<compile_context>
chip_gen: v7x
topology: tpu7x:2x2x1
jax: 0.10.0
libtpu: 0.0.40
codegen_flags: <defaults>
</compile_context>

<pallas_src>
import functools
import math

import jax
import jax.numpy as jnp
from jax.experimental import pallas as pl
from jax.experimental.pallas import tpu as pltpu


# ----------------------------------------------------------------------------
# Fused matmul + scale/bias + activation Pallas kernel
# ----------------------------------------------------------------------------

def _mm_kernel(x_ref, w_ref, s_ref, b_ref, o_ref, acc_ref, *, act):
    k = pl.program_id(2)

    @pl.when(k == 0)
    def _():
        acc_ref[...] = jnp.zeros_like(acc_ref)

    acc_ref[...] += jnp.dot(x_ref[...], w_ref[...],
                            preferred_element_type=jnp.float32)

    @pl.when(k == pl.num_programs(2) - 1)
    def _():
        y = acc_ref[...] * s_ref[...] + b_ref[...]
        if act == "relu":
            y = jnp.maximum(y, 0.0)
        elif act == "tanh":
            y = jnp.tanh(y)
        o_ref[...] = y.astype(o_ref.dtype)


def _round_up(x, m):
    return (x + m - 1) // m * m


def _pad_to(x, m, axis):
    r = (-x.shape[axis]) % m
    if r == 0:
        return x
    pad = [(0, 0)] * x.ndim
    pad[axis] = (0, r)
    return jnp.pad(x, pad)


def _pick_tile(dim, cap, mult):
    """Tile size that is a multiple of `mult`, <= cap, and divides padded dim."""
    padded = _round_up(dim, mult)
    if padded <= cap:
        return padded
    units = padded // mult
    for t in range(cap // mult, 0, -1):
        if units % t == 0:
            return t * mult
    return mult


def matmul_fused(x, w, scale, bias, act="none"):
    """y = act((x @ w) * scale + bias);  x:(M,K) w:(K,N) scale,bias:(N,)."""
    M, K = x.shape
    N = w.shape[1]

    # Generation-aware but VMEM-safe tile caps (fits easily in 64 MiB v7x VMEM,
    # lane-dense stores, divisor-aware K so no wasted MXU work on padding).
    TM = _pick_tile(M, 256, 16)     # 16: bf16 sublane packing
    TN = _pick_tile(N, 512, 128)
    TK = _pick_tile(K, 1024, 128)

    xp = _pad_to(_pad_to(x, TM, 0), TK, 1).astype(jnp.bfloat16)
    wp = _pad_to(_pad_to(w, TK, 0), TN, 1).astype(jnp.bfloat16)
    sp = _pad_to(scale.reshape(1, -1).astype(jnp.float32), TN, 1)
    bp = _pad_to(bias.reshape(1, -1).astype(jnp.float32), TN, 1)
    Mp, Kp = xp.shape
    Np = wp.shape[1]
    grid = (Mp // TM, Np // TN, Kp // TK)

    out = pl.pallas_call(
        functools.partial(_mm_kernel, act=act),
        out_shape=jax.ShapeDtypeStruct((Mp, Np), jnp.float32),
        grid_spec=pltpu.PrefetchScalarGridSpec(
            num_scalar_prefetch=0,
            grid=grid,
            in_specs=[
                pl.BlockSpec((TM, TK), lambda i, j, k: (i, k)),
                pl.BlockSpec((TK, TN), lambda i, j, k: (k, j)),
                pl.BlockSpec((1, TN), lambda i, j, k: (0, j)),
                pl.BlockSpec((1, TN), lambda i, j, k: (0, j)),
            ],
            out_specs=pl.BlockSpec((TM, TN), lambda i, j, k: (i, j)),
            scratch_shapes=[pltpu.VMEM((TM, TN), jnp.float32)],
        ),
        compiler_params=pltpu.CompilerParams(
            dimension_semantics=("parallel", "parallel", "arbitrary"),
            vmem_limit_bytes=64 * 1024 * 1024),
    )(xp, wp, sp, bp)
    return out[:M, :N]


# ----------------------------------------------------------------------------
# Conv2d via im2col + Pallas matmul (glue fused by the end-to-end jit)
# ----------------------------------------------------------------------------
# TODO(synk): patch extraction could be folded into the kernel's BlockSpec
#             index_map (shifted rectangular windows per (dy,dx) tap) to avoid
#             the k*k activation duplication entirely; at these layer sizes the
#             jit-fused im2col is already not the bottleneck.

def im2col(x, k, stride, pad):
    B, H, W, C = x.shape
    xp = jnp.pad(x, ((0, 0), (pad, pad), (pad, pad), (0, 0)))
    OH = (H + 2 * pad - k) // stride + 1
    OW = (W + 2 * pad - k) // stride + 1
    cols = []
    for dy in range(k):
        for dx in range(k):
            cols.append(xp[:, dy:dy + stride * (OH - 1) + 1:stride,
                           dx:dx + stride * (OW - 1) + 1:stride, :])
    patches = jnp.concatenate(cols, axis=-1)      # (B, OH, OW, k*k*C)
    return patches.reshape(B * OH * OW, k * k * C), (B, OH, OW)


def conv2d(x, w_hwio, scale, bias, stride, pad, act):
    k, _, cin, cout = w_hwio.shape
    patches, (B, OH, OW) = im2col(x, k, stride, pad)
    w2 = w_hwio.reshape(k * k * cin, cout)
    y = matmul_fused(patches, w2, scale, bias, act)
    return y.reshape(B, OH, OW, cout)


def pixel_shuffle_nhwc(x, r):
    """PyTorch nn.PixelShuffle(r) semantics, NHWC layout."""
    B, H, W, Cr2 = x.shape
    C = Cr2 // (r * r)
    x = x.reshape(B, H, W, C, r, r)
    x = jnp.transpose(x, (0, 1, 4, 2, 5, 3))      # (B, H, r, W, r, C)
    return x.reshape(B, H * r, W * r, C)


# ----------------------------------------------------------------------------
# Parameter init (PyTorch _initialize_weights semantics, deterministic)
# ----------------------------------------------------------------------------

def bn_fold(conv_bias, c, eps=1e-5):
    """Fold eval-mode BatchNorm2d (fresh BN: gamma=1, beta=0, mean=0, var=1)."""
    # TODO(synk): the PyTorch reference defaults to train-mode BN (batch stats);
    #             eval-mode running stats are folded here.
    scale = jnp.ones((c,), jnp.float32) / jnp.sqrt(1.0 + eps)
    bias = conv_bias.astype(jnp.float32) * scale
    return scale, bias


def init_espcn(key, scale_factor, num_channels, mid_channel):
    ks = jax.random.split(key, 5)

    def conv_w(k, cin, cout, ksize, std):
        return std * jax.random.normal(k, (ksize, ksize, cin, cout), jnp.float32)

    p = {}
    # first_part
    p["c1"] = {"w": conv_w(ks[0], num_channels, mid_channel, 5,
                           math.sqrt(2.0 / (mid_channel * 5 * 5))),
               "b": jnp.zeros((mid_channel,), jnp.float32)}
    p["c2"] = {"w": conv_w(ks[1], mid_channel, mid_channel // 2, 3,
                           math.sqrt(2.0 / ((mid_channel // 2) * 3 * 3))),
               "b": jnp.zeros((mid_channel // 2,), jnp.float32)}
    # last_part conv (in_channels == mid_channel//2 -> std 0.001)
    cout3 = num_channels * scale_factor ** 2
    p["c3"] = {"w": conv_w(ks[2], mid_channel // 2, cout3, 3, 0.001),
               "b": jnp.zeros((cout3,), jnp.float32)}
    # down block (dw_type == 'conv'): two Conv(4,2,1)+BN+ReLU
    stdd = math.sqrt(2.0 / (num_channels * 4 * 4))
    for name, kk in zip(("d1", "d2"), ks[3:5]):
        w = conv_w(kk, num_channels, num_channels, 4, stdd)
        b = jnp.zeros((num_channels,), jnp.float32)
        scale, bias = bn_fold(b, num_channels)
        p[name] = {"w": w, "scale": scale, "bias": bias}
    return p


# ----------------------------------------------------------------------------
# Forward pass (NCHW in, NCHW out) — jitted end-to-end
# ----------------------------------------------------------------------------

def espcn_forward(params, x_nchw, *, scale_factor):
    x = jnp.transpose(x_nchw, (0, 2, 3, 1)).astype(jnp.float32)   # NHWC
    nc = params["d1"]["w"].shape[-1]
    ones = lambda c: jnp.ones((c,), jnp.float32)

    # first_part: Conv(5, pad 2) + Tanh, Conv(3, pad 1) + Tanh
    x = conv2d(x, params["c1"]["w"], ones(params["c1"]["w"].shape[-1]),
               params["c1"]["b"], stride=1, pad=2, act="tanh")
    x = conv2d(x, params["c2"]["w"], ones(params["c2"]["w"].shape[-1]),
               params["c2"]["b"], stride=1, pad=1, act="tanh")

    # last_part: Conv(3, pad 1) + PixelShuffle
    x = conv2d(x, params["c3"]["w"], ones(params["c3"]["w"].shape[-1]),
               params["c3"]["b"], stride=1, pad=1, act="none")
    x = pixel_shuffle_nhwc(x, scale_factor)

    # down: Conv(4,2,1)+BN+ReLU, Conv(4,2,1)+BN+ReLU
    x = conv2d(x, params["d1"]["w"], params["d1"]["scale"],
               params["d1"]["bias"], stride=2, pad=1, act="relu")
    x = conv2d(x, params["d2"]["w"], params["d2"]["scale"],
               params["d2"]["bias"], stride=2, pad=1, act="relu")

    return jnp.transpose(x, (0, 3, 1, 2))    # back to NCHW
    del nc


# ----------------------------------------------------------------------------
# Main
# ----------------------------------------------------------------------------

if __name__ == "__main__":
    key = jax.random.PRNGKey(0)
    k_param, k_x = jax.random.split(key)

    # Small shapes consistent with the module (ESPCN(scale_factor=2,
    # num_channels=8, mid_channel=32, dw_type='conv')).
    scale_factor = 2
    num_channels = 8
    mid_channel = 32
    B, H, W = 2, 16, 16

    params = init_espcn(k_param, scale_factor, num_channels, mid_channel)
    x = jax.random.normal(k_x, (B, num_channels, H, W), jnp.float32)

    forward = jax.jit(functools.partial(espcn_forward,
                                        scale_factor=scale_factor))
    out = forward(params, x)
    jax.block_until_ready(out)

    # H*scale_factor downsampled 4x by the two stride-2 convs -> H*scale/4.
    expected = (B, num_channels, H * scale_factor // 4, W * scale_factor // 4)
    assert out.shape == expected, (out.shape, expected)
    assert bool(jnp.all(jnp.isfinite(out)))
    print("KERNEL_OK")
</pallas_src>

<mosaic_0001>
module attributes {stable_mosaic.version = 11 : i64} {
  func.func @_mm_kernel(%arg0: i32, %arg1: i32, %arg2: i32, %arg3: memref<256x256xbf16, #tpu.memory_space<vmem>>, %arg4: memref<256x128xbf16, #tpu.memory_space<vmem>>, %arg5: memref<1x128xf32, #tpu.memory_space<vmem>>, %arg6: memref<1x128xf32, #tpu.memory_space<vmem>>, %arg7: memref<256x128xf32, #tpu.memory_space<vmem>>, %arg8: memref<256x128xf32, #tpu.memory_space<vmem>>) attributes {dimension_semantics = [#tpu.dimension_semantics<parallel>, #tpu.dimension_semantics<parallel>, #tpu.dimension_semantics<arbitrary>], iteration_bounds = array<i64: 2, 1, 1>, scalar_prefetch = 0 : i64, scratch_operands = 1 : i64, tpu.core_type = #tpu.core_type<tc>, window_params = [{transform_indices = @transform_0, window_bounds = array<i64: 256, 256>}, {transform_indices = @transform_1, window_bounds = array<i64: 256, 128>}, {transform_indices = @transform_2, window_bounds = array<i64: 1, 128>}, {transform_indices = @transform_3, window_bounds = array<i64: 1, 128>}, {transform_indices = @transform_4, window_bounds = array<i64: 256, 128>}]} {
    %c0_i32 = arith.constant 0 : i32
    %0 = arith.cmpi eq, %arg2, %c0_i32 : i32
    %1 = arith.extui %0 : i1 to i32
    %c0_i32_0 = arith.constant 0 : i32
    %2 = arith.cmpi ne, %1, %c0_i32_0 : i32
    scf.if %2 {
      %cst_10 = arith.constant 0.000000e+00 : f32
      %12 = vector.broadcast %cst_10 : f32 to vector<256x128xf32>
      %c0_11 = arith.constant 0 : index
      %c0_12 = arith.constant 0 : index
      %13 = vector.load %arg8[%c0_11, %c0_12] : memref<256x128xf32, #tpu.memory_space<vmem>>, vector<256x128xf32>
      tpu.vector_store %arg8[%c0_11, %c0_12], %12 {strides = array<i32>} : memref<256x128xf32, #tpu.memory_space<vmem>>, vector<256x128xf32>,
    } else {
    }
    %c0 = arith.constant 0 : index
    %c0_1 = arith.constant 0 : index
    %3 = vector.load %arg8[%c0, %c0_1] : memref<256x128xf32, #tpu.memory_space<vmem>>, vector<256x128xf32>
    %c0_2 = arith.constant 0 : index
    %c0_3 = arith.constant 0 : index
    %4 = vector.load %arg3[%c0_2, %c0_3] : memref<256x256xbf16, #tpu.memory_space<vmem>>, vector<256x256xbf16>
    %c0_4 = arith.constant 0 : index
    %c0_5 = arith.constant 0 : index
    %5 = vector.load %arg4[%c0_4, %c0_5] : memref<256x128xbf16, #tpu.memory_space<vmem>>, vector<256x128xbf16>
    %cst = arith.constant dense<0.000000e+00> : vector<256x128xf32>
    %6 = tpu.matmul %4, %5, %cst {dimension_numbers = #tpu.dot_dimension_numbers<[1], [0], [0], [1], [0, 0, 1, 1], [], []>} : vector<256x256xbf16>, vector<256x128xbf16>, vector<256x128xf32> -> vector<256x128xf32>
    %7 = arith.addf %3, %6 : vector<256x128xf32>
    %c0_6 = arith.constant 0 : index
    %c0_7 = arith.constant 0 : index
    %8 = vector.load %arg8[%c0_6, %c0_7] : memref<256x128xf32, #tpu.memory_space<vmem>>, vector<256x128xf32>
    tpu.vector_store %arg8[%c0_6, %c0_7], %7 {strides = array<i32>} : memref<256x128xf32, #tpu.memory_space<vmem>>, vector<256x128xf32>,
    %c0_i32_8 = arith.constant 0 : i32
    %9 = arith.cmpi eq, %arg2, %c0_i32_8 : i32
    %10 = arith.extui %9 : i1 to i32
    %c0_i32_9 = arith.constant 0 : i32
    %11 = arith.cmpi ne, %10, %c0_i32_9 : i32
    scf.if %11 {
      %c0_10 = arith.constant 0 : index
      %c0_11 = arith.constant 0 : index
      %12 = vector.load %arg8[%c0_10, %c0_11] : memref<256x128xf32, #tpu.memory_space<vmem>>, vector<256x128xf32>
      %c0_12 = arith.constant 0 : index
      %c0_13 = arith.constant 0 : index
      %13 = vector.load %arg5[%c0_12, %c0_13] : memref<1x128xf32, #tpu.memory_space<vmem>>, vector<1x128xf32>
      %14 = vector.broadcast %13 : vector<1x128xf32> to vector<256x128xf32>
      %15 = arith.mulf %12, %14 : vector<256x128xf32>
      %c0_14 = arith.constant 0 : index
      %c0_15 = arith.constant 0 : index
      %16 = vector.load %arg6[%c0_14, %c0_15] : memref<1x128xf32, #tpu.memory_space<vmem>>, vector<1x128xf32>
      %17 = vector.broadcast %16 : vector<1x128xf32> to vector<256x128xf32>
      %18 = arith.addf %15, %17 : vector<256x128xf32>
      %19 = math.tanh %18 : vector<256x128xf32>
      %c0_16 = arith.constant 0 : index
      %c0_17 = arith.constant 0 : index
      %20 = vector.load %arg7[%c0_16, %c0_17] : memref<256x128xf32, #tpu.memory_space<vmem>>, vector<256x128xf32>
      tpu.vector_store %arg7[%c0_16, %c0_17], %19 {strides = array<i32>} : memref<256x128xf32, #tpu.memory_space<vmem>>, vector<256x128xf32>,
    } else {
    }
    return
  }
  func.func @transform_0(%arg0: i32, %arg1: i32, %arg2: i32) -> (i32, i32) {
    %c0_i32 = arith.constant 0 : i32
    return %arg0, %arg2 : i32, i32
  }
  func.func @transform_1(%arg0: i32, %arg1: i32, %arg2: i32) -> (i32, i32) {
    %c0_i32 = arith.constant 0 : i32
    return %arg2, %arg1 : i32, i32
  }
  func.func @transform_2(%arg0: i32, %arg1: i32, %arg2: i32) -> (i32, i32) {
    %c0_i32 = arith.constant 0 : i32
    %c0_i32_0 = arith.constant 0 : i32
    return %c0_i32, %arg1 : i32, i32
  }
  func.func @transform_3(%arg0: i32, %arg1: i32, %arg2: i32) -> (i32, i32) {
    %c0_i32 = arith.constant 0 : i32
    %c0_i32_0 = arith.constant 0 : i32
    return %c0_i32, %arg1 : i32, i32
  }
  func.func @transform_4(%arg0: i32, %arg1: i32, %arg2: i32) -> (i32, i32) {
    %c0_i32 = arith.constant 0 : i32
    return %arg0, %arg1 : i32, i32
  }
}

module attributes {stable_mosaic.version = 11 : i64} {
  func.func @_mm_kernel(%arg0: i32, %arg1: i32, %arg2: i32, %arg3: memref<256x384xbf16, #tpu.memory_space<vmem>>, %arg4: memref<384x128xbf16, #tpu.memory_space<vmem>>, %arg5: memref<1x128xf32, #tpu.memory_space<vmem>>, %arg6: memref<1x128xf32, #tpu.memory_space<vmem>>, %arg7: memref<256x128xf32, #tpu.memory_space<vmem>>, %arg8: memref<256x128xf32, #tpu.memory_space<vmem>>) attributes {dimension_semantics = [#tpu.dimension_semantics<parallel>, #tpu.dimension_semantics<parallel>, #tpu.dimension_semantics<arbitrary>], iteration_bounds = array<i64: 2, 1, 1>, scalar_prefetch = 0 : i64, scratch_operands = 1 : i64, tpu.core_type = #tpu.core_type<tc>, window_params = [{transform_indices = @transform_0, window_bounds = array<i64: 256, 384>}, {transform_indices = @transform_1, window_bounds = array<i64: 384, 128>}, {transform_indices = @transform_2, window_bounds = array<i64: 1, 128>}, {transform_indices = @transform_3, window_bounds = array<i64: 1, 128>}, {transform_indices = @transform_4, window_bounds = array<i64: 256, 128>}]} {
    %c0_i32 = arith.constant 0 : i32
    %0 = arith.cmpi eq, %arg2, %c0_i32 : i32
    %1 = arith.extui %0 : i1 to i32
    %c0_i32_0 = arith.constant 0 : i32
    %2 = arith.cmpi ne, %1, %c0_i32_0 : i32
    scf.if %2 {
      %cst_10 = arith.constant 0.000000e+00 : f32
      %12 = vector.broadcast %cst_10 : f32 to vector<256x128xf32>
      %c0_11 = arith.constant 0 : index
      %c0_12 = arith.constant 0 : index
      %13 = vector.load %arg8[%c0_11, %c0_12] : memref<256x128xf32, #tpu.memory_space<vmem>>, vector<256x128xf32>
      tpu.vector_store %arg8[%c0_11, %c0_12], %12 {strides = array<i32>} : memref<256x128xf32, #tpu.memory_space<vmem>>, vector<256x128xf32>,
    } else {
    }
    %c0 = arith.constant 0 : index
    %c0_1 = arith.constant 0 : index
    %3 = vector.load %arg8[%c0, %c0_1] : memref<256x128xf32, #tpu.memory_space<vmem>>, vector<256x128xf32>
    %c0_2 = arith.constant 0 : index
    %c0_3 = arith.constant 0 : index
    %4 = vector.load %arg3[%c0_2, %c0_3] : memref<256x384xbf16, #tpu.memory_space<vmem>>, vector<256x384xbf16>
    %c0_4 = arith.constant 0 : index
    %c0_5 = arith.constant 0 : index
    %5 = vector.load %arg4[%c0_4, %c0_5] : memref<384x128xbf16, #tpu.memory_space<vmem>>, vector<384x128xbf16>
    %cst = arith.constant dense<0.000000e+00> : vector<256x128xf32>
    %6 = tpu.matmul %4, %5, %cst {dimension_numbers = #tpu.dot_dimension_numbers<[1], [0], [0], [1], [0, 0, 1, 1], [], []>} : vector<256x384xbf16>, vector<384x128xbf16>, vector<256x128xf32> -> vector<256x128xf32>
    %7 = arith.addf %3, %6 : vector<256x128xf32>
    %c0_6 = arith.constant 0 : index
    %c0_7 = arith.constant 0 : index
    %8 = vector.load %arg8[%c0_6, %c0_7] : memref<256x128xf32, #tpu.memory_space<vmem>>, vector<256x128xf32>
    tpu.vector_store %arg8[%c0_6, %c0_7], %7 {strides = array<i32>} : memref<256x128xf32, #tpu.memory_space<vmem>>, vector<256x128xf32>,
    %c0_i32_8 = arith.constant 0 : i32
    %9 = arith.cmpi eq, %arg2, %c0_i32_8 : i32
    %10 = arith.extui %9 : i1 to i32
    %c0_i32_9 = arith.constant 0 : i32
    %11 = arith.cmpi ne, %10, %c0_i32_9 : i32
    scf.if %11 {
      %c0_10 = arith.constant 0 : index
      %c0_11 = arith.constant 0 : index
      %12 = vector.load %arg8[%c0_10, %c0_11] : memref<256x128xf32, #tpu.memory_space<vmem>>, vector<256x128xf32>
      %c0_12 = arith.constant 0 : index
      %c0_13 = arith.constant 0 : index
      %13 = vector.load %arg5[%c0_12, %c0_13] : memref<1x128xf32, #tpu.memory_space<vmem>>, vector<1x128xf32>
      %14 = vector.broadcast %13 : vector<1x128xf32> to vector<256x128xf32>
      %15 = arith.mulf %12, %14 : vector<256x128xf32>
      %c0_14 = arith.constant 0 : index
      %c0_15 = arith.constant 0 : index
      %16 = vector.load %arg6[%c0_14, %c0_15] : memref<1x128xf32, #tpu.memory_space<vmem>>, vector<1x128xf32>
      %17 = vector.broadcast %16 : vector<1x128xf32> to vector<256x128xf32>
      %18 = arith.addf %15, %17 : vector<256x128xf32>
      %19 = math.tanh %18 : vector<256x128xf32>
      %c0_16 = arith.constant 0 : index
      %c0_17 = arith.constant 0 : index
      %20 = vector.load %arg7[%c0_16, %c0_17] : memref<256x128xf32, #tpu.memory_space<vmem>>, vector<256x128xf32>
      tpu.vector_store %arg7[%c0_16, %c0_17], %19 {strides = array<i32>} : memref<256x128xf32, #tpu.memory_space<vmem>>, vector<256x128xf32>,
    } else {
    }
    return
  }
  func.func @transform_0(%arg0: i32, %arg1: i32, %arg2: i32) -> (i32, i32) {
    %c0_i32 = arith.constant 0 : i32
    return %arg0, %arg2 : i32, i32
  }
  func.func @transform_1(%arg0: i32, %arg1: i32, %arg2: i32) -> (i32, i32) {
    %c0_i32 = arith.constant 0 : i32
    return %arg2, %arg1 : i32, i32
  }
  func.func @transform_2(%arg0: i32, %arg1: i32, %arg2: i32) -> (i32, i32) {
    %c0_i32 = arith.constant 0 : i32
    %c0_i32_0 = arith.constant 0 : i32
    return %c0_i32, %arg1 : i32, i32
  }
  func.func @transform_3(%arg0: i32, %arg1: i32, %arg2: i32) -> (i32, i32) {
    %c0_i32 = arith.constant 0 : i32
    %c0_i32_0 = arith.constant 0 : i32
    return %c0_i32, %arg1 : i32, i32
  }
  func.func @transform_4(%arg0: i32, %arg1: i32, %arg2: i32) -> (i32, i32) {
    %c0_i32 = arith.constant 0 : i32
    return %arg0, %arg1 : i32, i32
  }
}

module attributes {stable_mosaic.version = 11 : i64} {
  func.func @_mm_kernel(%arg0: i32, %arg1: i32, %arg2: i32, %arg3: memref<256x256xbf16, #tpu.memory_space<vmem>>, %arg4: memref<256x128xbf16, #tpu.memory_space<vmem>>, %arg5: memref<1x128xf32, #tpu.memory_space<vmem>>, %arg6: memref<1x128xf32, #tpu.memory_space<vmem>>, %arg7: memref<256x128xf32, #tpu.memory_space<vmem>>, %arg8: memref<256x128xf32, #tpu.memory_space<vmem>>) attributes {dimension_semantics = [#tpu.dimension_semantics<parallel>, #tpu.dimension_semantics<parallel>, #tpu.dimension_semantics<arbitrary>], iteration_bounds = array<i64: 2, 1, 1>, scalar_prefetch = 0 : i64, scratch_operands = 1 : i64, tpu.core_type = #tpu.core_type<tc>, window_params = [{transform_indices = @transform_0, window_bounds = array<i64: 256, 256>}, {transform_indices = @transform_1, window_bounds = array<i64: 256, 128>}, {transform_indices = @transform_2, window_bounds = array<i64: 1, 128>}, {transform_indices = @transform_3, window_bounds = array<i64: 1, 128>}, {transform_indices = @transform_4, window_bounds = array<i64: 256, 128>}]} {
    %c0_i32 = arith.constant 0 : i32
    %0 = arith.cmpi eq, %arg2, %c0_i32 : i32
    %1 = arith.extui %0 : i1 to i32
    %c0_i32_0 = arith.constant 0 : i32
    %2 = arith.cmpi ne, %1, %c0_i32_0 : i32
    scf.if %2 {
      %cst_10 = arith.constant 0.000000e+00 : f32
      %12 = vector.broadcast %cst_10 : f32 to vector<256x128xf32>
      %c0_11 = arith.constant 0 : index
      %c0_12 = arith.constant 0 : index
      %13 = vector.load %arg8[%c0_11, %c0_12] : memref<256x128xf32, #tpu.memory_space<vmem>>, vector<256x128xf32>
      tpu.vector_store %arg8[%c0_11, %c0_12], %12 {strides = array<i32>} : memref<256x128xf32, #tpu.memory_space<vmem>>, vector<256x128xf32>,
    } else {
    }
    %c0 = arith.constant 0 : index
    %c0_1 = arith.constant 0 : index
    %3 = vector.load %arg8[%c0, %c0_1] : memref<256x128xf32, #tpu.memory_space<vmem>>, vector<256x128xf32>
    %c0_2 = arith.constant 0 : index
    %c0_3 = arith.constant 0 : index
    %4 = vector.load %arg3[%c0_2, %c0_3] : memref<256x256xbf16, #tpu.memory_space<vmem>>, vector<256x256xbf16>
    %c0_4 = arith.constant 0 : index
    %c0_5 = arith.constant 0 : index
    %5 = vector.load %arg4[%c0_4, %c0_5] : memref<256x128xbf16, #tpu.memory_space<vmem>>, vector<256x128xbf16>
    %cst = arith.constant dense<0.000000e+00> : vector<256x128xf32>
    %6 = tpu.matmul %4, %5, %cst {dimension_numbers = #tpu.dot_dimension_numbers<[1], [0], [0], [1], [0, 0, 1, 1], [], []>} : vector<256x256xbf16>, vector<256x128xbf16>, vector<256x128xf32> -> vector<256x128xf32>
    %7 = arith.addf %3, %6 : vector<256x128xf32>
    %c0_6 = arith.constant 0 : index
    %c0_7 = arith.constant 0 : index
    %8 = vector.load %arg8[%c0_6, %c0_7] : memref<256x128xf32, #tpu.memory_space<vmem>>, vector<256x128xf32>
    tpu.vector_store %arg8[%c0_6, %c0_7], %7 {strides = array<i32>} : memref<256x128xf32, #tpu.memory_space<vmem>>, vector<256x128xf32>,
    %c0_i32_8 = arith.constant 0 : i32
    %9 = arith.cmpi eq, %arg2, %c0_i32_8 : i32
    %10 = arith.extui %9 : i1 to i32
    %c0_i32_9 = arith.constant 0 : i32
    %11 = arith.cmpi ne, %10, %c0_i32_9 : i32
    scf.if %11 {
      %c0_10 = arith.constant 0 : index
      %c0_11 = arith.constant 0 : index
      %12 = vector.load %arg8[%c0_10, %c0_11] : memref<256x128xf32, #tpu.memory_space<vmem>>, vector<256x128xf32>
      %c0_12 = arith.constant 0 : index
      %c0_13 = arith.constant 0 : index
      %13 = vector.load %arg5[%c0_12, %c0_13] : memref<1x128xf32, #tpu.memory_space<vmem>>, vector<1x128xf32>
      %14 = vector.broadcast %13 : vector<1x128xf32> to vector<256x128xf32>
      %15 = arith.mulf %12, %14 : vector<256x128xf32>
      %c0_14 = arith.constant 0 : index
      %c0_15 = arith.constant 0 : index
      %16 = vector.load %arg6[%c0_14, %c0_15] : memref<1x128xf32, #tpu.memory_space<vmem>>, vector<1x128xf32>
      %17 = vector.broadcast %16 : vector<1x128xf32> to vector<256x128xf32>
      %18 = arith.addf %15, %17 : vector<256x128xf32>
      %c0_16 = arith.constant 0 : index
      %c0_17 = arith.constant 0 : index
      %19 = vector.load %arg7[%c0_16, %c0_17] : memref<256x128xf32, #tpu.memory_space<vmem>>, vector<256x128xf32>
      tpu.vector_store %arg7[%c0_16, %c0_17], %18 {strides = array<i32>} : memref<256x128xf32, #tpu.memory_space<vmem>>, vector<256x128xf32>,
    } else {
    }
    return
  }
  func.func @transform_0(%arg0: i32, %arg1: i32, %arg2: i32) -> (i32, i32) {
    %c0_i32 = arith.constant 0 : i32
    return %arg0, %arg2 : i32, i32
  }
  func.func @transform_1(%arg0: i32, %arg1: i32, %arg2: i32) -> (i32, i32) {
    %c0_i32 = arith.constant 0 : i32
    return %arg2, %arg1 : i32, i32
  }
  func.func @transform_2(%arg0: i32, %arg1: i32, %arg2: i32) -> (i32, i32) {
    %c0_i32 = arith.constant 0 : i32
    %c0_i32_0 = arith.constant 0 : i32
    return %c0_i32, %arg1 : i32, i32
  }
  func.func @transform_3(%arg0: i32, %arg1: i32, %arg2: i32) -> (i32, i32) {
    %c0_i32 = arith.constant 0 : i32
    %c0_i32_0 = arith.constant 0 : i32
    return %c0_i32, %arg1 : i32, i32
  }
  func.func @transform_4(%arg0: i32, %arg1: i32, %arg2: i32) -> (i32, i32) {
    %c0_i32 = arith.constant 0 : i32
    return %arg0, %arg1 : i32, i32
  }
}

module attributes {stable_mosaic.version = 11 : i64} {
  func.func @_mm_kernel(%arg0: i32, %arg1: i32, %arg2: i32, %arg3: memref<256x128xbf16, #tpu.memory_space<vmem>>, %arg4: memref<128x128xbf16, #tpu.memory_space<vmem>>, %arg5: memref<1x128xf32, #tpu.memory_space<vmem>>, %arg6: memref<1x128xf32, #tpu.memory_space<vmem>>, %arg7: memref<256x128xf32, #tpu.memory_space<vmem>>, %arg8: memref<256x128xf32, #tpu.memory_space<vmem>>) attributes {dimension_semantics = [#tpu.dimension_semantics<parallel>, #tpu.dimension_semantics<parallel>, #tpu.dimension_semantics<arbitrary>], iteration_bounds = array<i64: 2, 1, 1>, scalar_prefetch = 0 : i64, scratch_operands = 1 : i64, tpu.core_type = #tpu.core_type<tc>, window_params = [{transform_indices = @transform_0, window_bounds = array<i64: 256, 128>}, {transform_indices = @transform_1, window_bounds = array<i64: 128, 128>}, {transform_indices = @transform_2, window_bounds = array<i64: 1, 128>}, {transform_indices = @transform_3, window_bounds = array<i64: 1, 128>}, {transform_indices = @transform_4, window_bounds = array<i64: 256, 128>}]} {
    %c0_i32 = arith.constant 0 : i32
    %0 = arith.cmpi eq, %arg2, %c0_i32 : i32
    %1 = arith.extui %0 : i1 to i32
    %c0_i32_0 = arith.constant 0 : i32
    %2 = arith.cmpi ne, %1, %c0_i32_0 : i32
    scf.if %2 {
      %cst_10 = arith.constant 0.000000e+00 : f32
      %12 = vector.broadcast %cst_10 : f32 to vector<256x128xf32>
      %c0_11 = arith.constant 0 : index
      %c0_12 = arith.constant 0 : index
      %13 = vector.load %arg8[%c0_11, %c0_12] : memref<256x128xf32, #tpu.memory_space<vmem>>, vector<256x128xf32>
      tpu.vector_store %arg8[%c0_11, %c0_12], %12 {strides = array<i32>} : memref<256x128xf32, #tpu.memory_space<vmem>>, vector<256x128xf32>,
    } else {
    }
    %c0 = arith.constant 0 : index
    %c0_1 = arith.constant 0 : index
    %3 = vector.load %arg8[%c0, %c0_1] : memref<256x128xf32, #tpu.memory_space<vmem>>, vector<256x128xf32>
    %c0_2 = arith.constant 0 : index
    %c0_3 = arith.constant 0 : index
    %4 = vector.load %arg3[%c0_2, %c0_3] : memref<256x128xbf16, #tpu.memory_space<vmem>>, vector<256x128xbf16>
    %c0_4 = arith.constant 0 : index
    %c0_5 = arith.constant 0 : index
    %5 = vector.load %arg4[%c0_4, %c0_5] : memref<128x128xbf16, #tpu.memory_space<vmem>>, vector<128x128xbf16>
    %cst = arith.constant dense<0.000000e+00> : vector<256x128xf32>
    %6 = tpu.matmul %4, %5, %cst {dimension_numbers = #tpu.dot_dimension_numbers<[1], [0], [0], [1], [0, 0, 1, 1], [], []>} : vector<256x128xbf16>, vector<128x128xbf16>, vector<256x128xf32> -> vector<256x128xf32>
    %7 = arith.addf %3, %6 : vector<256x128xf32>
    %c0_6 = arith.constant 0 : index
    %c0_7 = arith.constant 0 : index
    %8 = vector.load %arg8[%c0_6, %c0_7] : memref<256x128xf32, #tpu.memory_space<vmem>>, vector<256x128xf32>
    tpu.vector_store %arg8[%c0_6, %c0_7], %7 {strides = array<i32>} : memref<256x128xf32, #tpu.memory_space<vmem>>, vector<256x128xf32>,
    %c0_i32_8 = arith.constant 0 : i32
    %9 = arith.cmpi eq, %arg2, %c0_i32_8 : i32
    %10 = arith.extui %9 : i1 to i32
    %c0_i32_9 = arith.constant 0 : i32
    %11 = arith.cmpi ne, %10, %c0_i32_9 : i32
    scf.if %11 {
      %c0_10 = arith.constant 0 : index
      %c0_11 = arith.constant 0 : index
      %12 = vector.load %arg8[%c0_10, %c0_11] : memref<256x128xf32, #tpu.memory_space<vmem>>, vector<256x128xf32>
      %c0_12 = arith.constant 0 : index
      %c0_13 = arith.constant 0 : index
      %13 = vector.load %arg5[%c0_12, %c0_13] : memref<1x128xf32, #tpu.memory_space<vmem>>, vector<1x128xf32>
      %14 = vector.broadcast %13 : vector<1x128xf32> to vector<256x128xf32>
      %15 = arith.mulf %12, %14 : vector<256x128xf32>
      %c0_14 = arith.constant 0 : index
      %c0_15 = arith.constant 0 : index
      %16 = vector.load %arg6[%c0_14, %c0_15] : memref<1x128xf32, #tpu.memory_space<vmem>>, vector<1x128xf32>
      %17 = vector.broadcast %16 : vector<1x128xf32> to vector<256x128xf32>
      %18 = arith.addf %15, %17 : vector<256x128xf32>
      %cst_16 = arith.constant 0.000000e+00 : f32
      %19 = vector.broadcast %cst_16 : f32 to vector<256x128xf32>
      %20 = arith.maximumf %18, %19 : vector<256x128xf32>
      %c0_17 = arith.constant 0 : index
      %c0_18 = arith.constant 0 : index
      %21 = vector.load %arg7[%c0_17, %c0_18] : memref<256x128xf32, #tpu.memory_space<vmem>>, vector<256x128xf32>
      tpu.vector_store %arg7[%c0_17, %c0_18], %20 {strides = array<i32>} : memref<256x128xf32, #tpu.memory_space<vmem>>, vector<256x128xf32>,
    } else {
    }
    return
  }
  func.func @transform_0(%arg0: i32, %arg1: i32, %arg2: i32) -> (i32, i32) {
    %c0_i32 = arith.constant 0 : i32
    return %arg0, %arg2 : i32, i32
  }
  func.func @transform_1(%arg0: i32, %arg1: i32, %arg2: i32) -> (i32, i32) {
    %c0_i32 = arith.constant 0 : i32
    return %arg2, %arg1 : i32, i32
  }
  func.func @transform_2(%arg0: i32, %arg1: i32, %arg2: i32) -> (i32, i32) {
    %c0_i32 = arith.constant 0 : i32
    %c0_i32_0 = arith.constant 0 : i32
    return %c0_i32, %arg1 : i32, i32
  }
  func.func @transform_3(%arg0: i32, %arg1: i32, %arg2: i32) -> (i32, i32) {
    %c0_i32 = arith.constant 0 : i32
    %c0_i32_0 = arith.constant 0 : i32
    return %c0_i32, %arg1 : i32, i32
  }
  func.func @transform_4(%arg0: i32, %arg1: i32, %arg2: i32) -> (i32, i32) {
    %c0_i32 = arith.constant 0 : i32
    return %arg0, %arg1 : i32, i32
  }
}

module attributes {stable_mosaic.version = 11 : i64} {
  func.func @_mm_kernel(%arg0: i32, %arg1: i32, %arg2: i32, %arg3: memref<128x128xbf16, #tpu.memory_space<vmem>>, %arg4: memref<128x128xbf16, #tpu.memory_space<vmem>>, %arg5: memref<1x128xf32, #tpu.memory_space<vmem>>, %arg6: memref<1x128xf32, #tpu.memory_space<vmem>>, %arg7: memref<128x128xf32, #tpu.memory_space<vmem>>, %arg8: memref<128x128xf32, #tpu.memory_space<vmem>>) attributes {dimension_semantics = [#tpu.dimension_semantics<parallel>, #tpu.dimension_semantics<parallel>, #tpu.dimension_semantics<arbitrary>], iteration_bounds = array<i64: 1, 1, 1>, scalar_prefetch = 0 : i64, scratch_operands = 1 : i64, tpu.core_type = #tpu.core_type<tc>, window_params = [{transform_indices = @transform_0, window_bounds = array<i64: 128, 128>}, {transform_indices = @transform_1, window_bounds = array<i64: 128, 128>}, {transform_indices = @transform_2, window_bounds = array<i64: 1, 128>}, {transform_indices = @transform_3, window_bounds = array<i64: 1, 128>}, {transform_indices = @transform_4, window_bounds = array<i64: 128, 128>}]} {
    %c0_i32 = arith.constant 0 : i32
    %0 = arith.cmpi eq, %arg2, %c0_i32 : i32
    %1 = arith.extui %0 : i1 to i32
    %c0_i32_0 = arith.constant 0 : i32
    %2 = arith.cmpi ne, %1, %c0_i32_0 : i32
    scf.if %2 {
      %cst_10 = arith.constant 0.000000e+00 : f32
      %12 = vector.broadcast %cst_10 : f32 to vector<128x128xf32>
      %c0_11 = arith.constant 0 : index
      %c0_12 = arith.constant 0 : index
      %13 = vector.load %arg8[%c0_11, %c0_12] : memref<128x128xf32, #tpu.memory_space<vmem>>, vector<128x128xf32>
      tpu.vector_store %arg8[%c0_11, %c0_12], %12 {strides = array<i32>} : memref<128x128xf32, #tpu.memory_space<vmem>>, vector<128x128xf32>,
    } else {
    }
    %c0 = arith.constant 0 : index
    %c0_1 = arith.constant 0 : index
    %3 = vector.load %arg8[%c0, %c0_1] : memref<128x128xf32, #tpu.memory_space<vmem>>, vector<128x128xf32>
    %c0_2 = arith.constant 0 : index
    %c0_3 = arith.constant 0 : index
    %4 = vector.load %arg3[%c0_2, %c0_3] : memref<128x128xbf16, #tpu.memory_space<vmem>>, vector<128x128xbf16>
    %c0_4 = arith.constant 0 : index
    %c0_5 = arith.constant 0 : index
    %5 = vector.load %arg4[%c0_4, %c0_5] : memref<128x128xbf16, #tpu.memory_space<vmem>>, vector<128x128xbf16>
    %cst = arith.constant dense<0.000000e+00> : vector<128x128xf32>
    %6 = tpu.matmul %4, %5, %cst {dimension_numbers = #tpu.dot_dimension_numbers<[1], [0], [0], [1], [0, 0, 1, 1], [], []>} : vector<128x128xbf16>, vector<128x128xbf16>, vector<128x128xf32> -> vector<128x128xf32>
    %7 = arith.addf %3, %6 : vector<128x128xf32>
    %c0_6 = arith.constant 0 : index
    %c0_7 = arith.constant 0 : index
    %8 = vector.load %arg8[%c0_6, %c0_7] : memref<128x128xf32, #tpu.memory_space<vmem>>, vector<128x128xf32>
    tpu.vector_store %arg8[%c0_6, %c0_7], %7 {strides = array<i32>} : memref<128x128xf32, #tpu.memory_space<vmem>>, vector<128x128xf32>,
    %c0_i32_8 = arith.constant 0 : i32
    %9 = arith.cmpi eq, %arg2, %c0_i32_8 : i32
    %10 = arith.extui %9 : i1 to i32
    %c0_i32_9 = arith.constant 0 : i32
    %11 = arith.cmpi ne, %10, %c0_i32_9 : i32
    scf.if %11 {
      %c0_10 = arith.constant 0 : index
      %c0_11 = arith.constant 0 : index
      %12 = vector.load %arg8[%c0_10, %c0_11] : memref<128x128xf32, #tpu.memory_space<vmem>>, vector<128x128xf32>
      %c0_12 = arith.constant 0 : index
      %c0_13 = arith.constant 0 : index
      %13 = vector.load %arg5[%c0_12, %c0_13] : memref<1x128xf32, #tpu.memory_space<vmem>>, vector<1x128xf32>
      %14 = vector.broadcast %13 : vector<1x128xf32> to vector<128x128xf32>
      %15 = arith.mulf %12, %14 : vector<128x128xf32>
      %c0_14 = arith.constant 0 : index
      %c0_15 = arith.constant 0 : index
      %16 = vector.load %arg6[%c0_14, %c0_15] : memref<1x128xf32, #tpu.memory_space<vmem>>, vector<1x128xf32>
      %17 = vector.broadcast %16 : vector<1x128xf32> to vector<128x128xf32>
      %18 = arith.addf %15, %17 : vector<128x128xf32>
      %cst_16 = arith.constant 0.000000e+00 : f32
      %19 = vector.broadcast %cst_16 : f32 to vector<128x128xf32>
      %20 = arith.maximumf %18, %19 : vector<128x128xf32>
      %c0_17 = arith.constant 0 : index
      %c0_18 = arith.constant 0 : index
      %21 = vector.load %arg7[%c0_17, %c0_18] : memref<128x128xf32, #tpu.memory_space<vmem>>, vector<128x128xf32>
      tpu.vector_store %arg7[%c0_17, %c0_18], %20 {strides = array<i32>} : memref<128x128xf32, #tpu.memory_space<vmem>>, vector<128x128xf32>,
    } else {
    }
    return
  }
  func.func @transform_0(%arg0: i32, %arg1: i32, %arg2: i32) -> (i32, i32) {
    %c0_i32 = arith.constant 0 : i32
    return %arg0, %arg2 : i32, i32
  }
  func.func @transform_1(%arg0: i32, %arg1: i32, %arg2: i32) -> (i32, i32) {
    %c0_i32 = arith.constant 0 : i32
    return %arg2, %arg1 : i32, i32
  }
  func.func @transform_2(%arg0: i32, %arg1: i32, %arg2: i32) -> (i32, i32) {
    %c0_i32 = arith.constant 0 : i32
    %c0_i32_0 = arith.constant 0 : i32
    return %c0_i32, %arg1 : i32, i32
  }
  func.func @transform_3(%arg0: i32, %arg1: i32, %arg2: i32) -> (i32, i32) {
    %c0_i32 = arith.constant 0 : i32
    %c0_i32_0 = arith.constant 0 : i32
    return %c0_i32, %arg1 : i32, i32
  }
  func.func @transform_4(%arg0: i32, %arg1: i32, %arg2: i32) -> (i32, i32) {
    %c0_i32 = arith.constant 0 : i32
    return %arg0, %arg1 : i32, i32
  }
}

</mosaic_0001>

<bundles_post_ra>
// kernel: espcn_forward.5
= control target key start
LH: loop header
LB: loop body
LE: loop exit
PB: predicated region body
PF: predicated region fallthrough
CT: control target
= control target key end

     0   :  { %9 = vsyncpa [#allocation4], 0  ;;  %s2337_s0 = inlined_call_operand.hbm [shape: bf16[512,256], index: 0, kind: input, shape index: {}]   ;;  %s2338_s1 = inlined_call_operand.hbm [shape: bf16[256,128], index: 1, kind: input, shape index: {}]   ;;  %s2339_s2 = inlined_call_operand.hbm [shape: f32[1,128], index: 2, kind: input, shape index: {}]   ;;  %s2340_s3 = inlined_call_operand.hbm [shape: f32[1,128], index: 3, kind: input, shape index: {}]   ;;  %s2341_s4 = inlined_call_operand.hbm [shape: f32[512,128], index: 4, kind: output, shape index: {}]  }
   0x1   :  { %11 = vsyncpa [#allocation4 + $0x1], 0 }
   0x2   :  { %12 = vsyncpa [#allocation7], 0 }
   0x3   :  { %13 = vsyncpa [#allocation10], 0 }
   0x4   :  { %14 = vsyncpa [#allocation5], 0 }
   0x5   :  { %16 = vsyncpa [#allocation5 + $0x1], 0  ;;  %s1915_s15 = smov 0   ;;  %s1917_s16 = smov 0  }
   0x6   :  { %s1919_s17 = smov 0   ;;  %s1921_s18 = smov 0  }
   0x7   :  { %s1923_s19 = smov 0   ;;  %s1925_s20 = smov 0  }
   0x8 LB: > { %s1243_s21 = sadd.s32 4294967295, %s1877_s20   ;;  %s1244_s22 = sadd.s32 4294967294, %s1877_s20   ;;  %s1877_s20 = sphi %s1925_s20, %s22_s20   ;;  %s1873_s19 = sphi %s1923_s19, %s2368_s19   ;;  %s1869_s18 = sphi %s1921_s18, %s2367_s18   ;;  %s1865_s17 = sphi %s1919_s17, %s2366_s17   ;;  %s1861_s16 = sphi %s1917_s16, %s2365_s16   ;;  %s1857_s15 = sphi %s1915_s15, %s2364_s15  }
   0x9   : > { %p63_p0 = scmp.ne.s32.totalorder %s1861_s16, %s1857_s15  ;;  %p1949_p1 = scmp.eq.s32.totalorder %s1243_s21, 0 }
   0xa   : > { %p1953_p2 = scmp.eq.s32.totalorder %s1243_s21, 1  ;;  %p175_p3 = scmp.eq.s32.totalorder %s1244_s22, 1 }
   0xb   : > { %s2347_s23 = scalar_select %p1949_p1, 1, 0 }
   0xc   : > { %s2348_s24 = scalar_select %p1953_p2, 1, 0 }
   0xd   : > { %p1959_p4 = por %p1949_p1, %p63_p0  ;;  %p1245_p5 = scmp.ge.s32.totalorder %s1877_s20, 1 }
   0xe   : > { %p1964_p6 = por %p175_p3, %p63_p0  ;;  %p182_p7 = scmp.lt.s32.totalorder %s1877_s20, 3 }
   0xf   : > { %s2349_s25 = scalar_select %p1959_p4, 1, 0 }
  0x10   : > { %s2350_s26 = scalar_select %p1964_p6, 1, 0 }
  0x11   : > { %p1969_p8 = pnand %p1245_p5, %p182_p7  ;;  %s1879_s28 = smov [#allocation6]  }
  0x12   : > { %2351 = sst [smem:[#allocation16_spill]] %s2350_s26  ;;  %s198_s29 = sshll.u32 %s1879_s28, 4  ;;  %s1973_s29 = int_to_ptr.vmem [resolvable:$true] %s198_s29 }
  0x13   : > { %s2352_s27 = scalar_select %p1969_p8, 1, 0 }
  0x14   : > { %p1462_p9 = pneg %p1969_p8  ;;  %s1880_s5 = smov [#allocation8]  }
  0x15   : > { %s214_s6 = sshll.u32 %s1880_s5, 4  ;;  %s1881_s7 = smov [#allocation9]   ;;  %s1984_s6 = int_to_ptr.vmem [resolvable:$true] %s214_s6 }
  0x16   : > { %p1980_p11 = pnand %p1462_p9, %p1949_p1  ;;  %s1986_s8 = sshll.u32 %s1881_s7, 4  ;;  %s228_s8 = int_to_ptr.vmem [resolvable:$true] %s1986_s8 }
  0x17   : > { %s1673_s11 = scalar_lea.hbm %s2338_s1, 2048 }
  0x18   : > { %p1674_p12 = scmp.ne.s32.totalorder %s2338_s1, %s1673_s11  ;;  %p1996_p13 = pneg %p1980_p11 }
  0x19   : > { %p1680_p5 = scmp.lt.u32.totalorder %s1673_s11, %s2338_s1 }
  0x1a   : > { %p1676_p0 = pnand %p1996_p13, %p1674_p12 }
  0x1c   : > { %p1677_p3 = pneg %p1676_p0 }
  0x1e   : > { %p1682_p7 = pnand %p1680_p5, %p1677_p3 }
  0x20   : > { %1685 = shalt.err (!%p1682_p7)
}
  0x21   : > { %s1686_s28 = scalar_lea.vmem %s1973_s29, 2048  ;;  %p1694_p1 = scmp.lt.s32.totalorder %s1973_s29, %s1973_s29 }
  0x22   : > { %p1687_p9 = scmp.ne.s32.totalorder %s1973_s29, %s1686_s28  ;;  %p1695_p4 = scmp.lt.s32.totalorder %s1686_s28, %s1686_s28 }
  0x24   : > { %p1689_p10 = pnand %p1687_p9, %p1996_p13  ;;  %p1696_p12 = por %p1695_p4, %p1694_p1 }
  0x26   : > { %p1690_p6 = pneg %p1689_p10 }
  0x28   : > { %p1697_p0 = pnand %p1696_p12, %p1690_p6 }
  0x2a   : > { %1700 = shalt.err (!%p1697_p0)
}
  0x2b   : > { %s1882_s5 = smov 64   ;;  %s1883_s7 = smov 4  }
  0x2c   : > { %1465 = dma.hbm_to_vmem [thread:$0]  (!%p1980_p11), %s2338_s1, 2048, %s1973_s29, [#allocation7], %s1882_s5, %s1882_s5, %s1883_s7  }
  0x2d   : > { %s1701_s13 = scalar_lea.hbm %s2339_s2, 16 }
  0x2e   : > { %p1702_p1 = scmp.ne.s32.totalorder %s2339_s2, %s1701_s13  ;;  %p1708_p10 = scmp.lt.u32.totalorder %s1701_s13, %s2339_s2 }
  0x30   : > { %p1704_p4 = pnand %p1702_p1, %p1996_p13 }
  0x32   : > { %p1705_p6 = pneg %p1704_p4 }
  0x34   : > { %p1710_p3 = pnand %p1708_p10, %p1705_p6 }
  0x36   : > { %1713 = shalt.err (!%p1710_p3)
}
  0x37   : > { %s1714_s29 = scalar_lea.vmem %s1984_s6, 16  ;;  %s1721_s5 = scalar_lea.vmem %s1984_s6, 32 }
  0x38   : > { %p1715_p5 = scmp.ne.s32.totalorder %s1984_s6, %s1714_s29  ;;  %p1722_p12 = scmp.lt.s32.totalorder %s1984_s6, %s1984_s6 }
  0x39   : > { %p1723_p0 = scmp.lt.s32.totalorder %s1721_s5, %s1714_s29 }
  0x3a   : > { %p1717_p7 = pnand %p1715_p5, %p1996_p13 }
  0x3b   : > { %p1724_p1 = por %p1723_p0, %p1722_p12 }
  0x3c   : > { %p1718_p9 = pneg %p1717_p7 }
  0x3e   : > { %p1725_p4 = pnand %p1724_p1, %p1718_p9 }
  0x40   : > { %1728 = shalt.err (!%p1725_p4)
}
  0x41   : > { %1468 = dma.hbm_to_vmem [thread:$0]  (!%p1980_p11), %s2339_s2, 16, %s1984_s6, [#allocation7]  }
  0x42   : > { %s1729_s11 = scalar_lea.hbm %s2340_s3, 16 }
  0x43   : > { %p1730_p6 = scmp.ne.s32.totalorder %s2340_s3, %s1729_s11  ;;  %p1736_p5 = scmp.lt.u32.totalorder %s1729_s11, %s2340_s3 }
  0x45   : > { %p1732_p10 = pnand %p1730_p6, %p1996_p13 }
  0x47   : > { %p1733_p3 = pneg %p1732_p10 }
  0x49   : > { %p1738_p7 = pnand %p1736_p5, %p1733_p3 }
  0x4b   : > { %1741 = shalt.err (!%p1738_p7)
}
  0x4c   : > { %s1742_s28 = scalar_lea.vmem %s228_s8, 16  ;;  %s1749_s6 = scalar_lea.vmem %s228_s8, 32 }
  0x4d   : > { %p1743_p9 = scmp.ne.s32.totalorder %s228_s8, %s1742_s28  ;;  %p1750_p1 = scmp.lt.s32.totalorder %s228_s8, %s228_s8 }
  0x4e   : > { %p1751_p4 = scmp.lt.s32.totalorder %s1749_s6, %s1742_s28 }
  0x4f   : > { %p1745_p12 = pnand %p1743_p9, %p1996_p13 }
  0x50   : > { %p1752_p8 = por %p1751_p4, %p1750_p1 }
  0x51   : > { %p1746_p0 = pneg %p1745_p12 }
  0x53   : > { %p1753_p2 = pnand %p1752_p8, %p1746_p0 }
  0x55   : > { %1756 = shalt.err (!%p1753_p2)
}
  0x56   : > { %1471 = dma.hbm_to_vmem [thread:$0]  (!%p1980_p11), %s2340_s3, 16, %s228_s8, [#allocation10]  }
  0x57   : > { %s50_s14 = sadd.s32 1, %s1865_s17  ;;  %s41_s26 = sadd.s32 1, %s1873_s19 }
  0x58   : > { %p57_p2 = scmp.ne.s32.totalorder %s1865_s17, %s1861_s16  ;;  %p43_p8 = scmp.ge.s32.totalorder %s41_s26, 2 }
  0x59   : > { %p58_p13 = scmp.eq.s32.totalorder %s1877_s20, 0  ;;  %p2355_p6 = scmp.ne.s32.totalorder %s2348_s24, 0 }
  0x5a   : > { %p1483_p3 = scmp.lt.s32.totalorder %s1877_s20, 2  ;;  %s2370_s26 = smov (%p43_p8, %s41_s26), 0 }
  0x5b   : > { %p2067_p10 = por %p2355_p6, %p57_p2  ;;  %p59_p5 = por %p58_p13, %p57_p2 }
  0x5c   : > { %s238_s7 = sand.u32 1, %s1865_s17   ;;  %s45_s9 = ssub.s32 %s1873_s19, %s2370_s26 }
  0x5d   : > { %p48_p7 = scmp.eq.s32.totalorder %s45_s9, 0  ;;  %s1250_s8 = sshll.u32 %s238_s7, 8 }
  0x5e   : > { %s1316_s10 = sshll.u32 %s1873_s19, 12  ;;  %s242_s21 = scalar_lea.vmem [#allocation3], %s1250_s8 }
  0x5f   : > { %s2079_s11 = scalar_select %p48_p7, %s1865_s17, %s50_s14  }
  0x60   : > { %s2084_s24 = scalar_lea.hbm %s2337_s0, %s1316_s10  ;;  %s252_s22 = sshll.u32 %s242_s21, 4  ;;  %s2086_s22 = int_to_ptr.vmem [resolvable:$true] %s252_s22 }
  0x61   : > { %p2090_p11 = pnand %p1483_p3, %p59_p5  ;;  %s2094_s6 = scalar_lea.sflag [#allocation4], %s238_s7 }
  0x62   : > { %s1757_s29 = scalar_lea.hbm %s2084_s24, 4096  ;;  %s1762_s9 = scalar_lea.hbm %s2337_s0, 8192 }
  0x63   : > { %p1758_p9 = scmp.ne.s32.totalorder %s2084_s24, %s1757_s29  ;;  %p1759_p12 = pneg %p2090_p11 }
  0x64   : > { %p1763_p4 = scmp.lt.u32.totalorder %s2084_s24, %s2337_s0  ;;  %p1764_p2 = scmp.lt.u32.totalorder %s1762_s9, %s1757_s29 }
  0x65   : > { %p1760_p0 = pnand %p1759_p12, %p1758_p9  ;;  %p1766_p13 = scmp.lt.u32.totalorder %s1757_s29, %s2084_s24 }
  0x66   : > { %p1765_p8 = por %p1764_p2, %p1763_p4 }
  0x67   : > { %p1761_p1 = pneg %p1760_p0 }
  0x68   : > { %p1767_p6 = por %p1766_p13, %p1765_p8 }
  0x6a   : > { %p1768_p3 = pnand %p1767_p6, %p1761_p1 }
  0x6c   : > { %1771 = shalt.err (!%p1768_p3)
}
  0x6d   : > { %s1772_s7 = scalar_lea.vmem %s2086_s22, 4096  ;;  %s1884_s12 = smov [#allocation3]  }
  0x6e   : > { %p1773_p5 = scmp.ne.s32.totalorder %s2086_s22, %s1772_s7  ;;  %s1777_s13 = sshll.u32 %s1884_s12, 4  ;;  %s1778_s13 = int_to_ptr.vmem [resolvable:$false] %s1777_s13 }
  0x6f   : > { %s1779_s21 = scalar_lea.vmem %s1778_s13, 8192  ;;  %p1780_p0 = scmp.lt.s32.totalorder %s2086_s22, %s1778_s13 }
  0x70   : > { %p1775_p7 = pnand %p1773_p5, %p1759_p12  ;;  %p1781_p4 = scmp.lt.s32.totalorder %s1779_s21, %s1772_s7 }
  0x72   : > { %p1776_p9 = pneg %p1775_p7  ;;  %p1782_p2 = por %p1781_p4, %p1780_p0 }
  0x74   : > { %p1783_p8 = pnand %p1782_p2, %p1776_p9 }
  0x76   : > { %1786 = shalt.err (!%p1783_p8)
}
  0x77   : > { %s1885_s29 = smov 128   ;;  %s1886_s5 = smov 8  }
  0x78   : > { %1475 = dma.hbm_to_vmem [thread:$0]  (!%p2090_p11), %s2084_s24, 4096, %s2086_s22, %s2094_s6, %s1885_s29, %s1885_s29, %s1886_s5  }
  0x79   : > { %p2358_p12 = scmp.ne.s32.totalorder %s2352_s27, 0 }
  0x7a   : > { %s2125_s14 = sand.u32 (!%p2358_p12), 1, %s1861_s16   ;;  %p2359_p1 = scmp.ne.s32.totalorder (!%p2358_p12), %s2349_s25, 0 }
  0x7b   : > { %264 = sbr.rel (%p2358_p12) target bundleno = 474 (0x1da), region = 36  ;;  %s1255_s9 = sshll.u32 (!%p2358_p12), %s2125_s14, 8 }
  0x7c   : > { %s267_s8 = scalar_lea.sflag (!%p2358_p12), [#allocation4], %s2125_s14  ;;  %s2131_s10 = scalar_lea.vmem (!%p2358_p12), [#allocation3], %s1255_s9 }
  0x82   : > { %1840 = dma.done.wait (%p2359_p1), %s267_s8, 4096  }
  0x83   : > { %1842 = vsyncadd (%p2359_p1), %s267_s8, 4294963200  ;;  %p2360_p11 = scmp.ne.s32.totalorder %s2347_s23, 0 }
  0x85   : > { %1844 = dma.done.wait (%p2360_p11), [#allocation7], 2064  }
  0x86   : > { %1846 = vsyncadd (%p2360_p11), [#allocation7], 4294965232 }
  0x87   : > { %1848 = dma.done.wait (%p2360_p11), [#allocation10], 16  }
  0x88   : > { %1850 = vsyncadd (%p2360_p11), [#allocation10], 4294967280  ;;  %v1545_v0 = vld [vmem:[#allocation6 + $0x40] sm:$0xff]   ;;  %v1547_v2 = vld [vmem:[#allocation6 + $0x48] sm:$0xff]   ;;  %s2199_s23 = scalar_lea.vmem [#allocation11], %s1255_s9  ;;  %s1317_s25 = sshll.u32 %s1869_s18, 12 }
  0x89   : > { %v1546_v1 = vld [vmem:[#allocation6] sm:$0xff]   ;;  %1318 = vmatprep.subr.bf16.mxu0 %v1545_v0  ;;  %1430 = vmatprep.subr.bf16.mxu1 %v1545_v0  ;;  %v1548_v3 = vld [vmem:[#allocation6 + $0x8] sm:$0xff]   ;;  %v1549_v4 = vld [vmem:[#allocation6 + $0x50] sm:$0xff]   ;;  %s1117_s27 = sshll.u32 %s2199_s23, 4  ;;  %s2283_s28 = scalar_lea.hbm %s2341_s4, %s1317_s25  ;;  %s2285_s27 = int_to_ptr.vmem [resolvable:$true] %s1117_s27 }
  0x8a   : > { %1319 = vmatpush3.bf16.msra.mxu0 %v1546_v1  ;;  %1438 = vmatpush3.bf16.msra.mxu1 %v1546_v1  ;;  %v1550_v5 = vld [vmem:[#allocation6 + $0x10] sm:$0xff]   ;;  %v1551_v6 = vld [vmem:[#allocation6 + $0x58] sm:$0xff]   ;;  %v1553_v8 = vld [vmem:[#allocation6 + $0x60] sm:$0xff]   ;;  %s1103_s18 = scalar_lea.sflag [#allocation5], %s2125_s14  ;;  %s1787_s6 = scalar_lea.vmem %s2285_s27, 4096 }
  0x8b   : > { %1320 = vmatprep.subr.bf16.mxu0 %v1547_v2  ;;  %1431 = vmatprep.subr.bf16.mxu1 %v1547_v2  ;;  %v1552_v7 = vld [vmem:[#allocation6 + $0x18] sm:$0xff]   ;;  %v1554_v9 = vld [vmem:[#allocation6 + $0x20] sm:$0xff]   ;;  %v1555_v10 = vld [vmem:[#allocation6 + $0x68] sm:$0xff]   ;;  %p1788_p13 = scmp.ne.s32.totalorder %s2285_s27, %s1787_s6  ;;  %s1887_s7 = smov [#allocation11]  }
  0x8c   : > { %v1563_v11 = vld [vmem:[%s2131_s10 + $0x4] ss:$8 sps:$4 sm:$0xff]   ;;  %v1557_v14 = vld [vmem:[#allocation6 + $0x70] sm:$0xff]   ;;  %v1559_v16 = vld [vmem:[#allocation6 + $0x78] sm:$0xff]   ;;  %s1791_s12 = sshll.u32 %s1887_s7, 4  ;;  %s1792_s12 = int_to_ptr.vmem [resolvable:$false] %s1791_s12 }
  0x8d   : > { %v1566_v12 = vld [vmem:[%s2131_s10 + $0x84] ss:$8 sps:$4 sm:$0xff]   ;;  %732 = vmatprep.mubr.bf16.mxu0 %v1563_v11  ;;  %v1558_v15 = vld [vmem:[#allocation6 + $0x30] sm:$0xff]   ;;  %v1560_v17 = vld [vmem:[#allocation6 + $0x38] sm:$0xff]   ;;  %p1789_p6 = pnand %p1788_p13, %p2067_p10  ;;  %s1793_s13 = scalar_lea.vmem %s1792_s12, 8192 }
  0x8e   : > { %1321 = vmatpush3.bf16.msra.mxu0 %v1548_v3  ;;  %1439 = vmatpush3.bf16.msra.mxu1 %v1548_v3  ;;  %v1556_v13 = vld [vmem:[#allocation6 + $0x28] sm:$0xff]   ;;  %v1567_v20 = vld [vmem:[%s2131_s10 + $0x14] ss:$8 sps:$4 sm:$0xff]   ;;  %v1571_v22 = vld [vmem:[%s2131_s10 + $0x10] ss:$8 sps:$4 sm:$0xff]   ;;  %p1794_p5 = scmp.lt.s32.totalorder %s2285_s27, %s1792_s12  ;;  %p1795_p7 = scmp.lt.s32.totalorder %s1793_s13, %s1787_s6 }
  0x8f   : > { %1322 = vmatprep.subr.bf16.mxu0 %v1549_v4  ;;  %1432 = vmatprep.subr.bf16.mxu1 %v1549_v4  ;;  %v1561_v18 = vld [vmem:[%s2131_s10] ss:$8 sps:$4 sm:$0xff]   ;;  %v1569_v21 = vld [vmem:[%s2131_s10 + $0x94] ss:$8 sps:$4 sm:$0xff]   ;;  %v1572_v23 = vld [vmem:[%s2131_s10 + $0x90] ss:$8 sps:$4 sm:$0xff]   ;;  %p1790_p3 = pneg %p1789_p6 }
  0x90   : > { %796 = vmatprep.mubr.bf16.mxu1 %v1566_v12  ;;  %v1564_v19 = vld [vmem:[%s2131_s10 + $0x80] ss:$8 sps:$4 sm:$0xff]   ;;  %v1573_v24 = vld [vmem:[%s2131_s10 + $0x24] ss:$8 sps:$4 sm:$0xff]   ;;  %v1579_v28 = vld [vmem:[%s2131_s10 + $0x34] ss:$8 sps:$4 sm:$0xff]   ;;  %p1796_p9 = por %p1795_p7, %p1794_p5 }
  0x91   : > { %v1575_v25 = vld [vmem:[%s2131_s10 + $0xa4] ss:$8 sps:$4 sm:$0xff]   ;;  %v1577_v26 = vld [vmem:[%s2131_s10 + $0x20] ss:$8 sps:$4 sm:$0xff]   ;;  %v1581_v29 = vld [vmem:[%s2131_s10 + $0xb4] ss:$8 sps:$4 sm:$0xff]  }
  0x92   : > { %1323 = vmatpush3.bf16.msra.mxu0 %v1550_v5  ;;  %1440 = vmatpush3.bf16.msra.mxu1 %v1550_v5  ;;  %v1578_v27 = vld [vmem:[%s2131_s10 + $0xa0] ss:$8 sps:$4 sm:$0xff]   ;;  %v1583_v30 = vld [vmem:[%s2131_s10 + $0x30] ss:$8 sps:$4 sm:$0xff]   ;;  %v1585_v32 = vld [vmem:[%s2131_s10 + $0x44] ss:$8 sps:$4 sm:$0xff]   ;;  %p1797_p0 = pnand %p1796_p9, %p1790_p3 }
  0x93   : > { %1324 = vmatprep.subr.bf16.mxu0 %v1551_v6  ;;  %1433 = vmatprep.subr.bf16.mxu1 %v1551_v6  ;;  %v1584_v31 = vld [vmem:[%s2131_s10 + $0xb0] ss:$8 sps:$4 sm:$0xff]   ;;  %v1587_v33 = vld [vmem:[%s2131_s10 + $0xc4] ss:$8 sps:$4 sm:$0xff]   ;;  %v1589_v34 = vld [vmem:[%s2131_s10 + $0x40] ss:$8 sps:$4 sm:$0xff]  }
  0x94   : > { %v1590_v35 = vld [vmem:[%s2131_s10 + $0xc0] ss:$8 sps:$4 sm:$0xff]   ;;  %v1591_v36 = vld [vmem:[%s2131_s10 + $0x54] ss:$8 sps:$4 sm:$0xff]   ;;  %v1595_v38 = vld [vmem:[%s2131_s10 + $0x50] ss:$8 sps:$4 sm:$0xff]  }
  0x95   : > { %v1593_v37 = vld [vmem:[%s2131_s10 + $0xd4] ss:$8 sps:$4 sm:$0xff]   ;;  %v1596_v39 = vld [vmem:[%s2131_s10 + $0xd0] ss:$8 sps:$4 sm:$0xff]   ;;  %v1597_v40 = vld [vmem:[%s2131_s10 + $0x64] ss:$8 sps:$4 sm:$0xff]  }
  0x96   : > { %1325 = vmatpush3.bf16.msra.mxu0 %v1552_v7  ;;  %1441 = vmatpush3.bf16.msra.mxu1 %v1552_v7  ;;  %v1599_v41 = vld [vmem:[%s2131_s10 + $0xe4] ss:$8 sps:$4 sm:$0xff]   ;;  %v1601_v42 = vld [vmem:[%s2131_s10 + $0x60] ss:$8 sps:$4 sm:$0xff]   ;;  %v1603_v44 = vld [vmem:[%s2131_s10 + $0x74] ss:$8 sps:$4 sm:$0xff]  }
  0x97   : > { %1326 = vmatprep.subr.bf16.mxu0 %v1553_v8  ;;  %1434 = vmatprep.subr.bf16.mxu1 %v1553_v8  ;;  %v1602_v43 = vld [vmem:[%s2131_s10 + $0xe0] ss:$8 sps:$4 sm:$0xff]   ;;  %v1605_v45 = vld [vmem:[%s2131_s10 + $0xf4] ss:$8 sps:$4 sm:$0xff]   ;;  %v1607_v46 = vld [vmem:[%s2131_s10 + $0x70] ss:$8 sps:$4 sm:$0xff]  }
  0x98   : > { %v1608_v47 = vld [vmem:[%s2131_s10 + $0xf0] ss:$8 sps:$4 sm:$0xff]   ;;  %v2177_v51 = vld [vmem:[#allocation8] ss:$0 sm:$0xff]  ;;  %v2179_v57 = vld [vmem:[#allocation9] ss:$0 sm:$0xff] }
  0x9a   : > { %1327 = vmatpush3.bf16.msra.mxu0 %v1554_v9  ;;  %1442 = vmatpush3.bf16.msra.mxu1 %v1554_v9 }
  0x9b   : > { %1328 = vmatprep.subr.bf16.mxu0 %v1555_v10  ;;  %1435 = vmatprep.subr.bf16.mxu1 %v1555_v10 }
  0x9e   : > { %1329 = vmatpush3.bf16.msra.mxu0 %v1556_v13  ;;  %1443 = vmatpush3.bf16.msra.mxu1 %v1556_v13 }
  0x9f   : > { %1330 = vmatprep.subr.bf16.mxu0 %v1557_v14  ;;  %1436 = vmatprep.subr.bf16.mxu1 %v1557_v14 }
  0xa2   : > { %1331 = vmatpush3.bf16.msra.mxu0 %v1558_v15  ;;  %1444 = vmatpush3.bf16.msra.mxu1 %v1558_v15 }
  0xa3   : > { %1332 = vmatprep.subr.bf16.mxu0 %v1559_v16  ;;  %1437 = vmatprep.subr.bf16.mxu1 %v1559_v16 }
  0xa6   : > { %1333 = vmatpush3.bf16.msra.mxu0 %v1560_v17  ;;  %1445 = vmatpush3.bf16.msra.mxu1 %v1560_v17 }
  0xa9   : > { %733 = vmatmul.mubr.bf16.vlgmr.msra.gmra.mrb[0].mxu0 %v1561_v18  ;;  %797 = vmatmul.mubr.bf16.vlgmr.msra.gmra.mrb[0].mxu1 %v1564_v19 }
  0xaa   : > { %740 = vmatprep.mubr.bf16.mxu0 %v1567_v20  ;;  %804 = vmatprep.mubr.bf16.mxu1 %v1569_v21 }
  0xb1   : > { %741 = vmatmul.mubr.bf16.gmra.mrb[4].mxu0 %v1571_v22  ;;  %805 = vmatmul.mubr.bf16.gmra.mrb[4].mxu1 %v1572_v23 }
  0xb2   : > { %748 = vmatprep.mubr.bf16.mxu0 %v1573_v24  ;;  %812 = vmatprep.mubr.bf16.mxu1 %v1575_v25 }
  0xb9   : > { %749 = vmatmul.mubr.bf16.gmra.mrb[8].mxu0 %v1577_v26  ;;  %813 = vmatmul.mubr.bf16.gmra.mrb[8].mxu1 %v1578_v27 }
  0xba   : > { %756 = vmatprep.mubr.bf16.mxu0 %v1579_v28  ;;  %820 = vmatprep.mubr.bf16.mxu1 %v1581_v29 }
  0xc1   : > { %757 = vmatmul.mubr.bf16.gmra.mrb[12].mxu0 %v1583_v30  ;;  %821 = vmatmul.mubr.bf16.gmra.mrb[12].mxu1 %v1584_v31 }
  0xc2   : > { %764 = vmatprep.mubr.bf16.mxu0 %v1585_v32  ;;  %828 = vmatprep.mubr.bf16.mxu1 %v1587_v33 }
  0xc9   : > { %765 = vmatmul.mubr.bf16.gmra.mrb[16].mxu0 %v1589_v34  ;;  %829 = vmatmul.mubr.bf16.gmra.mrb[16].mxu1 %v1590_v35 }
  0xca   : > { %772 = vmatprep.mubr.bf16.mxu0 %v1591_v36  ;;  %836 = vmatprep.mubr.bf16.mxu1 %v1593_v37 }
  0xd1   : > { %773 = vmatmul.mubr.bf16.gmra.mrb[20].mxu0 %v1595_v38  ;;  %837 = vmatmul.mubr.bf16.gmra.mrb[20].mxu1 %v1596_v39 }
  0xd2   : > { %780 = vmatprep.mubr.bf16.mxu0 %v1597_v40  ;;  %844 = vmatprep.mubr.bf16.mxu1 %v1599_v41 }
  0xd9   : > { %781 = vmatmul.mubr.bf16.gmra.mrb[24].mxu0 %v1601_v42  ;;  %845 = vmatmul.mubr.bf16.gmra.mrb[24].mxu1 %v1602_v43 }
  0xda   : > { %788 = vmatprep.mubr.bf16.mxu0 %v1603_v44  ;;  %852 = vmatprep.mubr.bf16.mxu1 %v1605_v45 }
  0xe1   : > { %789 = vmatmul.mubr.bf16.gmra.mrb[28].mxu0 %v1607_v46  ;;  %853 = vmatmul.mubr.bf16.gmra.mrb[28].mxu1 %v1608_v47 }
 0x17c   : > { %v1334_v48 = vpop.f32.mrb[0].mxu0  ;;  %v1382_v49 = vpop.f32.mrb[0].mxu1 }
 0x17d   : > { %v1335_v50 = vpop.f32.mrb[1].mxu0  ;;  %v1383_v52 = vpop.f32.mrb[1].mxu1 }
 0x17e   : > { %v1336_v53 = vadd.f32 %v1335_v50, %v1334_v48  ;;  %v1384_v54 = vadd.f32 %v1383_v52, %v1382_v49  ;;  %v1337_v55 = vpop.f32.mrb[2].mxu0  ;;  %v1385_v56 = vpop.f32.mrb[2].mxu1 }
 0x17f   : > { %v1338_v58 = vpop.f32.mrb[3].mxu0  ;;  %v1386_v59 = vpop.f32.mrb[3].mxu1 }
 0x180   : > { %v967_v60 = vmul.f32 %v1336_v53, %v2177_v51  ;;  %v983_v61 = vmul.f32 %v1384_v54, %v2177_v51  ;;  %v1339_v62 = vadd.f32 %v1338_v58, %v1337_v55  ;;  %v1387_v63 = vadd.f32 %v1386_v59, %v1385_v56 }
 0x182   : > { %v1006_v0 = vadd.f32 %v2179_v57, %v967_v60  ;;  %v1022_v1 = vadd.f32 %v2179_v57, %v983_v61  ;;  %v968_v2 = vmul.f32 %v1339_v62, %v2177_v51  ;;  %v984_v3 = vmul.f32 %v1387_v63, %v2177_v51 }
 0x184   : > { %1609 = vtanh.f32 %v1006_v0  ;;  %v1007_v4 = vadd.f32 %v2179_v57, %v968_v2  ;;  %v1023_v5 = vadd.f32 %v2179_v57, %v984_v3  ;;  %v1340_v6 = vpop.f32.mrb[4].mxu0  ;;  %v1388_v7 = vpop.f32.mrb[4].mxu1 }
 0x185   : > { %1611 = vtanh.f32 %v1022_v1  ;;  %v1341_v8 = vpop.f32.mrb[5].mxu0  ;;  %v1389_v9 = vpop.f32.mrb[5].mxu1 }
 0x186   : > { %1613 = vtanh.f32 %v1007_v4  ;;  %v1342_v10 = vadd.f32 %v1341_v8, %v1340_v6  ;;  %v1390_v11 = vadd.f32 %v1389_v9, %v1388_v7  ;;  %v1343_v12 = vpop.f32.mrb[6].mxu0  ;;  %v1391_v13 = vpop.f32.mrb[6].mxu1 }
 0x187   : > { %1615 = vtanh.f32 %v1023_v5  ;;  %v1344_v14 = vpop.f32.mrb[7].mxu0  ;;  %v1392_v15 = vpop.f32.mrb[7].mxu1 }
 0x188   : > { %v969_v16 = vmul.f32 %v1342_v10, %v2177_v51  ;;  %v985_v17 = vmul.f32 %v1390_v11, %v2177_v51  ;;  %v1345_v18 = vadd.f32 %v1344_v14, %v1343_v12  ;;  %v1393_v19 = vadd.f32 %v1392_v15, %v1391_v13 }
 0x18a   : > { %v1008_v20 = vadd.f32 %v2179_v57, %v969_v16  ;;  %v1024_v21 = vadd.f32 %v2179_v57, %v985_v17  ;;  %v970_v22 = vmul.f32 %v1345_v18, %v2177_v51  ;;  %v986_v23 = vmul.f32 %v1393_v19, %v2177_v51 }
 0x18c   : > { %1617 = vtanh.f32 %v1008_v20  ;;  %v1009_v24 = vadd.f32 %v2179_v57, %v970_v22  ;;  %v1025_v25 = vadd.f32 %v2179_v57, %v986_v23  ;;  %v1346_v26 = vpop.f32.mrb[8].mxu0  ;;  %v1394_v27 = vpop.f32.mrb[8].mxu1 }
 0x18d   : > { %1619 = vtanh.f32 %v1024_v21  ;;  %v1347_v28 = vpop.f32.mrb[9].mxu0  ;;  %v1395_v29 = vpop.f32.mrb[9].mxu1 }
 0x18e   : > { %v1610_v30 = vpop.eup %1609  ;;  %1621 = vtanh.f32 %v1009_v24  ;;  %v1348_v31 = vadd.f32 %v1347_v28, %v1346_v26  ;;  %v1396_v32 = vadd.f32 %v1395_v29, %v1394_v27  ;;  %v1349_v33 = vpop.f32.mrb[10].mxu0 }
 0x18f   : > { %v1397_v34 = vpop.f32.mrb[10].mxu1  ;;  %v1612_v35 = vpop.eup %1611  ;;  %1070 = vst [vmem:[%s2199_s23] sm:$0xff] %v1610_v30  ;;  %1623 = vtanh.f32 %v1025_v25 }
 0x190   : > { %v1350_v36 = vpop.f32.mrb[11].mxu0  ;;  %v1398_v37 = vpop.f32.mrb[11].mxu1  ;;  %1086 = vst [vmem:[%s2199_s23 + $0x80] sm:$0xff] %v1612_v35  ;;  %v971_v39 = vmul.f32 %v1348_v31, %v2177_v51  ;;  %v987_v40 = vmul.f32 %v1396_v32, %v2177_v51 }
 0x191   : > { %v1614_v38 = vpop.eup %1613  ;;  %v1351_v41 = vadd.f32 %v1350_v36, %v1349_v33  ;;  %v1399_v42 = vadd.f32 %v1398_v37, %v1397_v34 }
 0x192   : > { %v1616_v43 = vpop.eup %1615  ;;  %1071 = vst [vmem:[%s2199_s23 + $0x8] sm:$0xff] %v1614_v38  ;;  %v1010_v44 = vadd.f32 %v2179_v57, %v971_v39  ;;  %v1026_v45 = vadd.f32 %v2179_v57, %v987_v40 }
 0x193   : > { %1087 = vst [vmem:[%s2199_s23 + $0x88] sm:$0xff] %v1616_v43  ;;  %v972_v46 = vmul.f32 %v1351_v41, %v2177_v51  ;;  %v988_v47 = vmul.f32 %v1399_v42, %v2177_v51 }
 0x194   : > { %1625 = vtanh.f32 %v1010_v44  ;;  %v1352_v50 = vpop.f32.mrb[12].mxu0  ;;  %v1400_v52 = vpop.f32.mrb[12].mxu1 }
 0x195   : > { %v1011_v48 = vadd.f32 %v2179_v57, %v972_v46  ;;  %v1027_v49 = vadd.f32 %v2179_v57, %v988_v47  ;;  %1627 = vtanh.f32 %v1026_v45  ;;  %v1353_v53 = vpop.f32.mrb[13].mxu0  ;;  %v1401_v54 = vpop.f32.mrb[13].mxu1 }
 0x196   : > { %v1618_v55 = vpop.eup %1617  ;;  %v1354_v56 = vadd.f32 %v1353_v53, %v1352_v50  ;;  %v1402_v58 = vadd.f32 %v1401_v54, %v1400_v52  ;;  %v1355_v59 = vpop.f32.mrb[14].mxu0 }
 0x197   : > { %1629 = vtanh.f32 %v1011_v48  ;;  %v1403_v60 = vpop.f32.mrb[14].mxu1  ;;  %v1620_v61 = vpop.eup %1619  ;;  %1072 = vst [vmem:[%s2199_s23 + $0x10] sm:$0xff] %v1618_v55 }
 0x198   : > { %1631 = vtanh.f32 %v1027_v49  ;;  %v1356_v62 = vpop.f32.mrb[15].mxu0  ;;  %v1404_v63 = vpop.f32.mrb[15].mxu1  ;;  %1088 = vst [vmem:[%s2199_s23 + $0x90] sm:$0xff] %v1620_v61  ;;  %v973_v1 = vmul.f32 %v1354_v56, %v2177_v51  ;;  %v989_v2 = vmul.f32 %v1402_v58, %v2177_v51 }
 0x199   : > { %v1622_v0 = vpop.eup %1621  ;;  %v1357_v3 = vadd.f32 %v1356_v62, %v1355_v59  ;;  %v1405_v4 = vadd.f32 %v1404_v63, %v1403_v60 }
 0x19a   : > { %v1624_v5 = vpop.eup %1623  ;;  %1073 = vst [vmem:[%s2199_s23 + $0x18] sm:$0xff] %v1622_v0  ;;  %v1012_v6 = vadd.f32 %v2179_v57, %v973_v1  ;;  %v1028_v7 = vadd.f32 %v2179_v57, %v989_v2 }
 0x19b   : > { %1089 = vst [vmem:[%s2199_s23 + $0x98] sm:$0xff] %v1624_v5  ;;  %v974_v8 = vmul.f32 %v1357_v3, %v2177_v51  ;;  %v990_v9 = vmul.f32 %v1405_v4, %v2177_v51 }
 0x19c   : > { %1633 = vtanh.f32 %v1012_v6  ;;  %v1358_v12 = vpop.f32.mrb[16].mxu0  ;;  %v1406_v13 = vpop.f32.mrb[16].mxu1 }
 0x19d   : > { %v1013_v10 = vadd.f32 %v2179_v57, %v974_v8  ;;  %v1029_v11 = vadd.f32 %v2179_v57, %v990_v9  ;;  %1635 = vtanh.f32 %v1028_v7  ;;  %v1359_v14 = vpop.f32.mrb[17].mxu0  ;;  %v1407_v15 = vpop.f32.mrb[17].mxu1 }
 0x19e   : > { %v1626_v16 = vpop.eup %1625  ;;  %v1360_v17 = vadd.f32 %v1359_v14, %v1358_v12  ;;  %v1408_v18 = vadd.f32 %v1407_v15, %v1406_v13  ;;  %v1361_v19 = vpop.f32.mrb[18].mxu0 }
 0x19f   : > { %1637 = vtanh.f32 %v1013_v10  ;;  %v1409_v20 = vpop.f32.mrb[18].mxu1  ;;  %v1628_v21 = vpop.eup %1627  ;;  %1074 = vst [vmem:[%s2199_s23 + $0x20] sm:$0xff] %v1626_v16 }
 0x1a0   : > { %1639 = vtanh.f32 %v1029_v11  ;;  %v1362_v22 = vpop.f32.mrb[19].mxu0  ;;  %v1410_v23 = vpop.f32.mrb[19].mxu1  ;;  %1090 = vst [vmem:[%s2199_s23 + $0xa0] sm:$0xff] %v1628_v21  ;;  %v975_v25 = vmul.f32 %v1360_v17, %v2177_v51  ;;  %v991_v26 = vmul.f32 %v1408_v18, %v2177_v51 }
 0x1a1   : > { %v1630_v24 = vpop.eup %1629  ;;  %v1363_v27 = vadd.f32 %v1362_v22, %v1361_v19  ;;  %v1411_v28 = vadd.f32 %v1410_v23, %v1409_v20 }
 0x1a2   : > { %v1632_v29 = vpop.eup %1631  ;;  %1075 = vst [vmem:[%s2199_s23 + $0x28] sm:$0xff] %v1630_v24  ;;  %v1014_v30 = vadd.f32 %v2179_v57, %v975_v25  ;;  %v1030_v31 = vadd.f32 %v2179_v57, %v991_v26 }
 0x1a3   : > { %1091 = vst [vmem:[%s2199_s23 + $0xa8] sm:$0xff] %v1632_v29  ;;  %v976_v32 = vmul.f32 %v1363_v27, %v2177_v51  ;;  %v992_v33 = vmul.f32 %v1411_v28, %v2177_v51 }
 0x1a4   : > { %1641 = vtanh.f32 %v1014_v30  ;;  %v1364_v36 = vpop.f32.mrb[20].mxu0  ;;  %v1412_v37 = vpop.f32.mrb[20].mxu1 }
 0x1a5   : > { %v1015_v34 = vadd.f32 %v2179_v57, %v976_v32  ;;  %v1031_v35 = vadd.f32 %v2179_v57, %v992_v33  ;;  %1643 = vtanh.f32 %v1030_v31  ;;  %v1365_v38 = vpop.f32.mrb[21].mxu0  ;;  %v1413_v39 = vpop.f32.mrb[21].mxu1 }
 0x1a6   : > { %v1634_v40 = vpop.eup %1633  ;;  %v1366_v41 = vadd.f32 %v1365_v38, %v1364_v36  ;;  %v1414_v42 = vadd.f32 %v1413_v39, %v1412_v37  ;;  %v1367_v43 = vpop.f32.mrb[22].mxu0 }
 0x1a7   : > { %1645 = vtanh.f32 %v1015_v34  ;;  %v1415_v44 = vpop.f32.mrb[22].mxu1  ;;  %v1636_v45 = vpop.eup %1635  ;;  %1076 = vst [vmem:[%s2199_s23 + $0x30] sm:$0xff] %v1634_v40 }
 0x1a8   : > { %1647 = vtanh.f32 %v1031_v35  ;;  %v1368_v46 = vpop.f32.mrb[23].mxu0  ;;  %v1416_v47 = vpop.f32.mrb[23].mxu1  ;;  %1092 = vst [vmem:[%s2199_s23 + $0xb0] sm:$0xff] %v1636_v45  ;;  %v977_v49 = vmul.f32 %v1366_v41, %v2177_v51  ;;  %v993_v50 = vmul.f32 %v1414_v42, %v2177_v51 }
 0x1a9   : > { %v1638_v48 = vpop.eup %1637  ;;  %v1369_v52 = vadd.f32 %v1368_v46, %v1367_v43  ;;  %v1417_v53 = vadd.f32 %v1416_v47, %v1415_v44 }
 0x1aa   : > { %v1640_v54 = vpop.eup %1639  ;;  %1077 = vst [vmem:[%s2199_s23 + $0x38] sm:$0xff] %v1638_v48  ;;  %v1016_v55 = vadd.f32 %v2179_v57, %v977_v49  ;;  %v1032_v56 = vadd.f32 %v2179_v57, %v993_v50 }
 0x1ab   : > { %1093 = vst [vmem:[%s2199_s23 + $0xb8] sm:$0xff] %v1640_v54  ;;  %v978_v58 = vmul.f32 %v1369_v52, %v2177_v51  ;;  %v994_v59 = vmul.f32 %v1417_v53, %v2177_v51 }
 0x1ac   : > { %1649 = vtanh.f32 %v1016_v55  ;;  %v1370_v62 = vpop.f32.mrb[24].mxu0  ;;  %v1418_v63 = vpop.f32.mrb[24].mxu1 }
 0x1ad   : > { %v1017_v60 = vadd.f32 %v2179_v57, %v978_v58  ;;  %v1033_v61 = vadd.f32 %v2179_v57, %v994_v59  ;;  %1651 = vtanh.f32 %v1032_v56  ;;  %v1371_v0 = vpop.f32.mrb[25].mxu0  ;;  %v1419_v1 = vpop.f32.mrb[25].mxu1 }
 0x1ae   : > { %v1642_v2 = vpop.eup %1641  ;;  %v1372_v3 = vadd.f32 %v1371_v0, %v1370_v62  ;;  %v1420_v4 = vadd.f32 %v1419_v1, %v1418_v63  ;;  %v1373_v5 = vpop.f32.mrb[26].mxu0 }
 0x1af   : > { %1653 = vtanh.f32 %v1017_v60  ;;  %v1421_v6 = vpop.f32.mrb[26].mxu1  ;;  %v1644_v7 = vpop.eup %1643  ;;  %1078 = vst [vmem:[%s2199_s23 + $0x40] sm:$0xff] %v1642_v2 }
 0x1b0   : > { %1655 = vtanh.f32 %v1033_v61  ;;  %v1374_v8 = vpop.f32.mrb[27].mxu0  ;;  %v1422_v9 = vpop.f32.mrb[27].mxu1  ;;  %1094 = vst [vmem:[%s2199_s23 + $0xc0] sm:$0xff] %v1644_v7  ;;  %v979_v11 = vmul.f32 %v1372_v3, %v2177_v51  ;;  %v995_v12 = vmul.f32 %v1420_v4, %v2177_v51 }
 0x1b1   : > { %v1646_v10 = vpop.eup %1645  ;;  %v1375_v13 = vadd.f32 %v1374_v8, %v1373_v5  ;;  %v1423_v14 = vadd.f32 %v1422_v9, %v1421_v6 }
 0x1b2   : > { %v1648_v15 = vpop.eup %1647  ;;  %1079 = vst [vmem:[%s2199_s23 + $0x48] sm:$0xff] %v1646_v10  ;;  %v1018_v16 = vadd.f32 %v2179_v57, %v979_v11  ;;  %v1034_v17 = vadd.f32 %v2179_v57, %v995_v12 }
 0x1b3   : > { %1095 = vst [vmem:[%s2199_s23 + $0xc8] sm:$0xff] %v1648_v15  ;;  %v980_v18 = vmul.f32 %v1375_v13, %v2177_v51  ;;  %v996_v19 = vmul.f32 %v1423_v14, %v2177_v51 }
 0x1b4   : > { %1657 = vtanh.f32 %v1018_v16  ;;  %v1376_v22 = vpop.f32.mrb[28].mxu0  ;;  %v1424_v23 = vpop.f32.mrb[28].mxu1 }
 0x1b5   : > { %v1019_v20 = vadd.f32 %v2179_v57, %v980_v18  ;;  %v1035_v21 = vadd.f32 %v2179_v57, %v996_v19  ;;  %1659 = vtanh.f32 %v1034_v17  ;;  %v1377_v24 = vpop.f32.mrb[29].mxu0  ;;  %v1425_v25 = vpop.f32.mrb[29].mxu1 }
 0x1b6   : > { %v1650_v26 = vpop.eup %1649  ;;  %v1378_v27 = vadd.f32 %v1377_v24, %v1376_v22  ;;  %v1426_v28 = vadd.f32 %v1425_v25, %v1424_v23  ;;  %v1379_v29 = vpop.f32.mrb[30].mxu0 }
 0x1b7   : > { %1661 = vtanh.f32 %v1019_v20  ;;  %v1427_v30 = vpop.f32.mrb[30].mxu1  ;;  %v1652_v31 = vpop.eup %1651  ;;  %1080 = vst [vmem:[%s2199_s23 + $0x50] sm:$0xff] %v1650_v26 }
 0x1b8   : > { %1663 = vtanh.f32 %v1035_v21  ;;  %v1380_v32 = vpop.f32.mrb[31].mxu0  ;;  %v1428_v33 = vpop.f32.mrb[31].mxu1  ;;  %1096 = vst [vmem:[%s2199_s23 + $0xd0] sm:$0xff] %v1652_v31  ;;  %v981_v35 = vmul.f32 %v1378_v27, %v2177_v51  ;;  %v997_v36 = vmul.f32 %v1426_v28, %v2177_v51 }
 0x1b9   : > { %v1654_v34 = vpop.eup %1653  ;;  %v1381_v37 = vadd.f32 %v1380_v32, %v1379_v29  ;;  %v1429_v38 = vadd.f32 %v1428_v33, %v1427_v30 }
 0x1ba   : > { %v1656_v39 = vpop.eup %1655  ;;  %1081 = vst [vmem:[%s2199_s23 + $0x58] sm:$0xff] %v1654_v34  ;;  %v1020_v40 = vadd.f32 %v2179_v57, %v981_v35  ;;  %v1036_v41 = vadd.f32 %v2179_v57, %v997_v36 }
 0x1bb   : > { %1097 = vst [vmem:[%s2199_s23 + $0xd8] sm:$0xff] %v1656_v39  ;;  %v982_v42 = vmul.f32 %v1381_v37, %v2177_v51  ;;  %v998_v43 = vmul.f32 %v1429_v38, %v2177_v51 }
 0x1bc   : > { %1665 = vtanh.f32 %v1020_v40 }
 0x1bd   : > { %v1021_v44 = vadd.f32 %v2179_v57, %v982_v42  ;;  %v1037_v45 = vadd.f32 %v2179_v57, %v998_v43  ;;  %1667 = vtanh.f32 %v1036_v41 }
 0x1be   : > { %v1658_v46 = vpop.eup %1657 }
 0x1bf   : > { %1669 = vtanh.f32 %v1021_v44  ;;  %v1660_v47 = vpop.eup %1659  ;;  %1082 = vst [vmem:[%s2199_s23 + $0x60] sm:$0xff] %v1658_v46 }
 0x1c0   : > { %1671 = vtanh.f32 %v1037_v45  ;;  %1098 = vst [vmem:[%s2199_s23 + $0xe0] sm:$0xff] %v1660_v47 }
 0x1c1   : > { %v1662_v48 = vpop.eup %1661 }
 0x1c2   : > { %v1664_v51 = vpop.eup %1663  ;;  %1083 = vst [vmem:[%s2199_s23 + $0x68] sm:$0xff] %v1662_v48 }
 0x1c3   : > { %1099 = vst [vmem:[%s2199_s23 + $0xe8] sm:$0xff] %v1664_v51 }
 0x1c6   : > { %v1666_v57 = vpop.eup %1665 }
 0x1c7   : > { %v1668_v49 = vpop.eup %1667  ;;  %1084 = vst [vmem:[%s2199_s23 + $0x70] sm:$0xff] %v1666_v57 }
 0x1c8   : > { %1100 = vst [vmem:[%s2199_s23 + $0xf0] sm:$0xff] %v1668_v49 }
 0x1c9   : > { %v1670_v50 = vpop.eup %1669 }
 0x1ca   : > { %v1672_v52 = vpop.eup %1671  ;;  %1085 = vst [vmem:[%s2199_s23 + $0x78] sm:$0xff] %v1670_v50 }
 0x1cb   : > { %1101 = vst [vmem:[%s2199_s23 + $0xf8] sm:$0xff] %v1672_v52 }
 0x1cc   : > { %1800 = shalt.err (!%p1797_p0)
}
 0x1cd   : > { %s1801_s21 = scalar_lea.hbm %s2283_s28, 4096  ;;  %s1805_s9 = scalar_lea.hbm %s2341_s4, 8192 }
 0x1ce   : > { %p1802_p4 = scmp.ne.s32.totalorder %s2283_s28, %s1801_s21  ;;  %p1806_p12 = scmp.lt.u32.totalorder %s2283_s28, %s2341_s4 }
 0x1cf   : > { %p1807_p1 = scmp.lt.u32.totalorder %s1805_s9, %s1801_s21  ;;  %p1809_p13 = scmp.lt.u32.totalorder %s1801_s21, %s2283_s28 }
 0x1d0   : > { %p1803_p2 = pnand %p1802_p4, %p2067_p10 }
 0x1d1   : > { %p1808_p11 = por %p1807_p1, %p1806_p12 }
 0x1d2   : > { %p1804_p8 = pneg %p1803_p2 }
 0x1d3   : > { %p1810_p6 = por %p1809_p13, %p1808_p11 }
 0x1d5   : > { %p1811_p3 = pnand %p1810_p6, %p1804_p8 }
 0x1d7   : > { %1814 = shalt.err (!%p1811_p3)
}
 0x1d8   : > { %s1888_s23 = smov 128   ;;  %s1889_s25 = smov 8  }
 0x1d9   : > { %1460 = dma.vmem_to_hbm [thread:$0]  (%p2067_p10), %s2285_s27, 4096, %s2283_s28, %s1103_s18, %s1888_s23, %s1888_s23, %s1889_s25  }
 0x1da PF: > { %s2361_s24 = sld [smem:[#allocation16_spill]]  ;;  %s1132_s22 = sand.u32 1, %s1857_s15  }
 0x1db   : > { %p2363_p7 = scmp.ge.s32.totalorder %s1877_s20, 2  ;;  %s1133_s6 = scalar_lea.sflag [#allocation5], %s1132_s22 }
 0x1e0   : > { %p2362_p5 = scmp.ne.s32.totalorder %s2361_s24, 0 }
 0x1e2   : > { %p1477_p9 = pnand %p2363_p7, %p2362_p5 }
 0x1e4   : > { %1852 = dma.done.wait (!%p1477_p9), %s1133_s6, 4096  }
 0x1e5   : > { %1854 = vsyncadd (!%p1477_p9), %s1133_s6, 4294963200  ;;  %s22_s20 = sadd.s32 1, %s1877_s20   ;;  %s2364_s15 = smov %s1861_s16 }
 0x1e6   : > { %p19_p0 = scmp.ge.s32.totalorder %s22_s20, 4   ;;  %s2365_s16 = smov %s1865_s17 }
 0x1e7   : > { %s2366_s17 = smov %s2079_s11  ;;  %s2367_s18 = smov %s1873_s19 }
 0x1e8   : > { %s2368_s19 = smov %s2370_s26  ;;  %21 = sbr.rel (!%p19_p0) target bundleno = 8 (0x8), region = 104 }
 0x1ef   :  { %1138 = vsyncpa [#allocation4], 1 }
 0x1f0   :  { %1140 = vsyncpa [#allocation4 + $0x1], 1 }
 0x1f1   :  { %1141 = vsyncpa [#allocation7], 1 }
 0x1f2   :  { %1142 = vsyncpa [#allocation10], 1 }
 0x1f3   :  { %1143 = vsyncpa [#allocation5], 1 }
 0x1f4   :  { %1145 = vsyncpa [#allocation5 + $0x1], 1 }

// kernel: espcn_forward.6
= control target key start
LH: loop header
LB: loop body
LE: loop exit
PB: predicated region body
PF: predicated region fallthrough
CT: control target
= control target key end

     0   :  { %9 = vsyncpa [#allocation4], 0  ;;  %s2850_s0 = inlined_call_operand.hbm [shape: bf16[512,384], index: 0, kind: input, shape index: {}]   ;;  %s2851_s1 = inlined_call_operand.hbm [shape: bf16[384,128], index: 1, kind: input, shape index: {}]   ;;  %s2852_s2 = inlined_call_operand.hbm [shape: f32[1,128], index: 2, kind: input, shape index: {}]   ;;  %s2853_s3 = inlined_call_operand.hbm [shape: f32[1,128], index: 3, kind: input, shape index: {}]   ;;  %s2854_s4 = inlined_call_operand.hbm [shape: f32[512,128], index: 4, kind: output, shape index: {}]  }
   0x1   :  { %11 = vsyncpa [#allocation4 + $0x1], 0 }
   0x2   :  { %12 = vsyncpa [#allocation7], 0 }
   0x3   :  { %13 = vsyncpa [#allocation10], 0 }
   0x4   :  { %14 = vsyncpa [#allocation5], 0 }
   0x5   :  { %16 = vsyncpa [#allocation5 + $0x1], 0  ;;  %s2387_s15 = smov 0   ;;  %s2389_s16 = smov 0  }
   0x6   :  { %s2391_s17 = smov 0   ;;  %s2393_s18 = smov 0  }
   0x7   :  { %s2395_s19 = smov 0   ;;  %s2397_s20 = smov 0  }
   0x8 LB: > { %s1596_s21 = sadd.s32 4294967295, %s2349_s20   ;;  %s1597_s22 = sadd.s32 4294967294, %s2349_s20   ;;  %s2349_s20 = sphi %s2397_s20, %s22_s20   ;;  %s2345_s19 = sphi %s2395_s19, %s2881_s19   ;;  %s2341_s18 = sphi %s2393_s18, %s2880_s18   ;;  %s2337_s17 = sphi %s2391_s17, %s2879_s17   ;;  %s2333_s16 = sphi %s2389_s16, %s2878_s16   ;;  %s2329_s15 = sphi %s2387_s15, %s2877_s15  }
   0x9   : > { %p63_p0 = scmp.ne.s32.totalorder %s2333_s16, %s2329_s15  ;;  %p2421_p1 = scmp.eq.s32.totalorder %s1596_s21, 0 }
   0xa   : > { %p2425_p2 = scmp.eq.s32.totalorder %s1596_s21, 1  ;;  %p175_p3 = scmp.eq.s32.totalorder %s1597_s22, 1 }
   0xb   : > { %s2860_s23 = scalar_select %p2421_p1, 1, 0 }
   0xc   : > { %s2861_s24 = scalar_select %p2425_p2, 1, 0 }
   0xd   : > { %p2431_p4 = por %p2421_p1, %p63_p0  ;;  %p1598_p5 = scmp.ge.s32.totalorder %s2349_s20, 1 }
   0xe   : > { %p2436_p6 = por %p175_p3, %p63_p0  ;;  %p182_p7 = scmp.lt.s32.totalorder %s2349_s20, 3 }
   0xf   : > { %s2862_s25 = scalar_select %p2431_p4, 1, 0 }
  0x10   : > { %s2863_s26 = scalar_select %p2436_p6, 1, 0 }
  0x11   : > { %p2441_p8 = pnand %p1598_p5, %p182_p7  ;;  %s2351_s28 = smov [#allocation6]  }
  0x12   : > { %2864 = sst [smem:[#allocation16_spill]] %s2863_s26  ;;  %s198_s29 = sshll.u32 %s2351_s28, 4  ;;  %s2445_s29 = int_to_ptr.vmem [resolvable:$true] %s198_s29 }
  0x13   : > { %s2865_s27 = scalar_select %p2441_p8, 1, 0 }
  0x14   : > { %p1910_p9 = pneg %p2441_p8  ;;  %s2352_s5 = smov [#allocation8]  }
  0x15   : > { %s214_s6 = sshll.u32 %s2352_s5, 4  ;;  %s2353_s7 = smov [#allocation9]   ;;  %s2456_s6 = int_to_ptr.vmem [resolvable:$true] %s214_s6 }
  0x16   : > { %p2452_p11 = pnand %p1910_p9, %p2421_p1  ;;  %s2458_s8 = sshll.u32 %s2353_s7, 4  ;;  %s228_s8 = int_to_ptr.vmem [resolvable:$true] %s2458_s8 }
  0x17   : > { %s2145_s11 = scalar_lea.hbm %s2851_s1, 3072 }
  0x18   : > { %p2146_p12 = scmp.ne.s32.totalorder %s2851_s1, %s2145_s11  ;;  %p2468_p13 = pneg %p2452_p11 }
  0x19   : > { %p2152_p5 = scmp.lt.u32.totalorder %s2145_s11, %s2851_s1 }
  0x1a   : > { %p2148_p0 = pnand %p2468_p13, %p2146_p12 }
  0x1c   : > { %p2149_p3 = pneg %p2148_p0 }
  0x1e   : > { %p2154_p7 = pnand %p2152_p5, %p2149_p3 }
  0x20   : > { %2157 = shalt.err (!%p2154_p7)
}
  0x21   : > { %s2158_s28 = scalar_lea.vmem %s2445_s29, 3072  ;;  %p2166_p1 = scmp.lt.s32.totalorder %s2445_s29, %s2445_s29 }
  0x22   : > { %p2159_p9 = scmp.ne.s32.totalorder %s2445_s29, %s2158_s28  ;;  %p2167_p4 = scmp.lt.s32.totalorder %s2158_s28, %s2158_s28 }
  0x24   : > { %p2161_p10 = pnand %p2159_p9, %p2468_p13  ;;  %p2168_p12 = por %p2167_p4, %p2166_p1 }
  0x26   : > { %p2162_p6 = pneg %p2161_p10 }
  0x28   : > { %p2169_p0 = pnand %p2168_p12, %p2162_p6 }
  0x2a   : > { %2172 = shalt.err (!%p2169_p0)
}
  0x2b   : > { %s2354_s5 = smov 64   ;;  %s2355_s7 = smov 4  }
  0x2c   : > { %1913 = dma.hbm_to_vmem [thread:$0]  (!%p2452_p11), %s2851_s1, 3072, %s2445_s29, [#allocation7], %s2354_s5, %s2354_s5, %s2355_s7  }
  0x2d   : > { %s2173_s13 = scalar_lea.hbm %s2852_s2, 16 }
  0x2e   : > { %p2174_p1 = scmp.ne.s32.totalorder %s2852_s2, %s2173_s13  ;;  %p2180_p10 = scmp.lt.u32.totalorder %s2173_s13, %s2852_s2 }
  0x30   : > { %p2176_p4 = pnand %p2174_p1, %p2468_p13 }
  0x32   : > { %p2177_p6 = pneg %p2176_p4 }
  0x34   : > { %p2182_p3 = pnand %p2180_p10, %p2177_p6 }
  0x36   : > { %2185 = shalt.err (!%p2182_p3)
}
  0x37   : > { %s2186_s29 = scalar_lea.vmem %s2456_s6, 16  ;;  %s2193_s5 = scalar_lea.vmem %s2456_s6, 32 }
  0x38   : > { %p2187_p5 = scmp.ne.s32.totalorder %s2456_s6, %s2186_s29  ;;  %p2194_p12 = scmp.lt.s32.totalorder %s2456_s6, %s2456_s6 }
  0x39   : > { %p2195_p0 = scmp.lt.s32.totalorder %s2193_s5, %s2186_s29 }
  0x3a   : > { %p2189_p7 = pnand %p2187_p5, %p2468_p13 }
  0x3b   : > { %p2196_p1 = por %p2195_p0, %p2194_p12 }
  0x3c   : > { %p2190_p9 = pneg %p2189_p7 }
  0x3e   : > { %p2197_p4 = pnand %p2196_p1, %p2190_p9 }
  0x40   : > { %2200 = shalt.err (!%p2197_p4)
}
  0x41   : > { %1916 = dma.hbm_to_vmem [thread:$0]  (!%p2452_p11), %s2852_s2, 16, %s2456_s6, [#allocation7]  }
  0x42   : > { %s2201_s11 = scalar_lea.hbm %s2853_s3, 16 }
  0x43   : > { %p2202_p6 = scmp.ne.s32.totalorder %s2853_s3, %s2201_s11  ;;  %p2208_p5 = scmp.lt.u32.totalorder %s2201_s11, %s2853_s3 }
  0x45   : > { %p2204_p10 = pnand %p2202_p6, %p2468_p13 }
  0x47   : > { %p2205_p3 = pneg %p2204_p10 }
  0x49   : > { %p2210_p7 = pnand %p2208_p5, %p2205_p3 }
  0x4b   : > { %2213 = shalt.err (!%p2210_p7)
}
  0x4c   : > { %s2214_s28 = scalar_lea.vmem %s228_s8, 16  ;;  %s2221_s6 = scalar_lea.vmem %s228_s8, 32 }
  0x4d   : > { %p2215_p9 = scmp.ne.s32.totalorder %s228_s8, %s2214_s28  ;;  %p2222_p1 = scmp.lt.s32.totalorder %s228_s8, %s228_s8 }
  0x4e   : > { %p2223_p4 = scmp.lt.s32.totalorder %s2221_s6, %s2214_s28 }
  0x4f   : > { %p2217_p12 = pnand %p2215_p9, %p2468_p13 }
  0x50   : > { %p2224_p8 = por %p2223_p4, %p2222_p1 }
  0x51   : > { %p2218_p0 = pneg %p2217_p12 }
  0x53   : > { %p2225_p2 = pnand %p2224_p8, %p2218_p0 }
  0x55   : > { %2228 = shalt.err (!%p2225_p2)
}
  0x56   : > { %1919 = dma.hbm_to_vmem [thread:$0]  (!%p2452_p11), %s2853_s3, 16, %s228_s8, [#allocation10]  }
  0x57   : > { %s50_s14 = sadd.s32 1, %s2337_s17  ;;  %s41_s26 = sadd.s32 1, %s2345_s19 }
  0x58   : > { %p57_p2 = scmp.ne.s32.totalorder %s2337_s17, %s2333_s16  ;;  %p43_p8 = scmp.ge.s32.totalorder %s41_s26, 2 }
  0x59   : > { %p58_p13 = scmp.eq.s32.totalorder %s2349_s20, 0  ;;  %p2868_p6 = scmp.ne.s32.totalorder %s2861_s24, 0 }
  0x5a   : > { %p1931_p3 = scmp.lt.s32.totalorder %s2349_s20, 2  ;;  %s2883_s26 = smov (%p43_p8, %s41_s26), 0 }
  0x5b   : > { %p2539_p10 = por %p2868_p6, %p57_p2  ;;  %p59_p5 = por %p58_p13, %p57_p2 }
  0x5c   : > { %s238_s7 = sand.u32 1, %s2337_s17   ;;  %s45_s9 = ssub.s32 %s2345_s19, %s2883_s26 }
  0x5d   : > { %p48_p7 = scmp.eq.s32.totalorder %s45_s9, 0  ;;  %s1891_s8 = smul.u32 384, %s238_s7 }
  0x5e   : > { %s1892_s10 = smul.u32 6144, %s2345_s19  ;;  %p2550_p11 = pnand %p1931_p3, %p59_p5 }
  0x5f   : > { %s2555_s24 = scalar_select %p48_p7, %s2337_s17, %s50_s14  }
  0x60   : > { %s2560_s21 = scalar_lea.hbm %s2850_s0, %s1892_s10  ;;  %s242_s22 = scalar_lea.vmem [#allocation3], %s1891_s8 }
  0x61   : > { %s252_s28 = sshll.u32 %s242_s22, 4  ;;  %s2564_s6 = scalar_lea.sflag [#allocation4], %s238_s7  ;;  %s2562_s28 = int_to_ptr.vmem [resolvable:$true] %s252_s28 }
  0x62   : > { %s2229_s29 = scalar_lea.hbm %s2560_s21, 6144  ;;  %p2231_p12 = pneg %p2550_p11 }
  0x63   : > { %p2230_p9 = scmp.ne.s32.totalorder %s2560_s21, %s2229_s29  ;;  %s2234_s9 = scalar_lea.hbm %s2850_s0, 12288 }
  0x64   : > { %p2235_p4 = scmp.lt.u32.totalorder %s2560_s21, %s2850_s0  ;;  %p2236_p2 = scmp.lt.u32.totalorder %s2234_s9, %s2229_s29 }
  0x65   : > { %p2232_p0 = pnand %p2231_p12, %p2230_p9  ;;  %p2238_p13 = scmp.lt.u32.totalorder %s2229_s29, %s2560_s21 }
  0x66   : > { %p2237_p8 = por %p2236_p2, %p2235_p4 }
  0x67   : > { %p2233_p1 = pneg %p2232_p0 }
  0x68   : > { %p2239_p6 = por %p2238_p13, %p2237_p8 }
  0x6a   : > { %p2240_p3 = pnand %p2239_p6, %p2233_p1 }
  0x6c   : > { %2243 = shalt.err (!%p2240_p3)
}
  0x6d   : > { %s2244_s7 = scalar_lea.vmem %s2562_s28, 6144  ;;  %s2356_s8 = smov [#allocation3]  }
  0x6e   : > { %p2245_p5 = scmp.ne.s32.totalorder %s2562_s28, %s2244_s7  ;;  %s2249_s13 = sshll.u32 %s2356_s8, 4  ;;  %s2250_s13 = int_to_ptr.vmem [resolvable:$false] %s2249_s13 }
  0x6f   : > { %s2251_s22 = scalar_lea.vmem %s2250_s13, 12288  ;;  %p2252_p0 = scmp.lt.s32.totalorder %s2562_s28, %s2250_s13 }
  0x70   : > { %p2247_p7 = pnand %p2245_p5, %p2231_p12  ;;  %p2253_p4 = scmp.lt.s32.totalorder %s2251_s22, %s2244_s7 }
  0x72   : > { %p2248_p9 = pneg %p2247_p7  ;;  %p2254_p2 = por %p2253_p4, %p2252_p0 }
  0x74   : > { %p2255_p8 = pnand %p2254_p2, %p2248_p9 }
  0x76   : > { %2258 = shalt.err (!%p2255_p8)
}
  0x77   : > { %s2357_s29 = smov 192   ;;  %s2358_s5 = smov 12  }
  0x78   : > { %1923 = dma.hbm_to_vmem [thread:$0]  (!%p2550_p11), %s2560_s21, 6144, %s2562_s28, %s2564_s6, %s2357_s29, %s2357_s29, %s2358_s5  }
  0x79   : > { %p2871_p12 = scmp.ne.s32.totalorder %s2865_s27, 0 }
  0x7a   : > { %s2595_s14 = sand.u32 (!%p2871_p12), 1, %s2333_s16   ;;  %p2872_p1 = scmp.ne.s32.totalorder (!%p2871_p12), %s2862_s25, 0 }
  0x7b   : > { %264 = sbr.rel (%p2871_p12) target bundleno = 506 (0x1fa), region = 36  ;;  %s267_s10 = scalar_lea.sflag (!%p2871_p12), [#allocation4], %s2595_s14 }
  0x7c   : > { %s1893_s9 = smul.u32 (!%p2871_p12), 384, %s2595_s14 }
  0x7e   : > { %s2599_s12 = scalar_lea.vmem (!%p2871_p12), [#allocation3], %s1893_s9 }
  0x82   : > { %2312 = dma.done.wait (%p2872_p1), %s267_s10, 6144  }
  0x83   : > { %2314 = vsyncadd (%p2872_p1), %s267_s10, 4294961152  ;;  %p2873_p11 = scmp.ne.s32.totalorder %s2860_s23, 0 }
  0x85   : > { %2316 = dma.done.wait (%p2873_p11), [#allocation7], 3088  }
  0x86   : > { %2318 = vsyncadd (%p2873_p11), [#allocation7], 4294964208 }
  0x87   : > { %2320 = dma.done.wait (%p2873_p11), [#allocation10], 16  }
  0x88   : > { %2322 = vsyncadd (%p2873_p11), [#allocation10], 4294967280  ;;  %v1993_v0 = vld [vmem:[#allocation6 + $0x40] sm:$0xff]   ;;  %v1995_v2 = vld [vmem:[#allocation6 + $0x48] sm:$0xff]   ;;  %s1610_s23 = sshll.u32 %s2595_s14, 8  ;;  %s1690_s27 = sshll.u32 %s2341_s18, 12 }
  0x89   : > { %v1994_v1 = vld [vmem:[#allocation6] sm:$0xff]   ;;  %1691 = vmatprep.subr.bf16.mxu0 %v1993_v0  ;;  %1875 = vmatprep.subr.bf16.mxu1 %v1993_v0  ;;  %v1996_v3 = vld [vmem:[#allocation6 + $0x8] sm:$0xff]   ;;  %v1997_v4 = vld [vmem:[#allocation6 + $0x50] sm:$0xff]   ;;  %s2698_s25 = scalar_lea.vmem [#allocation11], %s1610_s23  ;;  %s2796_s6 = scalar_lea.hbm %s2854_s4, %s1690_s27 }
  0x8a   : > { %1692 = vmatpush3.bf16.msra.mxu0 %v1994_v1  ;;  %1883 = vmatpush3.bf16.msra.mxu1 %v1994_v1  ;;  %v1998_v5 = vld [vmem:[#allocation6 + $0x10] sm:$0xff]   ;;  %v1999_v6 = vld [vmem:[#allocation6 + $0x58] sm:$0xff]   ;;  %v2001_v8 = vld [vmem:[#allocation6 + $0x60] sm:$0xff]   ;;  %s1470_s11 = sshll.u32 %s2698_s25, 4  ;;  %s1456_s18 = scalar_lea.sflag [#allocation5], %s2595_s14  ;;  %s2798_s11 = int_to_ptr.vmem [resolvable:$true] %s1470_s11 }
  0x8b   : > { %1693 = vmatprep.subr.bf16.mxu0 %v1995_v2  ;;  %1876 = vmatprep.subr.bf16.mxu1 %v1995_v2  ;;  %v2000_v7 = vld [vmem:[#allocation6 + $0x18] sm:$0xff]   ;;  %v2002_v9 = vld [vmem:[#allocation6 + $0x20] sm:$0xff]   ;;  %v2003_v10 = vld [vmem:[#allocation6 + $0x68] sm:$0xff]   ;;  %s2259_s7 = scalar_lea.vmem %s2798_s11, 4096  ;;  %s2359_s8 = smov [#allocation11]  }
  0x8c   : > { %v2011_v11 = vld [vmem:[%s2599_s12 + $0x4] ss:$12 sps:$4 sm:$0xff]   ;;  %v2004_v13 = vld [vmem:[#allocation6 + $0x28] sm:$0xff]   ;;  %v2007_v16 = vld [vmem:[#allocation6 + $0x78] sm:$0xff]   ;;  %p2260_p13 = scmp.ne.s32.totalorder %s2798_s11, %s2259_s7  ;;  %s2263_s13 = sshll.u32 %s2359_s8, 4  ;;  %s2264_s13 = int_to_ptr.vmem [resolvable:$false] %s2263_s13 }
  0x8d   : > { %v2014_v12 = vld [vmem:[%s2599_s12 + $0x124] ss:$12 sps:$4 sm:$0xff]   ;;  %924 = vmatprep.mubr.bf16.mxu0 %v2011_v11  ;;  %v2008_v17 = vld [vmem:[#allocation6 + $0x38] sm:$0xff]   ;;  %v2009_v19 = vld [vmem:[%s2599_s12] ss:$12 sps:$4 sm:$0xff]   ;;  %s2265_s22 = scalar_lea.vmem %s2264_s13, 8192  ;;  %p2266_p5 = scmp.lt.s32.totalorder %s2798_s11, %s2264_s13 }
  0x8e   : > { %1694 = vmatpush3.bf16.msra.mxu0 %v1996_v3  ;;  %1884 = vmatpush3.bf16.msra.mxu1 %v1996_v3  ;;  %v2005_v14 = vld [vmem:[#allocation6 + $0x70] sm:$0xff]   ;;  %v2015_v18 = vld [vmem:[#allocation6 + $0x80] sm:$0xff]   ;;  %v2017_v21 = vld [vmem:[%s2599_s12 + $0x1c] ss:$12 sps:$4 sm:$0xff]   ;;  %p2261_p6 = pnand %p2260_p13, %p2539_p10  ;;  %p2267_p7 = scmp.lt.s32.totalorder %s2265_s22, %s2259_s7 }
  0x8f   : > { %1695 = vmatprep.subr.bf16.mxu0 %v1997_v4  ;;  %1877 = vmatprep.subr.bf16.mxu1 %v1997_v4  ;;  %v2006_v15 = vld [vmem:[#allocation6 + $0x30] sm:$0xff]   ;;  %v2012_v20 = vld [vmem:[%s2599_s12 + $0x120] ss:$12 sps:$4 sm:$0xff]   ;;  %v2019_v23 = vld [vmem:[%s2599_s12 + $0x13c] ss:$12 sps:$4 sm:$0xff]  }
  0x90   : > { %1020 = vmatprep.mubr.bf16.mxu1 %v2014_v12  ;;  %v2016_v22 = vld [vmem:[#allocation6 + $0x88] sm:$0xff]   ;;  %v2021_v24 = vld [vmem:[%s2599_s12 + $0x18] ss:$12 sps:$4 sm:$0xff]   ;;  %v2023_v25 = vld [vmem:[#allocation6 + $0x90] sm:$0xff]   ;;  %p2262_p3 = pneg %p2261_p6  ;;  %p2268_p9 = por %p2267_p7, %p2266_p5 }
  0x91   : > { %v2022_v26 = vld [vmem:[%s2599_s12 + $0x138] ss:$12 sps:$4 sm:$0xff]   ;;  %v2025_v28 = vld [vmem:[%s2599_s12 + $0x34] ss:$12 sps:$4 sm:$0xff]   ;;  %v2029_v31 = vld [vmem:[%s2599_s12 + $0x30] ss:$12 sps:$4 sm:$0xff]  }
  0x92   : > { %1696 = vmatpush3.bf16.msra.mxu0 %v1998_v5  ;;  %1885 = vmatpush3.bf16.msra.mxu1 %v1998_v5  ;;  %v2024_v27 = vld [vmem:[#allocation6 + $0x98] sm:$0xff]   ;;  %v2027_v29 = vld [vmem:[%s2599_s12 + $0x154] ss:$12 sps:$4 sm:$0xff]   ;;  %v2032_v33 = vld [vmem:[#allocation6 + $0xa8] sm:$0xff]   ;;  %p2269_p0 = pnand %p2268_p9, %p2262_p3 }
  0x93   : > { %1697 = vmatprep.subr.bf16.mxu0 %v1999_v6  ;;  %1878 = vmatprep.subr.bf16.mxu1 %v1999_v6  ;;  %v2031_v30 = vld [vmem:[#allocation6 + $0xa0] sm:$0xff]   ;;  %v2030_v32 = vld [vmem:[%s2599_s12 + $0x150] ss:$12 sps:$4 sm:$0xff]   ;;  %v2033_v34 = vld [vmem:[%s2599_s12 + $0x4c] ss:$12 sps:$4 sm:$0xff]  }
  0x94   : > { %v2035_v35 = vld [vmem:[%s2599_s12 + $0x16c] ss:$12 sps:$4 sm:$0xff]   ;;  %v2039_v36 = vld [vmem:[#allocation6 + $0xb0] sm:$0xff]   ;;  %v2046_v44 = vld [vmem:[%s2599_s12 + $0x7c] ss:$12 sps:$4 sm:$0xff]  }
  0x95   : > { %v2037_v37 = vld [vmem:[%s2599_s12 + $0x48] ss:$12 sps:$4 sm:$0xff]   ;;  %v2041_v39 = vld [vmem:[%s2599_s12 + $0x64] ss:$12 sps:$4 sm:$0xff]   ;;  %v2040_v40 = vld [vmem:[#allocation6 + $0xb8] sm:$0xff]  }
  0x96   : > { %1698 = vmatpush3.bf16.msra.mxu0 %v2000_v7  ;;  %1886 = vmatpush3.bf16.msra.mxu1 %v2000_v7  ;;  %v2038_v38 = vld [vmem:[%s2599_s12 + $0x168] ss:$12 sps:$4 sm:$0xff]   ;;  %v2044_v42 = vld [vmem:[%s2599_s12 + $0x60] ss:$12 sps:$4 sm:$0xff]   ;;  %v2048_v45 = vld [vmem:[%s2599_s12 + $0x38] ss:$12 sps:$4 sm:$0xff]  }
  0x97   : > { %1699 = vmatprep.subr.bf16.mxu0 %v2001_v8  ;;  %1879 = vmatprep.subr.bf16.mxu1 %v2001_v8  ;;  %v2043_v41 = vld [vmem:[%s2599_s12 + $0x8] ss:$12 sps:$4 sm:$0xff]   ;;  %v2045_v43 = vld [vmem:[%s2599_s12 + $0x20] ss:$12 sps:$4 sm:$0xff]   ;;  %v2049_v46 = vld [vmem:[%s2599_s12 + $0x78] ss:$12 sps:$4 sm:$0xff]  }
  0x98   : > { %v2050_v47 = vld [vmem:[%s2599_s12 + $0x50] ss:$12 sps:$4 sm:$0xff]   ;;  %v2051_v48 = vld [vmem:[%s2599_s12 + $0x94] ss:$12 sps:$4 sm:$0xff]   ;;  %v2056_v52 = vld [vmem:[%s2599_s12 + $0xac] ss:$12 sps:$4 sm:$0xff]  }
  0x99   : > { %v2053_v49 = vld [vmem:[%s2599_s12 + $0x68] ss:$12 sps:$4 sm:$0xff]   ;;  %v2054_v50 = vld [vmem:[%s2599_s12 + $0x90] ss:$12 sps:$4 sm:$0xff]   ;;  %v2055_v51 = vld [vmem:[%s2599_s12 + $0x80] ss:$12 sps:$4 sm:$0xff]  }
  0x9a   : > { %1700 = vmatpush3.bf16.msra.mxu0 %v2002_v9  ;;  %1887 = vmatpush3.bf16.msra.mxu1 %v2002_v9  ;;  %v2058_v53 = vld [vmem:[%s2599_s12 + $0x98] ss:$12 sps:$4 sm:$0xff]   ;;  %v2059_v54 = vld [vmem:[%s2599_s12 + $0xa8] ss:$12 sps:$4 sm:$0xff]   ;;  %v2060_v55 = vld [vmem:[%s2599_s12 + $0xb0] ss:$12 sps:$4 sm:$0xff]  }
  0x9b   : > { %1701 = vmatprep.subr.bf16.mxu0 %v2003_v10  ;;  %1880 = vmatprep.subr.bf16.mxu1 %v2003_v10  ;;  %v2061_v56 = vld [vmem:[%s2599_s12 + $0xc4] ss:$12 sps:$4 sm:$0xff]   ;;  %v2063_v57 = vld [vmem:[%s2599_s12 + $0xc8] ss:$12 sps:$4 sm:$0xff]   ;;  %v2064_v58 = vld [vmem:[%s2599_s12 + $0xc0] ss:$12 sps:$4 sm:$0xff]  }
  0x9c   : > { %v2065_v59 = vld [vmem:[%s2599_s12 + $0xe0] ss:$12 sps:$4 sm:$0xff]   ;;  %v2066_v60 = vld [vmem:[%s2599_s12 + $0xdc] ss:$12 sps:$4 sm:$0xff]   ;;  %v2068_v61 = vld [vmem:[%s2599_s12 + $0xf8] ss:$12 sps:$4 sm:$0xff]  }
  0x9d   : > { %v2069_v62 = vld [vmem:[%s2599_s12 + $0xd8] ss:$12 sps:$4 sm:$0xff]   ;;  %v2070_v63 = vld [vmem:[%s2599_s12 + $0x110] ss:$12 sps:$4 sm:$0xff]   ;;  %v2071_v0 = vld [vmem:[%s2599_s12 + $0xf4] ss:$12 sps:$4 sm:$0xff]  }
  0x9e   : > { %1702 = vmatpush3.bf16.msra.mxu0 %v2004_v13  ;;  %1888 = vmatpush3.bf16.msra.mxu1 %v2004_v13  ;;  %v2073_v1 = vld [vmem:[%s2599_s12 + $0x128] ss:$12 sps:$4 sm:$0xff]   ;;  %v2074_v2 = vld [vmem:[%s2599_s12 + $0xf0] ss:$12 sps:$4 sm:$0xff]   ;;  %v2075_v3 = vld [vmem:[%s2599_s12 + $0x140] ss:$12 sps:$4 sm:$0xff]  }
  0x9f   : > { %1703 = vmatprep.subr.bf16.mxu0 %v2005_v14  ;;  %1881 = vmatprep.subr.bf16.mxu1 %v2005_v14  ;;  %v2076_v4 = vld [vmem:[%s2599_s12 + $0x10c] ss:$12 sps:$4 sm:$0xff]   ;;  %v2079_v6 = vld [vmem:[%s2599_s12 + $0x108] ss:$12 sps:$4 sm:$0xff]   ;;  %v2080_v7 = vld [vmem:[%s2599_s12 + $0x170] ss:$12 sps:$4 sm:$0xff]  }
  0xa0   : > { %v2078_v5 = vld [vmem:[%s2599_s12 + $0x158] ss:$12 sps:$4 sm:$0xff]  }
  0xa2   : > { %1704 = vmatpush3.bf16.msra.mxu0 %v2006_v15  ;;  %1889 = vmatpush3.bf16.msra.mxu1 %v2006_v15 }
  0xa3   : > { %1705 = vmatprep.subr.bf16.mxu0 %v2007_v16  ;;  %1882 = vmatprep.subr.bf16.mxu1 %v2007_v16 }
  0xa6   : > { %1706 = vmatpush3.bf16.msra.mxu0 %v2008_v17  ;;  %1890 = vmatpush3.bf16.msra.mxu1 %v2008_v17 }
  0xa7   : > { %1827 = vmatprep.subr.bf16.mxu1 %v2015_v18 }
  0xa9   : > { %925 = vmatmul.mubr.bf16.vlgmr.msra.gmra.mrb[0].mxu0 %v2009_v19  ;;  %1021 = vmatmul.mubr.bf16.vlgmr.msra.gmra.mrb[0].mxu1 %v2012_v20 }
  0xaa   : > { %1828 = vmatpush3.bf16.msra.mxu1 %v2015_v18  ;;  %932 = vmatprep.mubr.bf16.mxu0 %v2017_v21 }
  0xab   : > { %1829 = vmatprep.subr.bf16.mxu1 %v2016_v22  ;;  %1028 = vmatprep.mubr.bf16.mxu1 %v2019_v23 }
  0xae   : > { %1830 = vmatpush3.bf16.msra.mxu1 %v2016_v22 }
  0xaf   : > { %1831 = vmatprep.subr.bf16.mxu1 %v2023_v25 }
  0xb1   : > { %933 = vmatmul.mubr.bf16.gmra.mrb[4].mxu0 %v2021_v24  ;;  %1029 = vmatmul.mubr.bf16.gmra.mrb[4].mxu1 %v2022_v26 }
  0xb2   : > { %1832 = vmatpush3.bf16.msra.mxu1 %v2023_v25  ;;  %940 = vmatprep.mubr.bf16.mxu0 %v2025_v28 }
  0xb3   : > { %1833 = vmatprep.subr.bf16.mxu1 %v2024_v27  ;;  %1036 = vmatprep.mubr.bf16.mxu1 %v2027_v29 }
  0xb6   : > { %1834 = vmatpush3.bf16.msra.mxu1 %v2024_v27 }
  0xb7   : > { %1835 = vmatprep.subr.bf16.mxu1 %v2031_v30 }
  0xb9   : > { %941 = vmatmul.mubr.bf16.gmra.mrb[8].mxu0 %v2029_v31  ;;  %1037 = vmatmul.mubr.bf16.gmra.mrb[8].mxu1 %v2030_v32 }
  0xba   : > { %1836 = vmatpush3.bf16.msra.mxu1 %v2031_v30  ;;  %948 = vmatprep.mubr.bf16.mxu0 %v2033_v34 }
  0xbb   : > { %1837 = vmatprep.subr.bf16.mxu1 %v2032_v33  ;;  %1044 = vmatprep.mubr.bf16.mxu1 %v2035_v35 }
  0xbe   : > { %1838 = vmatpush3.bf16.msra.mxu1 %v2032_v33 }
  0xbf   : > { %1839 = vmatprep.subr.bf16.mxu1 %v2039_v36 }
  0xc1   : > { %949 = vmatmul.mubr.bf16.gmra.mrb[12].mxu0 %v2037_v37  ;;  %1045 = vmatmul.mubr.bf16.gmra.mrb[12].mxu1 %v2038_v38 }
  0xc2   : > { %1840 = vmatpush3.bf16.msra.mxu1 %v2039_v36  ;;  %956 = vmatprep.mubr.bf16.mxu0 %v2041_v39 }
  0xc3   : > { %1841 = vmatprep.subr.bf16.mxu1 %v2040_v40  ;;  %1843 = vmatprep.mubr.bf16.mxu1 %v2043_v41 }
  0xc6   : > { %1842 = vmatpush3.bf16.msra.mxu1 %v2040_v40 }
  0xc9   : > { %957 = vmatmul.mubr.bf16.gmra.mrb[16].mxu0 %v2044_v42  ;;  %1844 = vmatmul.mubr.bf16.vlgmr.msra.gmra.mrb[16].mxu1 %v2045_v43 }
  0xca   : > { %964 = vmatprep.mubr.bf16.mxu0 %v2046_v44  ;;  %1847 = vmatprep.mubr.bf16.mxu1 %v2048_v45 }
  0xd1   : > { %965 = vmatmul.mubr.bf16.gmra.mrb[20].mxu0 %v2049_v46  ;;  %1848 = vmatmul.mubr.bf16.gmra.mrb[20].mxu1 %v2050_v47 }
  0xd2   : > { %972 = vmatprep.mubr.bf16.mxu0 %v2051_v48  ;;  %1851 = vmatprep.mubr.bf16.mxu1 %v2053_v49 }
  0xd9   : > { %973 = vmatmul.mubr.bf16.gmra.mrb[24].mxu0 %v2054_v50  ;;  %1852 = vmatmul.mubr.bf16.gmra.mrb[24].mxu1 %v2055_v51 }
  0xda   : > { %980 = vmatprep.mubr.bf16.mxu0 %v2056_v52  ;;  %1855 = vmatprep.mubr.bf16.mxu1 %v2058_v53 }
  0xe1   : > { %981 = vmatmul.mubr.bf16.gmra.mrb[28].mxu0 %v2059_v54  ;;  %1856 = vmatmul.mubr.bf16.gmra.mrb[28].mxu1 %v2060_v55 }
  0xe2   : > { %988 = vmatprep.mubr.bf16.mxu0 %v2061_v56  ;;  %1859 = vmatprep.mubr.bf16.mxu1 %v2063_v57 }
  0xe9   : > { %989 = vmatmul.mubr.bf16.gmra.mrb[32].mxu0 %v2064_v58  ;;  %1860 = vmatmul.mubr.bf16.gmra.mrb[32].mxu1 %v2065_v59  ;;  %v2677_v58 = vld [vmem:[#allocation8] ss:$0 sm:$0xff] }
  0xea   : > { %996 = vmatprep.mubr.bf16.mxu0 %v2066_v60  ;;  %1863 = vmatprep.mubr.bf16.mxu1 %v2068_v61 }
  0xf1   : > { %997 = vmatmul.mubr.bf16.gmra.mrb[36].mxu0 %v2069_v62  ;;  %1864 = vmatmul.mubr.bf16.gmra.mrb[36].mxu1 %v2070_v63  ;;  %v2679_v62 = vld [vmem:[#allocation9] ss:$0 sm:$0xff] }
  0xf2   : > { %1004 = vmatprep.mubr.bf16.mxu0 %v2071_v0  ;;  %1867 = vmatprep.mubr.bf16.mxu1 %v2073_v1 }
  0xf9   : > { %1005 = vmatmul.mubr.bf16.gmra.mrb[40].mxu0 %v2074_v2  ;;  %1868 = vmatmul.mubr.bf16.gmra.mrb[40].mxu1 %v2075_v3 }
  0xfa   : > { %1012 = vmatprep.mubr.bf16.mxu0 %v2076_v4  ;;  %1871 = vmatprep.mubr.bf16.mxu1 %v2078_v5 }
 0x101   : > { %1013 = vmatmul.mubr.bf16.gmra.mrb[44].mxu0 %v2079_v6  ;;  %1872 = vmatmul.mubr.bf16.gmra.mrb[44].mxu1 %v2080_v7 }
 0x17c   : > { %v1707_v8 = vpop.f32.mrb[0].mxu0  ;;  %v1779_v9 = vpop.f32.mrb[0].mxu1 }
 0x17d   : > { %v1708_v10 = vpop.f32.mrb[1].mxu0  ;;  %v1780_v11 = vpop.f32.mrb[1].mxu1 }
 0x17e   : > { %v1709_v12 = vadd.f32 %v1708_v10, %v1707_v8  ;;  %v2661_v13 = vadd.f32 %v1780_v11, %v1779_v9  ;;  %v1710_v14 = vpop.f32.mrb[2].mxu0  ;;  %v1782_v15 = vpop.f32.mrb[2].mxu1 }
 0x17f   : > { %v1711_v16 = vpop.f32.mrb[3].mxu0  ;;  %v1783_v17 = vpop.f32.mrb[3].mxu1 }
 0x180   : > { %v1712_v18 = vadd.f32 %v1711_v16, %v1710_v14  ;;  %v2663_v19 = vadd.f32 %v1783_v17, %v1782_v15 }
 0x184   : > { %v1713_v20 = vpop.f32.mrb[4].mxu0  ;;  %v1785_v21 = vpop.f32.mrb[4].mxu1 }
 0x185   : > { %v1714_v22 = vpop.f32.mrb[5].mxu0  ;;  %v1786_v23 = vpop.f32.mrb[5].mxu1 }
 0x186   : > { %v1715_v24 = vadd.f32 %v1714_v22, %v1713_v20  ;;  %v2665_v25 = vadd.f32 %v1786_v23, %v1785_v21  ;;  %v1716_v26 = vpop.f32.mrb[6].mxu0  ;;  %v1788_v27 = vpop.f32.mrb[6].mxu1 }
 0x187   : > { %v1717_v28 = vpop.f32.mrb[7].mxu0  ;;  %v1789_v29 = vpop.f32.mrb[7].mxu1 }
 0x188   : > { %v1718_v30 = vadd.f32 %v1717_v28, %v1716_v26  ;;  %v2667_v31 = vadd.f32 %v1789_v29, %v1788_v27 }
 0x18c   : > { %v1719_v32 = vpop.f32.mrb[8].mxu0  ;;  %v1791_v33 = vpop.f32.mrb[8].mxu1 }
 0x18d   : > { %v1720_v34 = vpop.f32.mrb[9].mxu0  ;;  %v1792_v35 = vpop.f32.mrb[9].mxu1 }
 0x18e   : > { %v1721_v36 = vadd.f32 %v1720_v34, %v1719_v32  ;;  %v2669_v37 = vadd.f32 %v1792_v35, %v1791_v33  ;;  %v1722_v38 = vpop.f32.mrb[10].mxu0  ;;  %v1794_v39 = vpop.f32.mrb[10].mxu1 }
 0x18f   : > { %v1723_v40 = vpop.f32.mrb[11].mxu0  ;;  %v1795_v41 = vpop.f32.mrb[11].mxu1 }
 0x190   : > { %v1724_v42 = vadd.f32 %v1723_v40, %v1722_v38  ;;  %v2671_v43 = vadd.f32 %v1795_v41, %v1794_v39 }
 0x194   : > { %v1725_v44 = vpop.f32.mrb[12].mxu0  ;;  %v1797_v45 = vpop.f32.mrb[12].mxu1 }
 0x195   : > { %v1726_v46 = vpop.f32.mrb[13].mxu0  ;;  %v1798_v47 = vpop.f32.mrb[13].mxu1 }
 0x196   : > { %v1727_v48 = vadd.f32 %v1726_v46, %v1725_v44  ;;  %v2673_v49 = vadd.f32 %v1798_v47, %v1797_v45  ;;  %v1728_v50 = vpop.f32.mrb[14].mxu0  ;;  %v1800_v51 = vpop.f32.mrb[14].mxu1 }
 0x197   : > { %v1729_v52 = vpop.f32.mrb[15].mxu0  ;;  %v1801_v53 = vpop.f32.mrb[15].mxu1 }
 0x198   : > { %v1730_v54 = vadd.f32 %v1729_v52, %v1728_v50  ;;  %v2675_v55 = vadd.f32 %v1801_v53, %v1800_v51 }
 0x19c   : > { %v1731_v56 = vpop.f32.mrb[16].mxu0  ;;  %v1845_v57 = vpop.f32.mrb[16].mxu1 }
 0x19d   : > { %v1096_v59 = vadd.f32 %v1845_v57, %v1715_v24  ;;  %v1732_v60 = vpop.f32.mrb[17].mxu0  ;;  %v1087_v61 = vpop.f32.mrb[17].mxu1 }
 0x19e   : > { %v1733_v63 = vadd.f32 %v1732_v60, %v1731_v56  ;;  %v1088_v0 = vadd.f32 %v1709_v12, %v1087_v61  ;;  %v1734_v1 = vpop.f32.mrb[18].mxu0  ;;  %v1846_v2 = vpop.f32.mrb[18].mxu1 }
 0x19f   : > { %v1322_v3 = vmul.f32 %v2677_v58, %v1096_v59  ;;  %v1099_v4 = vadd.f32 %v1846_v2, %v1718_v30  ;;  %v1735_v5 = vpop.f32.mrb[19].mxu0  ;;  %v1090_v6 = vpop.f32.mrb[19].mxu1 }
 0x1a0   : > { %v1320_v7 = vmul.f32 %v2677_v58, %v1088_v0  ;;  %v1736_v8 = vadd.f32 %v1735_v5, %v1734_v1  ;;  %v1091_v9 = vadd.f32 %v1712_v18, %v1090_v6 }
 0x1a1   : > { %v1361_v10 = vadd.f32 %v2679_v62, %v1322_v3  ;;  %v1323_v11 = vmul.f32 %v2677_v58, %v1099_v4 }
 0x1a2   : > { %v1359_v14 = vadd.f32 %v2679_v62, %v1320_v7  ;;  %v1321_v15 = vmul.f32 %v2677_v58, %v1091_v9 }
 0x1a3   : > { %2081 = vtanh.f32 %v1361_v10  ;;  %v1362_v12 = vadd.f32 %v2679_v62, %v1323_v11 }
 0x1a4   : > { %2083 = vtanh.f32 %v1359_v14  ;;  %v1360_v16 = vadd.f32 %v2679_v62, %v1321_v15  ;;  %v1737_v17 = vpop.f32.mrb[20].mxu0  ;;  %v1849_v20 = vpop.f32.mrb[20].mxu1 }
 0x1a5   : > { %2085 = vtanh.f32 %v1362_v12  ;;  %v1112_v21 = vadd.f32 %v1849_v20, %v1727_v48  ;;  %v1738_v18 = vpop.f32.mrb[21].mxu0  ;;  %v1103_v22 = vpop.f32.mrb[21].mxu1 }
 0x1a6   : > { %2087 = vtanh.f32 %v1360_v16  ;;  %v1739_v23 = vadd.f32 %v1738_v18, %v1737_v17  ;;  %v1104_v24 = vadd.f32 %v1721_v36, %v1103_v22  ;;  %v1740_v26 = vpop.f32.mrb[22].mxu0  ;;  %v1850_v27 = vpop.f32.mrb[22].mxu1 }
 0x1a7   : > { %v1326_v28 = vmul.f32 %v2677_v58, %v1112_v21  ;;  %v1115_v29 = vadd.f32 %v1850_v27, %v1730_v54  ;;  %v1741_v30 = vpop.f32.mrb[23].mxu0  ;;  %v1106_v32 = vpop.f32.mrb[23].mxu1 }
 0x1a8   : > { %v1324_v33 = vmul.f32 %v2677_v58, %v1104_v24  ;;  %v1742_v34 = vadd.f32 %v1741_v30, %v1740_v26  ;;  %v1107_v35 = vadd.f32 %v1724_v42, %v1106_v32 }
 0x1a9   : > { %v1365_v38 = vadd.f32 %v2679_v62, %v1326_v28  ;;  %v1327_v39 = vmul.f32 %v2677_v58, %v1115_v29 }
 0x1aa   : > { %v1363_v40 = vadd.f32 %v2679_v62, %v1324_v33  ;;  %v1325_v36 = vmul.f32 %v2677_v58, %v1107_v35 }
 0x1ab   : > { %2089 = vtanh.f32 %v1365_v38  ;;  %v1366_v41 = vadd.f32 %v2679_v62, %v1327_v39 }
 0x1ac   : > { %2091 = vtanh.f32 %v1363_v40  ;;  %v1364_v44 = vadd.f32 %v2679_v62, %v1325_v36  ;;  %v1743_v45 = vpop.f32.mrb[24].mxu0  ;;  %v1853_v46 = vpop.f32.mrb[24].mxu1 }
 0x1ad   : > { %v2082_v47 = vpop.eup %2081  ;;  %2093 = vtanh.f32 %v1366_v41  ;;  %v1128_v48 = vadd.f32 %v1853_v46, %v1739_v23  ;;  %v1744_v42 = vpop.f32.mrb[25].mxu0 }
 0x1ae   : > { %v1119_v50 = vpop.f32.mrb[25].mxu1  ;;  %v2084_v51 = vpop.eup %2083  ;;  %1425 = vst [vmem:[%s2698_s25 + $0x10] sm:$0xff] %v2082_v47  ;;  %2095 = vtanh.f32 %v1364_v44  ;;  %v1745_v52 = vadd.f32 %v1744_v42, %v1743_v45 }
 0x1af   : > { %v1120_v53 = vadd.f32 %v1733_v63, %v1119_v50  ;;  %v1746_v54 = vpop.f32.mrb[26].mxu0  ;;  %v1854_v56 = vpop.f32.mrb[26].mxu1  ;;  %1423 = vst [vmem:[%s2698_s25] sm:$0xff] %v2084_v51  ;;  %v1330_v59 = vmul.f32 %v2677_v58, %v1128_v48 }
 0x1b0   : > { %v2086_v57 = vpop.eup %2085  ;;  %v1131_v60 = vadd.f32 %v1854_v56, %v1742_v34  ;;  %v1747_v61 = vpop.f32.mrb[27].mxu0 }
 0x1b1   : > { %v1122_v0 = vpop.f32.mrb[27].mxu1  ;;  %v2088_v1 = vpop.eup %2087  ;;  %1426 = vst [vmem:[%s2698_s25 + $0x18] sm:$0xff] %v2086_v57  ;;  %v1328_v2 = vmul.f32 %v2677_v58, %v1120_v53  ;;  %v1748_v3 = vadd.f32 %v1747_v61, %v1746_v54  ;;  %v1369_v5 = vadd.f32 %v2679_v62, %v1330_v59 }
 0x1b2   : > { %v1123_v4 = vadd.f32 %v1736_v8, %v1122_v0  ;;  %1424 = vst [vmem:[%s2698_s25 + $0x8] sm:$0xff] %v2088_v1  ;;  %v1331_v63 = vmul.f32 %v2677_v58, %v1131_v60 }
 0x1b3   : > { %v1367_v6 = vadd.f32 %v2679_v62, %v1328_v2  ;;  %2097 = vtanh.f32 %v1369_v5 }
 0x1b4   : > { %v1329_v7 = vmul.f32 %v2677_v58, %v1123_v4  ;;  %v1370_v9 = vadd.f32 %v2679_v62, %v1331_v63  ;;  %v1749_v11 = vpop.f32.mrb[28].mxu0  ;;  %v1857_v14 = vpop.f32.mrb[28].mxu1 }
 0x1b5   : > { %2099 = vtanh.f32 %v1367_v6  ;;  %v2090_v8 = vpop.eup %2089  ;;  %v1750_v15 = vpop.f32.mrb[29].mxu0 }
 0x1b6   : > { %v1368_v10 = vadd.f32 %v2679_v62, %v1329_v7  ;;  %2101 = vtanh.f32 %v1370_v9  ;;  %v1135_v12 = vpop.f32.mrb[29].mxu1  ;;  %v2092_v16 = vpop.eup %2091  ;;  %1429 = vst [vmem:[%s2698_s25 + $0x30] sm:$0xff] %v2090_v8  ;;  %v1751_v17 = vadd.f32 %v1750_v15, %v1749_v11 }
 0x1b7   : > { %v1136_v20 = vadd.f32 %v1745_v52, %v1135_v12  ;;  %v1752_v21 = vpop.f32.mrb[30].mxu0  ;;  %v1858_v18 = vpop.f32.mrb[30].mxu1  ;;  %1427 = vst [vmem:[%s2698_s25 + $0x20] sm:$0xff] %v2092_v16 }
 0x1b8   : > { %2103 = vtanh.f32 %v1368_v10  ;;  %v2094_v22 = vpop.eup %2093  ;;  %v1753_v23 = vpop.f32.mrb[31].mxu0  ;;  %v1144_v27 = vadd.f32 %v1857_v14, %v1751_v17 }
 0x1b9   : > { %v1138_v24 = vpop.f32.mrb[31].mxu1  ;;  %v2096_v26 = vpop.eup %2095  ;;  %1430 = vst [vmem:[%s2698_s25 + $0x38] sm:$0xff] %v2094_v22  ;;  %v1332_v28 = vmul.f32 %v2677_v58, %v1136_v20  ;;  %v1754_v29 = vadd.f32 %v1753_v23, %v1752_v21 }
 0x1ba   : > { %v1139_v30 = vadd.f32 %v1748_v3, %v1138_v24  ;;  %1428 = vst [vmem:[%s2698_s25 + $0x28] sm:$0xff] %v2096_v26  ;;  %v1334_v32 = vmul.f32 %v2677_v58, %v1144_v27 }
 0x1bb   : > { %v1371_v33 = vadd.f32 %v2679_v62, %v1332_v28  ;;  %v1147_v34 = vadd.f32 %v1858_v18, %v1754_v29 }
 0x1bc   : > { %v1333_v35 = vmul.f32 %v2677_v58, %v1139_v30  ;;  %v1373_v38 = vadd.f32 %v2679_v62, %v1334_v32  ;;  %v1755_v36 = vpop.f32.mrb[32].mxu0  ;;  %v1861_v41 = vpop.f32.mrb[32].mxu1 }
 0x1bd   : > { %2105 = vtanh.f32 %v1371_v33  ;;  %v1335_v39 = vmul.f32 %v2677_v58, %v1147_v34  ;;  %v2098_v44 = vpop.eup %2097  ;;  %v1756_v45 = vpop.f32.mrb[33].mxu0 }
 0x1be   : > { %v1372_v40 = vadd.f32 %v2679_v62, %v1333_v35  ;;  %v1151_v46 = vpop.f32.mrb[33].mxu1  ;;  %1433 = vst [vmem:[%s2698_s25 + $0x50] sm:$0xff] %v2098_v44  ;;  %2107 = vtanh.f32 %v1373_v38  ;;  %v1757_v42 = vadd.f32 %v1756_v45, %v1755_v36  ;;  %v1758_v50 = vpop.f32.mrb[34].mxu0 }
 0x1bf   : > { %v2100_v47 = vpop.eup %2099  ;;  %v1374_v48 = vadd.f32 %v2679_v62, %v1335_v39  ;;  %v1862_v51 = vpop.f32.mrb[34].mxu1 }
 0x1c0   : > { %v2102_v52 = vpop.eup %2101  ;;  %1431 = vst [vmem:[%s2698_s25 + $0x40] sm:$0xff] %v2100_v47  ;;  %2109 = vtanh.f32 %v1372_v40  ;;  %v1759_v53 = vpop.f32.mrb[35].mxu0  ;;  %v1152_v57 = vadd.f32 %v1757_v42, %v1151_v46 }
 0x1c1   : > { %v1154_v54 = vpop.f32.mrb[35].mxu1  ;;  %1434 = vst [vmem:[%s2698_s25 + $0x58] sm:$0xff] %v2102_v52  ;;  %2111 = vtanh.f32 %v1374_v48  ;;  %v1760_v59 = vadd.f32 %v1759_v53, %v1758_v50 }
 0x1c2   : > { %v2104_v56 = vpop.eup %2103  ;;  %v1336_v60 = vmul.f32 %v2677_v58, %v1152_v57 }
 0x1c3   : > { %1432 = vst [vmem:[%s2698_s25 + $0x48] sm:$0xff] %v2104_v56  ;;  %v1155_v61 = vadd.f32 %v1760_v59, %v1154_v54 }
 0x1c4   : > { %v1375_v0 = vadd.f32 %v2679_v62, %v1336_v60  ;;  %v1761_v2 = vpop.f32.mrb[36].mxu0  ;;  %v2731_v3 = vpop.f32.mrb[36].mxu1 }
 0x1c5   : > { %v1337_v1 = vmul.f32 %v2677_v58, %v1155_v61  ;;  %v1762_v4 = vpop.f32.mrb[37].mxu0  ;;  %v1167_v5 = vpop.f32.mrb[37].mxu1 }
 0x1c6   : > { %2113 = vtanh.f32 %v1375_v0  ;;  %v1763_v7 = vadd.f32 %v1762_v4, %v1761_v2  ;;  %v1764_v9 = vpop.f32.mrb[38].mxu0  ;;  %v2734_v10 = vpop.f32.mrb[38].mxu1 }
 0x1c7   : > { %v2106_v63 = vpop.eup %2105  ;;  %v1376_v6 = vadd.f32 %v2679_v62, %v1337_v1  ;;  %v1765_v11 = vpop.f32.mrb[39].mxu0 }
 0x1c8   : > { %1435 = vst [vmem:[%s2698_s25 + $0x60] sm:$0xff] %v2106_v63  ;;  %v1170_v14 = vpop.f32.mrb[39].mxu1  ;;  %v2108_v8 = vpop.eup %2107  ;;  %v1160_v15 = vadd.f32 %v1861_v41, %v1763_v7  ;;  %v1766_v12 = vadd.f32 %v1765_v11, %v1764_v9 }
 0x1c9   : > { %2115 = vtanh.f32 %v1376_v6  ;;  %1437 = vst [vmem:[%s2698_s25 + $0x70] sm:$0xff] %v2108_v8 }
 0x1ca   : > { %v2110_v16 = vpop.eup %2109  ;;  %v1338_v20 = vmul.f32 %v2677_v58, %v1160_v15  ;;  %v1163_v21 = vadd.f32 %v1862_v51, %v1766_v12 }
 0x1cb   : > { %v2112_v17 = vpop.eup %2111  ;;  %1436 = vst [vmem:[%s2698_s25 + $0x68] sm:$0xff] %v2110_v16 }
 0x1cc   : > { %1438 = vst [vmem:[%s2698_s25 + $0x78] sm:$0xff] %v2112_v17  ;;  %v1377_v18 = vadd.f32 %v2679_v62, %v1338_v20  ;;  %v1339_v22 = vmul.f32 %v2677_v58, %v1163_v21  ;;  %v1767_v23 = vpop.f32.mrb[40].mxu0  ;;  %v1869_v24 = vpop.f32.mrb[40].mxu1 }
 0x1cd   : > { %v1192_v26 = vadd.f32 %v1869_v24, %v2665_v25  ;;  %v1768_v27 = vpop.f32.mrb[41].mxu0  ;;  %v1183_v28 = vpop.f32.mrb[41].mxu1 }
 0x1ce   : > { %2117 = vtanh.f32 %v1377_v18  ;;  %v1378_v29 = vadd.f32 %v2679_v62, %v1339_v22  ;;  %v1769_v30 = vadd.f32 %v1768_v27, %v1767_v23  ;;  %v1184_v32 = vadd.f32 %v2661_v13, %v1183_v28  ;;  %v1770_v33 = vpop.f32.mrb[42].mxu0  ;;  %v1870_v34 = vpop.f32.mrb[42].mxu1 }
 0x1cf   : > { %v1346_v35 = vmul.f32 %v2677_v58, %v1192_v26  ;;  %v1195_v38 = vadd.f32 %v1870_v34, %v2667_v31  ;;  %v1771_v39 = vpop.f32.mrb[43].mxu0  ;;  %v1186_v40 = vpop.f32.mrb[43].mxu1 }
 0x1d0   : > { %v2114_v36 = vpop.eup %2113  ;;  %2119 = vtanh.f32 %v1378_v29  ;;  %v1168_v25 = vadd.f32 %v1769_v30, %v1167_v5  ;;  %v1344_v41 = vmul.f32 %v2677_v58, %v1184_v32  ;;  %v1772_v44 = vadd.f32 %v1771_v39, %v1770_v33 }
 0x1d1   : > { %1439 = vst [vmem:[%s2698_s25 + $0x80] sm:$0xff] %v2114_v36  ;;  %v1385_v45 = vadd.f32 %v2679_v62, %v1346_v35  ;;  %v1347_v13 = vmul.f32 %v2677_v58, %v1195_v38  ;;  %v1187_v46 = vadd.f32 %v2663_v19, %v1186_v40 }
 0x1d2   : > { %v1340_v48 = vmul.f32 %v2677_v58, %v1168_v25  ;;  %v1383_v31 = vadd.f32 %v2679_v62, %v1344_v41  ;;  %v1171_v42 = vadd.f32 %v1772_v44, %v1170_v14 }
 0x1d3   : > { %v2116_v47 = vpop.eup %2115  ;;  %2121 = vtanh.f32 %v1385_v45  ;;  %v1386_v50 = vadd.f32 %v2679_v62, %v1347_v13  ;;  %v1345_v51 = vmul.f32 %v2677_v58, %v1187_v46 }
 0x1d4   : > { %1440 = vst [vmem:[%s2698_s25 + $0x88] sm:$0xff] %v2116_v47  ;;  %v1379_v52 = vadd.f32 %v2679_v62, %v1340_v48  ;;  %2123 = vtanh.f32 %v1383_v31  ;;  %v1341_v53 = vmul.f32 %v2677_v58, %v1171_v42  ;;  %v1773_v54 = vpop.f32.mrb[44].mxu0  ;;  %v1873_v56 = vpop.f32.mrb[44].mxu1 }
 0x1d5   : > { %2125 = vtanh.f32 %v1386_v50  ;;  %v1384_v19 = vadd.f32 %v2679_v62, %v1345_v51  ;;  %v1208_v57 = vadd.f32 %v1873_v56, %v2673_v49  ;;  %v1774_v59 = vpop.f32.mrb[45].mxu0  ;;  %v1199_v60 = vpop.f32.mrb[45].mxu1 }
 0x1d6   : > { %2127 = vtanh.f32 %v1379_v52  ;;  %v1380_v61 = vadd.f32 %v2679_v62, %v1341_v53  ;;  %v1775_v0 = vadd.f32 %v1774_v59, %v1773_v54  ;;  %v1200_v1 = vadd.f32 %v2669_v37, %v1199_v60  ;;  %v1776_v2 = vpop.f32.mrb[46].mxu0  ;;  %v1874_v4 = vpop.f32.mrb[46].mxu1 }
 0x1d7   : > { %2129 = vtanh.f32 %v1384_v19  ;;  %v1350_v5 = vmul.f32 %v2677_v58, %v1208_v57  ;;  %v1211_v63 = vadd.f32 %v1874_v4, %v2675_v55  ;;  %v1777_v6 = vpop.f32.mrb[47].mxu0  ;;  %v1202_v7 = vpop.f32.mrb[47].mxu1 }
 0x1d8   : > { %v2118_v49 = vpop.eup %2117  ;;  %2131 = vtanh.f32 %v1380_v61  ;;  %v1176_v9 = vadd.f32 %v2731_v3, %v1775_v0  ;;  %v1348_v11 = vmul.f32 %v2677_v58, %v1200_v1  ;;  %v1778_v14 = vadd.f32 %v1777_v6, %v1776_v2 }
 0x1d9   : > { %1441 = vst [vmem:[%s2698_s25 + $0x90] sm:$0xff] %v2118_v49  ;;  %v1389_v37 = vadd.f32 %v2679_v62, %v1350_v5  ;;  %v1351_v8 = vmul.f32 %v2677_v58, %v1211_v63  ;;  %v1203_v15 = vadd.f32 %v2671_v43, %v1202_v7 }
 0x1da   : > { %v2120_v12 = vpop.eup %2119  ;;  %v1342_v55 = vmul.f32 %v2677_v58, %v1176_v9  ;;  %v1387_v16 = vadd.f32 %v2679_v62, %v1348_v11  ;;  %v1179_v17 = vadd.f32 %v2734_v10, %v1778_v14 }
 0x1db   : > { %1442 = vst [vmem:[%s2698_s25 + $0x98] sm:$0xff] %v2120_v12  ;;  %2133 = vtanh.f32 %v1389_v37  ;;  %v1390_v3 = vadd.f32 %v2679_v62, %v1351_v8  ;;  %v1349_v20 = vmul.f32 %v2677_v58, %v1203_v15 }
 0x1dc   : > { %v1381_v21 = vadd.f32 %v2679_v62, %v1342_v55  ;;  %2135 = vtanh.f32 %v1387_v16  ;;  %v1343_v43 = vmul.f32 %v2677_v58, %v1179_v17 }
 0x1dd   : > { %v2122_v18 = vpop.eup %2121  ;;  %2137 = vtanh.f32 %v1390_v3  ;;  %v1388_v10 = vadd.f32 %v2679_v62, %v1349_v20 }
 0x1de   : > { %v2124_v22 = vpop.eup %2123  ;;  %1449 = vst [vmem:[%s2698_s25 + $0xd0] sm:$0xff] %v2122_v18  ;;  %2139 = vtanh.f32 %v1381_v21  ;;  %v1382_v23 = vadd.f32 %v2679_v62, %v1343_v43 }
 0x1df   : > { %v2126_v24 = vpop.eup %2125  ;;  %1447 = vst [vmem:[%s2698_s25 + $0xc0] sm:$0xff] %v2124_v22  ;;  %2141 = vtanh.f32 %v1388_v10 }
 0x1e0   : > { %v2128_v26 = vpop.eup %2127  ;;  %1450 = vst [vmem:[%s2698_s25 + $0xd8] sm:$0xff] %v2126_v24  ;;  %2143 = vtanh.f32 %v1382_v23 }
 0x1e1   : > { %v2130_v58 = vpop.eup %2129  ;;  %1443 = vst [vmem:[%s2698_s25 + $0xa0] sm:$0xff] %v2128_v26 }
 0x1e2   : > { %v2132_v27 = vpop.eup %2131  ;;  %1448 = vst [vmem:[%s2698_s25 + $0xc8] sm:$0xff] %v2130_v58 }
 0x1e3   : > { %1444 = vst [vmem:[%s2698_s25 + $0xa8] sm:$0xff] %v2132_v27 }
 0x1e5   : > { %v2134_v28 = vpop.eup %2133 }
 0x1e6   : > { %v2136_v62 = vpop.eup %2135  ;;  %1453 = vst [vmem:[%s2698_s25 + $0xf0] sm:$0xff] %v2134_v28 }
 0x1e7   : > { %v2138_v29 = vpop.eup %2137  ;;  %1451 = vst [vmem:[%s2698_s25 + $0xe0] sm:$0xff] %v2136_v62 }
 0x1e8   : > { %v2140_v30 = vpop.eup %2139  ;;  %1454 = vst [vmem:[%s2698_s25 + $0xf8] sm:$0xff] %v2138_v29 }
 0x1e9   : > { %v2142_v32 = vpop.eup %2141  ;;  %1445 = vst [vmem:[%s2698_s25 + $0xb0] sm:$0xff] %v2140_v30 }
 0x1ea   : > { %v2144_v33 = vpop.eup %2143  ;;  %1452 = vst [vmem:[%s2698_s25 + $0xe8] sm:$0xff] %v2142_v32 }
 0x1eb   : > { %1446 = vst [vmem:[%s2698_s25 + $0xb8] sm:$0xff] %v2144_v33 }
 0x1ec   : > { %2272 = shalt.err (!%p2269_p0)
}
 0x1ed   : > { %s2273_s29 = scalar_lea.hbm %s2796_s6, 4096  ;;  %s2277_s10 = scalar_lea.hbm %s2854_s4, 8192 }
 0x1ee   : > { %p2274_p4 = scmp.ne.s32.totalorder %s2796_s6, %s2273_s29  ;;  %p2278_p12 = scmp.lt.u32.totalorder %s2796_s6, %s2854_s4 }
 0x1ef   : > { %p2279_p1 = scmp.lt.u32.totalorder %s2277_s10, %s2273_s29  ;;  %p2281_p13 = scmp.lt.u32.totalorder %s2273_s29, %s2796_s6 }
 0x1f0   : > { %p2275_p2 = pnand %p2274_p4, %p2539_p10 }
 0x1f1   : > { %p2280_p11 = por %p2279_p1, %p2278_p12 }
 0x1f2   : > { %p2276_p8 = pneg %p2275_p2 }
 0x1f3   : > { %p2282_p6 = por %p2281_p13, %p2280_p11 }
 0x1f5   : > { %p2283_p3 = pnand %p2282_p6, %p2276_p8 }
 0x1f7   : > { %2286 = shalt.err (!%p2283_p3)
}
 0x1f8   : > { %s2360_s25 = smov 128   ;;  %s2361_s27 = smov 8  }
 0x1f9   : > { %1908 = dma.vmem_to_hbm [thread:$0]  (%p2539_p10), %s2798_s11, 4096, %s2796_s6, %s1456_s18, %s2360_s25, %s2360_s25, %s2361_s27  }
 0x1fa PF: > { %s2874_s21 = sld [smem:[#allocation16_spill]]  ;;  %s1485_s28 = sand.u32 1, %s2329_s15  }
 0x1fb   : > { %p2876_p7 = scmp.ge.s32.totalorder %s2349_s20, 2  ;;  %s1486_s7 = scalar_lea.sflag [#allocation5], %s1485_s28 }
 0x200   : > { %p2875_p5 = scmp.ne.s32.totalorder %s2874_s21, 0 }
 0x202   : > { %p1925_p9 = pnand %p2876_p7, %p2875_p5 }
 0x204   : > { %2324 = dma.done.wait (!%p1925_p9), %s1486_s7, 4096  }
 0x205   : > { %2326 = vsyncadd (!%p1925_p9), %s1486_s7, 4294963200  ;;  %s22_s20 = sadd.s32 1, %s2349_s20   ;;  %s2877_s15 = smov %s2333_s16 }
 0x206   : > { %p19_p0 = scmp.ge.s32.totalorder %s22_s20, 4   ;;  %s2878_s16 = smov %s2337_s17 }
 0x207   : > { %s2879_s17 = smov %s2555_s24  ;;  %s2880_s18 = smov %s2345_s19 }
 0x208   : > { %s2881_s19 = smov %s2883_s26  ;;  %21 = sbr.rel (!%p19_p0) target bundleno = 8 (0x8), region = 104 }
 0x20f   :  { %1491 = vsyncpa [#allocation4], 1 }
 0x210   :  { %1493 = vsyncpa [#allocation4 + $0x1], 1 }
 0x211   :  { %1494 = vsyncpa [#allocation7], 1 }
 0x212   :  { %1495 = vsyncpa [#allocation10], 1 }
 0x213   :  { %1496 = vsyncpa [#allocation5], 1 }
 0x214   :  { %1498 = vsyncpa [#allocation5 + $0x1], 1 }

// kernel: espcn_forward.7
= control target key start
LH: loop header
LB: loop body
LE: loop exit
PB: predicated region body
PF: predicated region fallthrough
CT: control target
= control target key end

     0   :  { %9 = vsyncpa [#allocation4], 0  ;;  %s2241_s0 = inlined_call_operand.hbm [shape: bf16[512,256], index: 0, kind: input, shape index: {}]   ;;  %s2242_s1 = inlined_call_operand.hbm [shape: bf16[256,128], index: 1, kind: input, shape index: {}]   ;;  %s2243_s2 = inlined_call_operand.hbm [shape: f32[1,128], index: 2, kind: input, shape index: {}]   ;;  %s2244_s3 = inlined_call_operand.hbm [shape: f32[1,128], index: 3, kind: input, shape index: {}]   ;;  %s2245_s4 = inlined_call_operand.hbm [shape: f32[512,128], index: 4, kind: output, shape index: {}]  }
   0x1   :  { %11 = vsyncpa [#allocation4 + $0x1], 0 }
   0x2   :  { %12 = vsyncpa [#allocation7], 0 }
   0x3   :  { %13 = vsyncpa [#allocation10], 0 }
   0x4   :  { %14 = vsyncpa [#allocation5], 0 }
   0x5   :  { %16 = vsyncpa [#allocation5 + $0x1], 0  ;;  %s1819_s15 = smov 0   ;;  %s1821_s16 = smov 0  }
   0x6   :  { %s1823_s17 = smov 0   ;;  %s1825_s18 = smov 0  }
   0x7   :  { %s1827_s19 = smov 0   ;;  %s1829_s20 = smov 0  }
   0x8 LB: > { %s1211_s21 = sadd.s32 4294967295, %s1781_s20   ;;  %s1212_s22 = sadd.s32 4294967294, %s1781_s20   ;;  %s1781_s20 = sphi %s1829_s20, %s22_s20   ;;  %s1777_s19 = sphi %s1827_s19, %s2272_s19   ;;  %s1773_s18 = sphi %s1825_s18, %s2271_s18   ;;  %s1769_s17 = sphi %s1823_s17, %s2270_s17   ;;  %s1765_s16 = sphi %s1821_s16, %s2269_s16   ;;  %s1761_s15 = sphi %s1819_s15, %s2268_s15  }
   0x9   : > { %p63_p0 = scmp.ne.s32.totalorder %s1765_s16, %s1761_s15  ;;  %p1853_p1 = scmp.eq.s32.totalorder %s1211_s21, 0 }
   0xa   : > { %p1857_p2 = scmp.eq.s32.totalorder %s1211_s21, 1  ;;  %p175_p3 = scmp.eq.s32.totalorder %s1212_s22, 1 }
   0xb   : > { %s2251_s23 = scalar_select %p1853_p1, 1, 0 }
   0xc   : > { %s2252_s24 = scalar_select %p1857_p2, 1, 0 }
   0xd   : > { %p1863_p4 = por %p1853_p1, %p63_p0  ;;  %p1213_p5 = scmp.ge.s32.totalorder %s1781_s20, 1 }
   0xe   : > { %p1868_p6 = por %p175_p3, %p63_p0  ;;  %p182_p7 = scmp.lt.s32.totalorder %s1781_s20, 3 }
   0xf   : > { %s2253_s25 = scalar_select %p1863_p4, 1, 0 }
  0x10   : > { %s2254_s26 = scalar_select %p1868_p6, 1, 0 }
  0x11   : > { %p1873_p8 = pnand %p1213_p5, %p182_p7  ;;  %s1783_s28 = smov [#allocation6]  }
  0x12   : > { %2255 = sst [smem:[#allocation16_spill]] %s2254_s26  ;;  %s198_s29 = sshll.u32 %s1783_s28, 4  ;;  %s1877_s29 = int_to_ptr.vmem [resolvable:$true] %s198_s29 }
  0x13   : > { %s2256_s27 = scalar_select %p1873_p8, 1, 0 }
  0x14   : > { %p1430_p9 = pneg %p1873_p8  ;;  %s1784_s5 = smov [#allocation8]  }
  0x15   : > { %s214_s6 = sshll.u32 %s1784_s5, 4  ;;  %s1785_s7 = smov [#allocation9]   ;;  %s1888_s6 = int_to_ptr.vmem [resolvable:$true] %s214_s6 }
  0x16   : > { %p1884_p11 = pnand %p1430_p9, %p1853_p1  ;;  %s1890_s8 = sshll.u32 %s1785_s7, 4  ;;  %s228_s8 = int_to_ptr.vmem [resolvable:$true] %s1890_s8 }
  0x17   : > { %s1577_s11 = scalar_lea.hbm %s2242_s1, 2048 }
  0x18   : > { %p1578_p12 = scmp.ne.s32.totalorder %s2242_s1, %s1577_s11  ;;  %p1900_p13 = pneg %p1884_p11 }
  0x19   : > { %p1584_p5 = scmp.lt.u32.totalorder %s1577_s11, %s2242_s1 }
  0x1a   : > { %p1580_p0 = pnand %p1900_p13, %p1578_p12 }
  0x1c   : > { %p1581_p3 = pneg %p1580_p0 }
  0x1e   : > { %p1586_p7 = pnand %p1584_p5, %p1581_p3 }
  0x20   : > { %1589 = shalt.err (!%p1586_p7)
}
  0x21   : > { %s1590_s28 = scalar_lea.vmem %s1877_s29, 2048  ;;  %p1598_p1 = scmp.lt.s32.totalorder %s1877_s29, %s1877_s29 }
  0x22   : > { %p1591_p9 = scmp.ne.s32.totalorder %s1877_s29, %s1590_s28  ;;  %p1599_p4 = scmp.lt.s32.totalorder %s1590_s28, %s1590_s28 }
  0x24   : > { %p1593_p10 = pnand %p1591_p9, %p1900_p13  ;;  %p1600_p12 = por %p1599_p4, %p1598_p1 }
  0x26   : > { %p1594_p6 = pneg %p1593_p10 }
  0x28   : > { %p1601_p0 = pnand %p1600_p12, %p1594_p6 }
  0x2a   : > { %1604 = shalt.err (!%p1601_p0)
}
  0x2b   : > { %s1786_s5 = smov 64   ;;  %s1787_s7 = smov 4  }
  0x2c   : > { %1433 = dma.hbm_to_vmem [thread:$0]  (!%p1884_p11), %s2242_s1, 2048, %s1877_s29, [#allocation7], %s1786_s5, %s1786_s5, %s1787_s7  }
  0x2d   : > { %s1605_s13 = scalar_lea.hbm %s2243_s2, 16 }
  0x2e   : > { %p1606_p1 = scmp.ne.s32.totalorder %s2243_s2, %s1605_s13  ;;  %p1612_p10 = scmp.lt.u32.totalorder %s1605_s13, %s2243_s2 }
  0x30   : > { %p1608_p4 = pnand %p1606_p1, %p1900_p13 }
  0x32   : > { %p1609_p6 = pneg %p1608_p4 }
  0x34   : > { %p1614_p3 = pnand %p1612_p10, %p1609_p6 }
  0x36   : > { %1617 = shalt.err (!%p1614_p3)
}
  0x37   : > { %s1618_s29 = scalar_lea.vmem %s1888_s6, 16  ;;  %s1625_s5 = scalar_lea.vmem %s1888_s6, 32 }
  0x38   : > { %p1619_p5 = scmp.ne.s32.totalorder %s1888_s6, %s1618_s29  ;;  %p1626_p12 = scmp.lt.s32.totalorder %s1888_s6, %s1888_s6 }
  0x39   : > { %p1627_p0 = scmp.lt.s32.totalorder %s1625_s5, %s1618_s29 }
  0x3a   : > { %p1621_p7 = pnand %p1619_p5, %p1900_p13 }
  0x3b   : > { %p1628_p1 = por %p1627_p0, %p1626_p12 }
  0x3c   : > { %p1622_p9 = pneg %p1621_p7 }
  0x3e   : > { %p1629_p4 = pnand %p1628_p1, %p1622_p9 }
  0x40   : > { %1632 = shalt.err (!%p1629_p4)
}
  0x41   : > { %1436 = dma.hbm_to_vmem [thread:$0]  (!%p1884_p11), %s2243_s2, 16, %s1888_s6, [#allocation7]  }
  0x42   : > { %s1633_s11 = scalar_lea.hbm %s2244_s3, 16 }
  0x43   : > { %p1634_p6 = scmp.ne.s32.totalorder %s2244_s3, %s1633_s11  ;;  %p1640_p5 = scmp.lt.u32.totalorder %s1633_s11, %s2244_s3 }
  0x45   : > { %p1636_p10 = pnand %p1634_p6, %p1900_p13 }
  0x47   : > { %p1637_p3 = pneg %p1636_p10 }
  0x49   : > { %p1642_p7 = pnand %p1640_p5, %p1637_p3 }
  0x4b   : > { %1645 = shalt.err (!%p1642_p7)
}
  0x4c   : > { %s1646_s28 = scalar_lea.vmem %s228_s8, 16  ;;  %s1653_s6 = scalar_lea.vmem %s228_s8, 32 }
  0x4d   : > { %p1647_p9 = scmp.ne.s32.totalorder %s228_s8, %s1646_s28  ;;  %p1654_p1 = scmp.lt.s32.totalorder %s228_s8, %s228_s8 }
  0x4e   : > { %p1655_p4 = scmp.lt.s32.totalorder %s1653_s6, %s1646_s28 }
  0x4f   : > { %p1649_p12 = pnand %p1647_p9, %p1900_p13 }
  0x50   : > { %p1656_p8 = por %p1655_p4, %p1654_p1 }
  0x51   : > { %p1650_p0 = pneg %p1649_p12 }
  0x53   : > { %p1657_p2 = pnand %p1656_p8, %p1650_p0 }
  0x55   : > { %1660 = shalt.err (!%p1657_p2)
}
  0x56   : > { %1439 = dma.hbm_to_vmem [thread:$0]  (!%p1884_p11), %s2244_s3, 16, %s228_s8, [#allocation10]  }
  0x57   : > { %s50_s14 = sadd.s32 1, %s1769_s17  ;;  %s41_s26 = sadd.s32 1, %s1777_s19 }
  0x58   : > { %p57_p2 = scmp.ne.s32.totalorder %s1769_s17, %s1765_s16  ;;  %p43_p8 = scmp.ge.s32.totalorder %s41_s26, 2 }
  0x59   : > { %p58_p13 = scmp.eq.s32.totalorder %s1781_s20, 0  ;;  %p2259_p6 = scmp.ne.s32.totalorder %s2252_s24, 0 }
  0x5a   : > { %p1451_p3 = scmp.lt.s32.totalorder %s1781_s20, 2  ;;  %s2274_s26 = smov (%p43_p8, %s41_s26), 0 }
  0x5b   : > { %p1971_p10 = por %p2259_p6, %p57_p2  ;;  %p59_p5 = por %p58_p13, %p57_p2 }
  0x5c   : > { %s238_s7 = sand.u32 1, %s1769_s17   ;;  %s45_s9 = ssub.s32 %s1777_s19, %s2274_s26 }
  0x5d   : > { %p48_p7 = scmp.eq.s32.totalorder %s45_s9, 0  ;;  %s1218_s8 = sshll.u32 %s238_s7, 8 }
  0x5e   : > { %s1284_s10 = sshll.u32 %s1777_s19, 12  ;;  %s242_s21 = scalar_lea.vmem [#allocation3], %s1218_s8 }
  0x5f   : > { %s1983_s11 = scalar_select %p48_p7, %s1769_s17, %s50_s14  }
  0x60   : > { %s1988_s24 = scalar_lea.hbm %s2241_s0, %s1284_s10  ;;  %s252_s22 = sshll.u32 %s242_s21, 4  ;;  %s1990_s22 = int_to_ptr.vmem [resolvable:$true] %s252_s22 }
  0x61   : > { %p1994_p11 = pnand %p1451_p3, %p59_p5  ;;  %s1998_s6 = scalar_lea.sflag [#allocation4], %s238_s7 }
  0x62   : > { %s1661_s29 = scalar_lea.hbm %s1988_s24, 4096  ;;  %s1666_s9 = scalar_lea.hbm %s2241_s0, 8192 }
  0x63   : > { %p1662_p9 = scmp.ne.s32.totalorder %s1988_s24, %s1661_s29  ;;  %p1663_p12 = pneg %p1994_p11 }
  0x64   : > { %p1667_p4 = scmp.lt.u32.totalorder %s1988_s24, %s2241_s0  ;;  %p1668_p2 = scmp.lt.u32.totalorder %s1666_s9, %s1661_s29 }
  0x65   : > { %p1664_p0 = pnand %p1663_p12, %p1662_p9  ;;  %p1670_p13 = scmp.lt.u32.totalorder %s1661_s29, %s1988_s24 }
  0x66   : > { %p1669_p8 = por %p1668_p2, %p1667_p4 }
  0x67   : > { %p1665_p1 = pneg %p1664_p0 }
  0x68   : > { %p1671_p6 = por %p1670_p13, %p1669_p8 }
  0x6a   : > { %p1672_p3 = pnand %p1671_p6, %p1665_p1 }
  0x6c   : > { %1675 = shalt.err (!%p1672_p3)
}
  0x6d   : > { %s1676_s7 = scalar_lea.vmem %s1990_s22, 4096  ;;  %s1788_s12 = smov [#allocation3]  }
  0x6e   : > { %p1677_p5 = scmp.ne.s32.totalorder %s1990_s22, %s1676_s7  ;;  %s1681_s13 = sshll.u32 %s1788_s12, 4  ;;  %s1682_s13 = int_to_ptr.vmem [resolvable:$false] %s1681_s13 }
  0x6f   : > { %s1683_s21 = scalar_lea.vmem %s1682_s13, 8192  ;;  %p1684_p0 = scmp.lt.s32.totalorder %s1990_s22, %s1682_s13 }
  0x70   : > { %p1679_p7 = pnand %p1677_p5, %p1663_p12  ;;  %p1685_p4 = scmp.lt.s32.totalorder %s1683_s21, %s1676_s7 }
  0x72   : > { %p1680_p9 = pneg %p1679_p7  ;;  %p1686_p2 = por %p1685_p4, %p1684_p0 }
  0x74   : > { %p1687_p8 = pnand %p1686_p2, %p1680_p9 }
  0x76   : > { %1690 = shalt.err (!%p1687_p8)
}
  0x77   : > { %s1789_s29 = smov 128   ;;  %s1790_s5 = smov 8  }
  0x78   : > { %1443 = dma.hbm_to_vmem [thread:$0]  (!%p1994_p11), %s1988_s24, 4096, %s1990_s22, %s1998_s6, %s1789_s29, %s1789_s29, %s1790_s5  }
  0x79   : > { %p2262_p12 = scmp.ne.s32.totalorder %s2256_s27, 0 }
  0x7a   : > { %s2029_s14 = sand.u32 (!%p2262_p12), 1, %s1765_s16   ;;  %p2263_p1 = scmp.ne.s32.totalorder (!%p2262_p12), %s2253_s25, 0 }
  0x7b   : > { %264 = sbr.rel (%p2262_p12) target bundleno = 461 (0x1cd), region = 36  ;;  %s1223_s9 = sshll.u32 (!%p2262_p12), %s2029_s14, 8 }
  0x7c   : > { %s267_s8 = scalar_lea.sflag (!%p2262_p12), [#allocation4], %s2029_s14  ;;  %s2035_s10 = scalar_lea.vmem (!%p2262_p12), [#allocation3], %s1223_s9 }
  0x82   : > { %1744 = dma.done.wait (%p2263_p1), %s267_s8, 4096  }
  0x83   : > { %1746 = vsyncadd (%p2263_p1), %s267_s8, 4294963200  ;;  %p2264_p11 = scmp.ne.s32.totalorder %s2251_s23, 0 }
  0x85   : > { %1748 = dma.done.wait (%p2264_p11), [#allocation7], 2064  }
  0x86   : > { %1750 = vsyncadd (%p2264_p11), [#allocation7], 4294965232 }
  0x87   : > { %1752 = dma.done.wait (%p2264_p11), [#allocation10], 16  }
  0x88   : > { %1754 = vsyncadd (%p2264_p11), [#allocation10], 4294967280  ;;  %v1513_v0 = vld [vmem:[#allocation6 + $0x40] sm:$0xff]   ;;  %v1515_v2 = vld [vmem:[#allocation6 + $0x48] sm:$0xff]   ;;  %s2093_s23 = scalar_lea.vmem [#allocation11], %s1223_s9  ;;  %s1285_s25 = sshll.u32 %s1773_s18, 12 }
  0x89   : > { %v1514_v1 = vld [vmem:[#allocation6] sm:$0xff]   ;;  %1286 = vmatprep.subr.bf16.mxu0 %v1513_v0  ;;  %1398 = vmatprep.subr.bf16.mxu1 %v1513_v0  ;;  %v1516_v3 = vld [vmem:[#allocation6 + $0x8] sm:$0xff]   ;;  %v1517_v4 = vld [vmem:[#allocation6 + $0x50] sm:$0xff]   ;;  %s1085_s27 = sshll.u32 %s2093_s23, 4  ;;  %s2184_s28 = scalar_lea.hbm %s2245_s4, %s1285_s25  ;;  %s2186_s27 = int_to_ptr.vmem [resolvable:$true] %s1085_s27 }
  0x8a   : > { %1287 = vmatpush3.bf16.msra.mxu0 %v1514_v1  ;;  %1406 = vmatpush3.bf16.msra.mxu1 %v1514_v1  ;;  %v1518_v5 = vld [vmem:[#allocation6 + $0x10] sm:$0xff]   ;;  %v1519_v6 = vld [vmem:[#allocation6 + $0x58] sm:$0xff]   ;;  %v1521_v8 = vld [vmem:[#allocation6 + $0x60] sm:$0xff]   ;;  %s1071_s18 = scalar_lea.sflag [#allocation5], %s2029_s14  ;;  %s1691_s6 = scalar_lea.vmem %s2186_s27, 4096 }
  0x8b   : > { %1288 = vmatprep.subr.bf16.mxu0 %v1515_v2  ;;  %1399 = vmatprep.subr.bf16.mxu1 %v1515_v2  ;;  %v1520_v7 = vld [vmem:[#allocation6 + $0x18] sm:$0xff]   ;;  %v1522_v9 = vld [vmem:[#allocation6 + $0x20] sm:$0xff]   ;;  %v1523_v10 = vld [vmem:[#allocation6 + $0x68] sm:$0xff]   ;;  %p1692_p13 = scmp.ne.s32.totalorder %s2186_s27, %s1691_s6  ;;  %s1791_s7 = smov [#allocation11]  }
  0x8c   : > { %v1531_v11 = vld [vmem:[%s2035_s10 + $0x4] ss:$8 sps:$4 sm:$0xff]   ;;  %v1525_v14 = vld [vmem:[#allocation6 + $0x70] sm:$0xff]   ;;  %v1527_v16 = vld [vmem:[#allocation6 + $0x78] sm:$0xff]   ;;  %s1695_s12 = sshll.u32 %s1791_s7, 4  ;;  %s1696_s12 = int_to_ptr.vmem [resolvable:$false] %s1695_s12 }
  0x8d   : > { %v1534_v12 = vld [vmem:[%s2035_s10 + $0x84] ss:$8 sps:$4 sm:$0xff]   ;;  %732 = vmatprep.mubr.bf16.mxu0 %v1531_v11  ;;  %v1526_v15 = vld [vmem:[#allocation6 + $0x30] sm:$0xff]   ;;  %v1528_v17 = vld [vmem:[#allocation6 + $0x38] sm:$0xff]   ;;  %p1693_p6 = pnand %p1692_p13, %p1971_p10  ;;  %s1697_s13 = scalar_lea.vmem %s1696_s12, 8192 }
  0x8e   : > { %1289 = vmatpush3.bf16.msra.mxu0 %v1516_v3  ;;  %1407 = vmatpush3.bf16.msra.mxu1 %v1516_v3  ;;  %v1524_v13 = vld [vmem:[#allocation6 + $0x28] sm:$0xff]   ;;  %v1535_v20 = vld [vmem:[%s2035_s10 + $0x14] ss:$8 sps:$4 sm:$0xff]   ;;  %v1539_v22 = vld [vmem:[%s2035_s10 + $0x10] ss:$8 sps:$4 sm:$0xff]   ;;  %p1698_p5 = scmp.lt.s32.totalorder %s2186_s27, %s1696_s12  ;;  %p1699_p7 = scmp.lt.s32.totalorder %s1697_s13, %s1691_s6 }
  0x8f   : > { %1290 = vmatprep.subr.bf16.mxu0 %v1517_v4  ;;  %1400 = vmatprep.subr.bf16.mxu1 %v1517_v4  ;;  %v1529_v18 = vld [vmem:[%s2035_s10] ss:$8 sps:$4 sm:$0xff]   ;;  %v1537_v21 = vld [vmem:[%s2035_s10 + $0x94] ss:$8 sps:$4 sm:$0xff]   ;;  %v1540_v23 = vld [vmem:[%s2035_s10 + $0x90] ss:$8 sps:$4 sm:$0xff]   ;;  %p1694_p3 = pneg %p1693_p6 }
  0x90   : > { %796 = vmatprep.mubr.bf16.mxu1 %v1534_v12  ;;  %v1532_v19 = vld [vmem:[%s2035_s10 + $0x80] ss:$8 sps:$4 sm:$0xff]   ;;  %v1541_v24 = vld [vmem:[%s2035_s10 + $0x24] ss:$8 sps:$4 sm:$0xff]   ;;  %v1547_v28 = vld [vmem:[%s2035_s10 + $0x34] ss:$8 sps:$4 sm:$0xff]   ;;  %p1700_p9 = por %p1699_p7, %p1698_p5 }
  0x91   : > { %v1543_v25 = vld [vmem:[%s2035_s10 + $0xa4] ss:$8 sps:$4 sm:$0xff]   ;;  %v1545_v26 = vld [vmem:[%s2035_s10 + $0x20] ss:$8 sps:$4 sm:$0xff]   ;;  %v1549_v29 = vld [vmem:[%s2035_s10 + $0xb4] ss:$8 sps:$4 sm:$0xff]  }
  0x92   : > { %1291 = vmatpush3.bf16.msra.mxu0 %v1518_v5  ;;  %1408 = vmatpush3.bf16.msra.mxu1 %v1518_v5  ;;  %v1546_v27 = vld [vmem:[%s2035_s10 + $0xa0] ss:$8 sps:$4 sm:$0xff]   ;;  %v1551_v30 = vld [vmem:[%s2035_s10 + $0x30] ss:$8 sps:$4 sm:$0xff]   ;;  %v1553_v32 = vld [vmem:[%s2035_s10 + $0x44] ss:$8 sps:$4 sm:$0xff]   ;;  %p1701_p0 = pnand %p1700_p9, %p1694_p3 }
  0x93   : > { %1292 = vmatprep.subr.bf16.mxu0 %v1519_v6  ;;  %1401 = vmatprep.subr.bf16.mxu1 %v1519_v6  ;;  %v1552_v31 = vld [vmem:[%s2035_s10 + $0xb0] ss:$8 sps:$4 sm:$0xff]   ;;  %v1555_v33 = vld [vmem:[%s2035_s10 + $0xc4] ss:$8 sps:$4 sm:$0xff]   ;;  %v1557_v34 = vld [vmem:[%s2035_s10 + $0x40] ss:$8 sps:$4 sm:$0xff]  }
  0x94   : > { %v1558_v35 = vld [vmem:[%s2035_s10 + $0xc0] ss:$8 sps:$4 sm:$0xff]   ;;  %v1559_v36 = vld [vmem:[%s2035_s10 + $0x54] ss:$8 sps:$4 sm:$0xff]   ;;  %v1563_v38 = vld [vmem:[%s2035_s10 + $0x50] ss:$8 sps:$4 sm:$0xff]  }
  0x95   : > { %v1561_v37 = vld [vmem:[%s2035_s10 + $0xd4] ss:$8 sps:$4 sm:$0xff]   ;;  %v1564_v39 = vld [vmem:[%s2035_s10 + $0xd0] ss:$8 sps:$4 sm:$0xff]   ;;  %v1565_v40 = vld [vmem:[%s2035_s10 + $0x64] ss:$8 sps:$4 sm:$0xff]  }
  0x96   : > { %1293 = vmatpush3.bf16.msra.mxu0 %v1520_v7  ;;  %1409 = vmatpush3.bf16.msra.mxu1 %v1520_v7  ;;  %v1567_v41 = vld [vmem:[%s2035_s10 + $0xe4] ss:$8 sps:$4 sm:$0xff]   ;;  %v1569_v42 = vld [vmem:[%s2035_s10 + $0x60] ss:$8 sps:$4 sm:$0xff]   ;;  %v1571_v44 = vld [vmem:[%s2035_s10 + $0x74] ss:$8 sps:$4 sm:$0xff]  }
  0x97   : > { %1294 = vmatprep.subr.bf16.mxu0 %v1521_v8  ;;  %1402 = vmatprep.subr.bf16.mxu1 %v1521_v8  ;;  %v1570_v43 = vld [vmem:[%s2035_s10 + $0xe0] ss:$8 sps:$4 sm:$0xff]   ;;  %v1573_v45 = vld [vmem:[%s2035_s10 + $0xf4] ss:$8 sps:$4 sm:$0xff]   ;;  %v1575_v46 = vld [vmem:[%s2035_s10 + $0x70] ss:$8 sps:$4 sm:$0xff]  }
  0x98   : > { %v1576_v47 = vld [vmem:[%s2035_s10 + $0xf0] ss:$8 sps:$4 sm:$0xff]   ;;  %v2081_v51 = vld [vmem:[#allocation8] ss:$0 sm:$0xff]  ;;  %v2083_v57 = vld [vmem:[#allocation9] ss:$0 sm:$0xff] }
  0x9a   : > { %1295 = vmatpush3.bf16.msra.mxu0 %v1522_v9  ;;  %1410 = vmatpush3.bf16.msra.mxu1 %v1522_v9 }
  0x9b   : > { %1296 = vmatprep.subr.bf16.mxu0 %v1523_v10  ;;  %1403 = vmatprep.subr.bf16.mxu1 %v1523_v10 }
  0x9e   : > { %1297 = vmatpush3.bf16.msra.mxu0 %v1524_v13  ;;  %1411 = vmatpush3.bf16.msra.mxu1 %v1524_v13 }
  0x9f   : > { %1298 = vmatprep.subr.bf16.mxu0 %v1525_v14  ;;  %1404 = vmatprep.subr.bf16.mxu1 %v1525_v14 }
  0xa2   : > { %1299 = vmatpush3.bf16.msra.mxu0 %v1526_v15  ;;  %1412 = vmatpush3.bf16.msra.mxu1 %v1526_v15 }
  0xa3   : > { %1300 = vmatprep.subr.bf16.mxu0 %v1527_v16  ;;  %1405 = vmatprep.subr.bf16.mxu1 %v1527_v16 }
  0xa6   : > { %1301 = vmatpush3.bf16.msra.mxu0 %v1528_v17  ;;  %1413 = vmatpush3.bf16.msra.mxu1 %v1528_v17 }
  0xa9   : > { %733 = vmatmul.mubr.bf16.vlgmr.msra.gmra.mrb[0].mxu0 %v1529_v18  ;;  %797 = vmatmul.mubr.bf16.vlgmr.msra.gmra.mrb[0].mxu1 %v1532_v19 }
  0xaa   : > { %740 = vmatprep.mubr.bf16.mxu0 %v1535_v20  ;;  %804 = vmatprep.mubr.bf16.mxu1 %v1537_v21 }
  0xb1   : > { %741 = vmatmul.mubr.bf16.gmra.mrb[4].mxu0 %v1539_v22  ;;  %805 = vmatmul.mubr.bf16.gmra.mrb[4].mxu1 %v1540_v23 }
  0xb2   : > { %748 = vmatprep.mubr.bf16.mxu0 %v1541_v24  ;;  %812 = vmatprep.mubr.bf16.mxu1 %v1543_v25 }
  0xb9   : > { %749 = vmatmul.mubr.bf16.gmra.mrb[8].mxu0 %v1545_v26  ;;  %813 = vmatmul.mubr.bf16.gmra.mrb[8].mxu1 %v1546_v27 }
  0xba   : > { %756 = vmatprep.mubr.bf16.mxu0 %v1547_v28  ;;  %820 = vmatprep.mubr.bf16.mxu1 %v1549_v29 }
  0xc1   : > { %757 = vmatmul.mubr.bf16.gmra.mrb[12].mxu0 %v1551_v30  ;;  %821 = vmatmul.mubr.bf16.gmra.mrb[12].mxu1 %v1552_v31 }
  0xc2   : > { %764 = vmatprep.mubr.bf16.mxu0 %v1553_v32  ;;  %828 = vmatprep.mubr.bf16.mxu1 %v1555_v33 }
  0xc9   : > { %765 = vmatmul.mubr.bf16.gmra.mrb[16].mxu0 %v1557_v34  ;;  %829 = vmatmul.mubr.bf16.gmra.mrb[16].mxu1 %v1558_v35 }
  0xca   : > { %772 = vmatprep.mubr.bf16.mxu0 %v1559_v36  ;;  %836 = vmatprep.mubr.bf16.mxu1 %v1561_v37 }
  0xd1   : > { %773 = vmatmul.mubr.bf16.gmra.mrb[20].mxu0 %v1563_v38  ;;  %837 = vmatmul.mubr.bf16.gmra.mrb[20].mxu1 %v1564_v39 }
  0xd2   : > { %780 = vmatprep.mubr.bf16.mxu0 %v1565_v40  ;;  %844 = vmatprep.mubr.bf16.mxu1 %v1567_v41 }
  0xd9   : > { %781 = vmatmul.mubr.bf16.gmra.mrb[24].mxu0 %v1569_v42  ;;  %845 = vmatmul.mubr.bf16.gmra.mrb[24].mxu1 %v1570_v43 }
  0xda   : > { %788 = vmatprep.mubr.bf16.mxu0 %v1571_v44  ;;  %852 = vmatprep.mubr.bf16.mxu1 %v1573_v45 }
  0xe1   : > { %789 = vmatmul.mubr.bf16.gmra.mrb[28].mxu0 %v1575_v46  ;;  %853 = vmatmul.mubr.bf16.gmra.mrb[28].mxu1 %v1576_v47 }
 0x17c   : > { %v1302_v48 = vpop.f32.mrb[0].mxu0  ;;  %v1350_v49 = vpop.f32.mrb[0].mxu1 }
 0x17d   : > { %v1303_v50 = vpop.f32.mrb[1].mxu0  ;;  %v1351_v52 = vpop.f32.mrb[1].mxu1 }
 0x17e   : > { %v1304_v53 = vadd.f32 %v1303_v50, %v1302_v48  ;;  %v1352_v54 = vadd.f32 %v1351_v52, %v1350_v49  ;;  %v1305_v55 = vpop.f32.mrb[2].mxu0  ;;  %v1353_v56 = vpop.f32.mrb[2].mxu1 }
 0x17f   : > { %v1306_v58 = vpop.f32.mrb[3].mxu0  ;;  %v1354_v59 = vpop.f32.mrb[3].mxu1 }
 0x180   : > { %v967_v60 = vmul.f32 %v1304_v53, %v2081_v51  ;;  %v983_v61 = vmul.f32 %v1352_v54, %v2081_v51  ;;  %v1307_v62 = vadd.f32 %v1306_v58, %v1305_v55  ;;  %v1355_v63 = vadd.f32 %v1354_v59, %v1353_v56 }
 0x182   : > { %v1006_v0 = vadd.f32 %v2083_v57, %v967_v60  ;;  %v1022_v1 = vadd.f32 %v2083_v57, %v983_v61  ;;  %v968_v2 = vmul.f32 %v1307_v62, %v2081_v51  ;;  %v984_v3 = vmul.f32 %v1355_v63, %v2081_v51 }
 0x184   : > { %1038 = vst [vmem:[%s2093_s23] sm:$0xff] %v1006_v0  ;;  %1054 = vst [vmem:[%s2093_s23 + $0x80] sm:$0xff] %v1022_v1  ;;  %v1007_v4 = vadd.f32 %v2083_v57, %v968_v2  ;;  %v1023_v5 = vadd.f32 %v2083_v57, %v984_v3  ;;  %v1308_v6 = vpop.f32.mrb[4].mxu0  ;;  %v1356_v7 = vpop.f32.mrb[4].mxu1 }
 0x185   : > { %v1309_v8 = vpop.f32.mrb[5].mxu0  ;;  %v1357_v9 = vpop.f32.mrb[5].mxu1 }
 0x186   : > { %1039 = vst [vmem:[%s2093_s23 + $0x8] sm:$0xff] %v1007_v4  ;;  %1055 = vst [vmem:[%s2093_s23 + $0x88] sm:$0xff] %v1023_v5  ;;  %v1310_v10 = vadd.f32 %v1309_v8, %v1308_v6  ;;  %v1358_v11 = vadd.f32 %v1357_v9, %v1356_v7  ;;  %v1311_v12 = vpop.f32.mrb[6].mxu0  ;;  %v1359_v13 = vpop.f32.mrb[6].mxu1 }
 0x187   : > { %v1312_v14 = vpop.f32.mrb[7].mxu0  ;;  %v1360_v15 = vpop.f32.mrb[7].mxu1 }
 0x188   : > { %v969_v16 = vmul.f32 %v1310_v10, %v2081_v51  ;;  %v985_v17 = vmul.f32 %v1358_v11, %v2081_v51  ;;  %v1313_v18 = vadd.f32 %v1312_v14, %v1311_v12  ;;  %v1361_v19 = vadd.f32 %v1360_v15, %v1359_v13 }
 0x18a   : > { %v1008_v20 = vadd.f32 %v2083_v57, %v969_v16  ;;  %v1024_v21 = vadd.f32 %v2083_v57, %v985_v17  ;;  %v970_v22 = vmul.f32 %v1313_v18, %v2081_v51  ;;  %v986_v23 = vmul.f32 %v1361_v19, %v2081_v51 }
 0x18c   : > { %1040 = vst [vmem:[%s2093_s23 + $0x10] sm:$0xff] %v1008_v20  ;;  %1056 = vst [vmem:[%s2093_s23 + $0x90] sm:$0xff] %v1024_v21  ;;  %v1009_v24 = vadd.f32 %v2083_v57, %v970_v22  ;;  %v1025_v25 = vadd.f32 %v2083_v57, %v986_v23  ;;  %v1314_v26 = vpop.f32.mrb[8].mxu0  ;;  %v1362_v27 = vpop.f32.mrb[8].mxu1 }
 0x18d   : > { %v1315_v28 = vpop.f32.mrb[9].mxu0  ;;  %v1363_v29 = vpop.f32.mrb[9].mxu1 }
 0x18e   : > { %1041 = vst [vmem:[%s2093_s23 + $0x18] sm:$0xff] %v1009_v24  ;;  %1057 = vst [vmem:[%s2093_s23 + $0x98] sm:$0xff] %v1025_v25  ;;  %v1316_v30 = vadd.f32 %v1315_v28, %v1314_v26  ;;  %v1364_v31 = vadd.f32 %v1363_v29, %v1362_v27  ;;  %v1317_v32 = vpop.f32.mrb[10].mxu0  ;;  %v1365_v33 = vpop.f32.mrb[10].mxu1 }
 0x18f   : > { %v1318_v34 = vpop.f32.mrb[11].mxu0  ;;  %v1366_v35 = vpop.f32.mrb[11].mxu1 }
 0x190   : > { %v971_v36 = vmul.f32 %v1316_v30, %v2081_v51  ;;  %v987_v37 = vmul.f32 %v1364_v31, %v2081_v51  ;;  %v1319_v38 = vadd.f32 %v1318_v34, %v1317_v32  ;;  %v1367_v39 = vadd.f32 %v1366_v35, %v1365_v33 }
 0x192   : > { %v1010_v40 = vadd.f32 %v2083_v57, %v971_v36  ;;  %v1026_v41 = vadd.f32 %v2083_v57, %v987_v37  ;;  %v972_v42 = vmul.f32 %v1319_v38, %v2081_v51  ;;  %v988_v43 = vmul.f32 %v1367_v39, %v2081_v51 }
 0x194   : > { %1042 = vst [vmem:[%s2093_s23 + $0x20] sm:$0xff] %v1010_v40  ;;  %1058 = vst [vmem:[%s2093_s23 + $0xa0] sm:$0xff] %v1026_v41  ;;  %v1011_v44 = vadd.f32 %v2083_v57, %v972_v42  ;;  %v1027_v45 = vadd.f32 %v2083_v57, %v988_v43  ;;  %v1320_v46 = vpop.f32.mrb[12].mxu0  ;;  %v1368_v47 = vpop.f32.mrb[12].mxu1 }
 0x195   : > { %v1321_v48 = vpop.f32.mrb[13].mxu0  ;;  %v1369_v49 = vpop.f32.mrb[13].mxu1 }
 0x196   : > { %1043 = vst [vmem:[%s2093_s23 + $0x28] sm:$0xff] %v1011_v44  ;;  %1059 = vst [vmem:[%s2093_s23 + $0xa8] sm:$0xff] %v1027_v45  ;;  %v1322_v50 = vadd.f32 %v1321_v48, %v1320_v46  ;;  %v1370_v52 = vadd.f32 %v1369_v49, %v1368_v47  ;;  %v1323_v53 = vpop.f32.mrb[14].mxu0  ;;  %v1371_v54 = vpop.f32.mrb[14].mxu1 }
 0x197   : > { %v1324_v55 = vpop.f32.mrb[15].mxu0  ;;  %v1372_v56 = vpop.f32.mrb[15].mxu1 }
 0x198   : > { %v973_v58 = vmul.f32 %v1322_v50, %v2081_v51  ;;  %v989_v59 = vmul.f32 %v1370_v52, %v2081_v51  ;;  %v1325_v60 = vadd.f32 %v1324_v55, %v1323_v53  ;;  %v1373_v61 = vadd.f32 %v1372_v56, %v1371_v54 }
 0x19a   : > { %v1012_v62 = vadd.f32 %v2083_v57, %v973_v58  ;;  %v1028_v63 = vadd.f32 %v2083_v57, %v989_v59  ;;  %v974_v0 = vmul.f32 %v1325_v60, %v2081_v51  ;;  %v990_v1 = vmul.f32 %v1373_v61, %v2081_v51 }
 0x19c   : > { %1044 = vst [vmem:[%s2093_s23 + $0x30] sm:$0xff] %v1012_v62  ;;  %1060 = vst [vmem:[%s2093_s23 + $0xb0] sm:$0xff] %v1028_v63  ;;  %v1013_v2 = vadd.f32 %v2083_v57, %v974_v0  ;;  %v1029_v3 = vadd.f32 %v2083_v57, %v990_v1  ;;  %v1326_v4 = vpop.f32.mrb[16].mxu0  ;;  %v1374_v5 = vpop.f32.mrb[16].mxu1 }
 0x19d   : > { %v1327_v6 = vpop.f32.mrb[17].mxu0  ;;  %v1375_v7 = vpop.f32.mrb[17].mxu1 }
 0x19e   : > { %1045 = vst [vmem:[%s2093_s23 + $0x38] sm:$0xff] %v1013_v2  ;;  %1061 = vst [vmem:[%s2093_s23 + $0xb8] sm:$0xff] %v1029_v3  ;;  %v1328_v8 = vadd.f32 %v1327_v6, %v1326_v4  ;;  %v1376_v9 = vadd.f32 %v1375_v7, %v1374_v5  ;;  %v1329_v10 = vpop.f32.mrb[18].mxu0  ;;  %v1377_v11 = vpop.f32.mrb[18].mxu1 }
 0x19f   : > { %v1330_v12 = vpop.f32.mrb[19].mxu0  ;;  %v1378_v13 = vpop.f32.mrb[19].mxu1 }
 0x1a0   : > { %v975_v14 = vmul.f32 %v1328_v8, %v2081_v51  ;;  %v991_v15 = vmul.f32 %v1376_v9, %v2081_v51  ;;  %v1331_v16 = vadd.f32 %v1330_v12, %v1329_v10  ;;  %v1379_v17 = vadd.f32 %v1378_v13, %v1377_v11 }
 0x1a2   : > { %v1014_v18 = vadd.f32 %v2083_v57, %v975_v14  ;;  %v1030_v19 = vadd.f32 %v2083_v57, %v991_v15  ;;  %v976_v20 = vmul.f32 %v1331_v16, %v2081_v51  ;;  %v992_v21 = vmul.f32 %v1379_v17, %v2081_v51 }
 0x1a4   : > { %1046 = vst [vmem:[%s2093_s23 + $0x40] sm:$0xff] %v1014_v18  ;;  %1062 = vst [vmem:[%s2093_s23 + $0xc0] sm:$0xff] %v1030_v19  ;;  %v1015_v22 = vadd.f32 %v2083_v57, %v976_v20  ;;  %v1031_v23 = vadd.f32 %v2083_v57, %v992_v21  ;;  %v1332_v24 = vpop.f32.mrb[20].mxu0  ;;  %v1380_v25 = vpop.f32.mrb[20].mxu1 }
 0x1a5   : > { %v1333_v26 = vpop.f32.mrb[21].mxu0  ;;  %v1381_v27 = vpop.f32.mrb[21].mxu1 }
 0x1a6   : > { %1047 = vst [vmem:[%s2093_s23 + $0x48] sm:$0xff] %v1015_v22  ;;  %1063 = vst [vmem:[%s2093_s23 + $0xc8] sm:$0xff] %v1031_v23  ;;  %v1334_v28 = vadd.f32 %v1333_v26, %v1332_v24  ;;  %v1382_v29 = vadd.f32 %v1381_v27, %v1380_v25  ;;  %v1335_v30 = vpop.f32.mrb[22].mxu0  ;;  %v1383_v31 = vpop.f32.mrb[22].mxu1 }
 0x1a7   : > { %v1336_v32 = vpop.f32.mrb[23].mxu0  ;;  %v1384_v33 = vpop.f32.mrb[23].mxu1 }
 0x1a8   : > { %v977_v34 = vmul.f32 %v1334_v28, %v2081_v51  ;;  %v993_v35 = vmul.f32 %v1382_v29, %v2081_v51  ;;  %v1337_v36 = vadd.f32 %v1336_v32, %v1335_v30  ;;  %v1385_v37 = vadd.f32 %v1384_v33, %v1383_v31 }
 0x1aa   : > { %v1016_v38 = vadd.f32 %v2083_v57, %v977_v34  ;;  %v1032_v39 = vadd.f32 %v2083_v57, %v993_v35  ;;  %v978_v40 = vmul.f32 %v1337_v36, %v2081_v51  ;;  %v994_v41 = vmul.f32 %v1385_v37, %v2081_v51 }
 0x1ac   : > { %1048 = vst [vmem:[%s2093_s23 + $0x50] sm:$0xff] %v1016_v38  ;;  %1064 = vst [vmem:[%s2093_s23 + $0xd0] sm:$0xff] %v1032_v39  ;;  %v1017_v42 = vadd.f32 %v2083_v57, %v978_v40  ;;  %v1033_v43 = vadd.f32 %v2083_v57, %v994_v41  ;;  %v1338_v44 = vpop.f32.mrb[24].mxu0  ;;  %v1386_v45 = vpop.f32.mrb[24].mxu1 }
 0x1ad   : > { %v1339_v46 = vpop.f32.mrb[25].mxu0  ;;  %v1387_v47 = vpop.f32.mrb[25].mxu1 }
 0x1ae   : > { %1049 = vst [vmem:[%s2093_s23 + $0x58] sm:$0xff] %v1017_v42  ;;  %1065 = vst [vmem:[%s2093_s23 + $0xd8] sm:$0xff] %v1033_v43  ;;  %v1340_v48 = vadd.f32 %v1339_v46, %v1338_v44  ;;  %v1388_v49 = vadd.f32 %v1387_v47, %v1386_v45  ;;  %v1341_v50 = vpop.f32.mrb[26].mxu0  ;;  %v1389_v52 = vpop.f32.mrb[26].mxu1 }
 0x1af   : > { %v1342_v53 = vpop.f32.mrb[27].mxu0  ;;  %v1390_v54 = vpop.f32.mrb[27].mxu1 }
 0x1b0   : > { %v979_v55 = vmul.f32 %v1340_v48, %v2081_v51  ;;  %v995_v56 = vmul.f32 %v1388_v49, %v2081_v51  ;;  %v1343_v58 = vadd.f32 %v1342_v53, %v1341_v50  ;;  %v1391_v59 = vadd.f32 %v1390_v54, %v1389_v52 }
 0x1b2   : > { %v1018_v60 = vadd.f32 %v2083_v57, %v979_v55  ;;  %v1034_v61 = vadd.f32 %v2083_v57, %v995_v56  ;;  %v980_v62 = vmul.f32 %v1343_v58, %v2081_v51  ;;  %v996_v63 = vmul.f32 %v1391_v59, %v2081_v51 }
 0x1b4   : > { %1050 = vst [vmem:[%s2093_s23 + $0x60] sm:$0xff] %v1018_v60  ;;  %1066 = vst [vmem:[%s2093_s23 + $0xe0] sm:$0xff] %v1034_v61  ;;  %v1019_v0 = vadd.f32 %v2083_v57, %v980_v62  ;;  %v1035_v1 = vadd.f32 %v2083_v57, %v996_v63  ;;  %v1344_v2 = vpop.f32.mrb[28].mxu0  ;;  %v1392_v3 = vpop.f32.mrb[28].mxu1 }
 0x1b5   : > { %v1345_v4 = vpop.f32.mrb[29].mxu0  ;;  %v1393_v5 = vpop.f32.mrb[29].mxu1 }
 0x1b6   : > { %1051 = vst [vmem:[%s2093_s23 + $0x68] sm:$0xff] %v1019_v0  ;;  %1067 = vst [vmem:[%s2093_s23 + $0xe8] sm:$0xff] %v1035_v1  ;;  %v1346_v6 = vadd.f32 %v1345_v4, %v1344_v2  ;;  %v1394_v7 = vadd.f32 %v1393_v5, %v1392_v3  ;;  %v1347_v8 = vpop.f32.mrb[30].mxu0  ;;  %v1395_v9 = vpop.f32.mrb[30].mxu1 }
 0x1b7   : > { %v1348_v10 = vpop.f32.mrb[31].mxu0  ;;  %v1396_v11 = vpop.f32.mrb[31].mxu1 }
 0x1b8   : > { %v981_v12 = vmul.f32 %v1346_v6, %v2081_v51  ;;  %v997_v13 = vmul.f32 %v1394_v7, %v2081_v51  ;;  %v1349_v14 = vadd.f32 %v1348_v10, %v1347_v8  ;;  %v1397_v15 = vadd.f32 %v1396_v11, %v1395_v9 }
 0x1ba   : > { %v1020_v16 = vadd.f32 %v2083_v57, %v981_v12  ;;  %v1036_v17 = vadd.f32 %v2083_v57, %v997_v13  ;;  %v982_v18 = vmul.f32 %v1349_v14, %v2081_v51  ;;  %v998_v19 = vmul.f32 %v1397_v15, %v2081_v51 }
 0x1bc   : > { %1052 = vst [vmem:[%s2093_s23 + $0x70] sm:$0xff] %v1020_v16  ;;  %1068 = vst [vmem:[%s2093_s23 + $0xf0] sm:$0xff] %v1036_v17  ;;  %v1021_v20 = vadd.f32 %v2083_v57, %v982_v18  ;;  %v1037_v21 = vadd.f32 %v2083_v57, %v998_v19 }
 0x1be   : > { %1053 = vst [vmem:[%s2093_s23 + $0x78] sm:$0xff] %v1021_v20  ;;  %1069 = vst [vmem:[%s2093_s23 + $0xf8] sm:$0xff] %v1037_v21 }
 0x1bf   : > { %1704 = shalt.err (!%p1701_p0)
}
 0x1c0   : > { %s1705_s21 = scalar_lea.hbm %s2184_s28, 4096  ;;  %s1709_s9 = scalar_lea.hbm %s2245_s4, 8192 }
 0x1c1   : > { %p1706_p4 = scmp.ne.s32.totalorder %s2184_s28, %s1705_s21  ;;  %p1710_p12 = scmp.lt.u32.totalorder %s2184_s28, %s2245_s4 }
 0x1c2   : > { %p1711_p1 = scmp.lt.u32.totalorder %s1709_s9, %s1705_s21  ;;  %p1713_p13 = scmp.lt.u32.totalorder %s1705_s21, %s2184_s28 }
 0x1c3   : > { %p1707_p2 = pnand %p1706_p4, %p1971_p10 }
 0x1c4   : > { %p1712_p11 = por %p1711_p1, %p1710_p12 }
 0x1c5   : > { %p1708_p8 = pneg %p1707_p2 }
 0x1c6   : > { %p1714_p6 = por %p1713_p13, %p1712_p11 }
 0x1c8   : > { %p1715_p3 = pnand %p1714_p6, %p1708_p8 }
 0x1ca   : > { %1718 = shalt.err (!%p1715_p3)
}
 0x1cb   : > { %s1792_s23 = smov 128   ;;  %s1793_s25 = smov 8  }
 0x1cc   : > { %1428 = dma.vmem_to_hbm [thread:$0]  (%p1971_p10), %s2186_s27, 4096, %s2184_s28, %s1071_s18, %s1792_s23, %s1792_s23, %s1793_s25  }
 0x1cd PF: > { %s2265_s24 = sld [smem:[#allocation16_spill]]  ;;  %s1100_s22 = sand.u32 1, %s1761_s15  }
 0x1ce   : > { %p2267_p7 = scmp.ge.s32.totalorder %s1781_s20, 2  ;;  %s1101_s6 = scalar_lea.sflag [#allocation5], %s1100_s22 }
 0x1d3   : > { %p2266_p5 = scmp.ne.s32.totalorder %s2265_s24, 0 }
 0x1d5   : > { %p1445_p9 = pnand %p2267_p7, %p2266_p5 }
 0x1d7   : > { %1756 = dma.done.wait (!%p1445_p9), %s1101_s6, 4096  }
 0x1d8   : > { %1758 = vsyncadd (!%p1445_p9), %s1101_s6, 4294963200  ;;  %s22_s20 = sadd.s32 1, %s1781_s20   ;;  %s2268_s15 = smov %s1765_s16 }
 0x1d9   : > { %p19_p0 = scmp.ge.s32.totalorder %s22_s20, 4   ;;  %s2269_s16 = smov %s1769_s17 }
 0x1da   : > { %s2270_s17 = smov %s1983_s11  ;;  %s2271_s18 = smov %s1777_s19 }
 0x1db   : > { %s2272_s19 = smov %s2274_s26  ;;  %21 = sbr.rel (!%p19_p0) target bundleno = 8 (0x8), region = 104 }
 0x1e2   :  { %1106 = vsyncpa [#allocation4], 1 }
 0x1e3   :  { %1108 = vsyncpa [#allocation4 + $0x1], 1 }
 0x1e4   :  { %1109 = vsyncpa [#allocation7], 1 }
 0x1e5   :  { %1110 = vsyncpa [#allocation10], 1 }
 0x1e6   :  { %1111 = vsyncpa [#allocation5], 1 }
 0x1e7   :  { %1113 = vsyncpa [#allocation5 + $0x1], 1 }

// kernel: espcn_forward.8
= control target key start
LH: loop header
LB: loop body
LE: loop exit
PB: predicated region body
PF: predicated region fallthrough
CT: control target
= control target key end

     0   :  { %9 = vsyncpa [#allocation4], 0  ;;  %s2018_s0 = inlined_call_operand.hbm [shape: bf16[512,128], index: 0, kind: input, shape index: {}]   ;;  %s2019_s1 = inlined_call_operand.hbm [shape: bf16[128,128], index: 1, kind: input, shape index: {}]   ;;  %s2020_s2 = inlined_call_operand.hbm [shape: f32[1,128], index: 2, kind: input, shape index: {}]   ;;  %s2021_s3 = inlined_call_operand.hbm [shape: f32[1,128], index: 3, kind: input, shape index: {}]   ;;  %s2022_s4 = inlined_call_operand.hbm [shape: f32[512,128], index: 4, kind: output, shape index: {}]  }
   0x1   :  { %11 = vsyncpa [#allocation4 + $0x1], 0 }
   0x2   :  { %12 = vsyncpa [#allocation7], 0 }
   0x3   :  { %13 = vsyncpa [#allocation10], 0 }
   0x4   :  { %14 = vsyncpa [#allocation5], 0 }
   0x5   :  { %16 = vsyncpa [#allocation5 + $0x1], 0  ;;  %s1609_s15 = smov 0   ;;  %s1611_s16 = smov 0  }
   0x6   :  { %s1613_s17 = smov 0   ;;  %s1615_s18 = smov 0  }
   0x7   :  { %s1617_s19 = smov 0   ;;  %s1619_s20 = smov 0  }
   0x8 LB: > { %s1111_s21 = sadd.s32 4294967295, %s1573_s20   ;;  %s1112_s22 = sadd.s32 4294967294, %s1573_s20   ;;  %s1573_s20 = sphi %s1619_s20, %s22_s20   ;;  %s1569_s19 = sphi %s1617_s19, %s2049_s19   ;;  %s1565_s18 = sphi %s1615_s18, %s2048_s18   ;;  %s1561_s17 = sphi %s1613_s17, %s2047_s17   ;;  %s1557_s16 = sphi %s1611_s16, %s2046_s16   ;;  %s1553_s15 = sphi %s1609_s15, %s2045_s15  }
   0x9   : > { %p63_p0 = scmp.ne.s32.totalorder %s1557_s16, %s1553_s15  ;;  %p1643_p1 = scmp.eq.s32.totalorder %s1111_s21, 0 }
   0xa   : > { %p1647_p2 = scmp.eq.s32.totalorder %s1111_s21, 1  ;;  %p175_p3 = scmp.eq.s32.totalorder %s1112_s22, 1 }
   0xb   : > { %s2028_s23 = scalar_select %p1643_p1, 1, 0 }
   0xc   : > { %s2029_s24 = scalar_select %p1647_p2, 1, 0 }
   0xd   : > { %p1653_p4 = por %p1643_p1, %p63_p0  ;;  %p1113_p5 = scmp.ge.s32.totalorder %s1573_s20, 1 }
   0xe   : > { %p1658_p6 = por %p175_p3, %p63_p0  ;;  %p182_p7 = scmp.lt.s32.totalorder %s1573_s20, 3 }
   0xf   : > { %s2030_s25 = scalar_select %p1653_p4, 1, 0 }
  0x10   : > { %s2031_s26 = scalar_select %p1658_p6, 1, 0 }
  0x11   : > { %p1663_p8 = pnand %p1113_p5, %p182_p7  ;;  %s1575_s28 = smov [#allocation6]  }
  0x12   : > { %2032 = sst [smem:[#allocation16_spill]] %s2031_s26  ;;  %s198_s29 = sshll.u32 %s1575_s28, 4  ;;  %s1667_s29 = int_to_ptr.vmem [resolvable:$true] %s198_s29 }
  0x13   : > { %s2033_s27 = scalar_select %p1663_p8, 1, 0 }
  0x14   : > { %p1264_p9 = pneg %p1663_p8  ;;  %s1576_s5 = smov [#allocation8]  }
  0x15   : > { %s214_s6 = sshll.u32 %s1576_s5, 4  ;;  %s1577_s7 = smov [#allocation9]   ;;  %s1678_s6 = int_to_ptr.vmem [resolvable:$true] %s214_s6 }
  0x16   : > { %p1674_p11 = pnand %p1264_p9, %p1643_p1  ;;  %s1680_s8 = sshll.u32 %s1577_s7, 4  ;;  %s228_s8 = int_to_ptr.vmem [resolvable:$true] %s1680_s8 }
  0x17   : > { %s1369_s11 = scalar_lea.hbm %s2019_s1, 1024 }
  0x18   : > { %p1370_p12 = scmp.ne.s32.totalorder %s2019_s1, %s1369_s11  ;;  %p1690_p13 = pneg %p1674_p11 }
  0x19   : > { %p1376_p5 = scmp.lt.u32.totalorder %s1369_s11, %s2019_s1 }
  0x1a   : > { %p1372_p0 = pnand %p1690_p13, %p1370_p12 }
  0x1c   : > { %p1373_p3 = pneg %p1372_p0 }
  0x1e   : > { %p1378_p7 = pnand %p1376_p5, %p1373_p3 }
  0x20   : > { %1381 = shalt.err (!%p1378_p7)
}
  0x21   : > { %s1382_s28 = scalar_lea.vmem %s1667_s29, 1024  ;;  %p1390_p1 = scmp.lt.s32.totalorder %s1667_s29, %s1667_s29 }
  0x22   : > { %p1383_p9 = scmp.ne.s32.totalorder %s1667_s29, %s1382_s28  ;;  %p1391_p4 = scmp.lt.s32.totalorder %s1382_s28, %s1382_s28 }
  0x24   : > { %p1385_p10 = pnand %p1383_p9, %p1690_p13  ;;  %p1392_p12 = por %p1391_p4, %p1390_p1 }
  0x26   : > { %p1386_p6 = pneg %p1385_p10 }
  0x28   : > { %p1393_p0 = pnand %p1392_p12, %p1386_p6 }
  0x2a   : > { %1396 = shalt.err (!%p1393_p0)
}
  0x2b   : > { %s1578_s5 = smov 64   ;;  %s1579_s7 = smov 4  }
  0x2c   : > { %1267 = dma.hbm_to_vmem [thread:$0]  (!%p1674_p11), %s2019_s1, 1024, %s1667_s29, [#allocation7], %s1578_s5, %s1578_s5, %s1579_s7  }
  0x2d   : > { %s1397_s13 = scalar_lea.hbm %s2020_s2, 16 }
  0x2e   : > { %p1398_p1 = scmp.ne.s32.totalorder %s2020_s2, %s1397_s13  ;;  %p1404_p10 = scmp.lt.u32.totalorder %s1397_s13, %s2020_s2 }
  0x30   : > { %p1400_p4 = pnand %p1398_p1, %p1690_p13 }
  0x32   : > { %p1401_p6 = pneg %p1400_p4 }
  0x34   : > { %p1406_p3 = pnand %p1404_p10, %p1401_p6 }
  0x36   : > { %1409 = shalt.err (!%p1406_p3)
}
  0x37   : > { %s1410_s29 = scalar_lea.vmem %s1678_s6, 16  ;;  %s1417_s9 = scalar_lea.vmem %s1678_s6, 32 }
  0x38   : > { %p1411_p5 = scmp.ne.s32.totalorder %s1678_s6, %s1410_s29  ;;  %p1418_p12 = scmp.lt.s32.totalorder %s1678_s6, %s1678_s6 }
  0x39   : > { %p1419_p0 = scmp.lt.s32.totalorder %s1417_s9, %s1410_s29 }
  0x3a   : > { %p1413_p7 = pnand %p1411_p5, %p1690_p13 }
  0x3b   : > { %p1420_p1 = por %p1419_p0, %p1418_p12 }
  0x3c   : > { %p1414_p9 = pneg %p1413_p7 }
  0x3e   : > { %p1421_p4 = pnand %p1420_p1, %p1414_p9 }
  0x40   : > { %1424 = shalt.err (!%p1421_p4)
}
  0x41   : > { %1270 = dma.hbm_to_vmem [thread:$0]  (!%p1674_p11), %s2020_s2, 16, %s1678_s6, [#allocation7]  }
  0x42   : > { %s1425_s13 = scalar_lea.hbm %s2021_s3, 16 }
  0x43   : > { %p1426_p6 = scmp.ne.s32.totalorder %s2021_s3, %s1425_s13  ;;  %p1432_p5 = scmp.lt.u32.totalorder %s1425_s13, %s2021_s3 }
  0x45   : > { %p1428_p10 = pnand %p1426_p6, %p1690_p13 }
  0x47   : > { %p1429_p3 = pneg %p1428_p10 }
  0x49   : > { %p1434_p7 = pnand %p1432_p5, %p1429_p3 }
  0x4b   : > { %1437 = shalt.err (!%p1434_p7)
}
  0x4c   : > { %s1438_s9 = scalar_lea.vmem %s228_s8, 16  ;;  %s1445_s6 = scalar_lea.vmem %s228_s8, 32 }
  0x4d   : > { %p1439_p9 = scmp.ne.s32.totalorder %s228_s8, %s1438_s9  ;;  %p1446_p1 = scmp.lt.s32.totalorder %s228_s8, %s228_s8 }
  0x4e   : > { %p1447_p4 = scmp.lt.s32.totalorder %s1445_s6, %s1438_s9 }
  0x4f   : > { %p1441_p12 = pnand %p1439_p9, %p1690_p13 }
  0x50   : > { %p1448_p8 = por %p1447_p4, %p1446_p1 }
  0x51   : > { %p1442_p0 = pneg %p1441_p12 }
  0x53   : > { %p1449_p2 = pnand %p1448_p8, %p1442_p0 }
  0x55   : > { %1452 = shalt.err (!%p1449_p2)
}
  0x56   : > { %1273 = dma.hbm_to_vmem [thread:$0]  (!%p1674_p11), %s2021_s3, 16, %s228_s8, [#allocation10]  }
  0x57   : > { %s50_s14 = sadd.s32 1, %s1561_s17  ;;  %s41_s11 = sadd.s32 1, %s1569_s19 }
  0x58   : > { %p57_p2 = scmp.ne.s32.totalorder %s1561_s17, %s1557_s16  ;;  %p43_p8 = scmp.ge.s32.totalorder %s41_s11, 2 }
  0x59   : > { %p58_p13 = scmp.eq.s32.totalorder %s1573_s20, 0  ;;  %p2036_p6 = scmp.ne.s32.totalorder %s2029_s24, 0 }
  0x5a   : > { %p1285_p3 = scmp.lt.s32.totalorder %s1573_s20, 2  ;;  %s2051_s11 = smov (%p43_p8, %s41_s11), 0 }
  0x5b   : > { %p1764_p10 = por %p2036_p6, %p57_p2  ;;  %p59_p5 = por %p58_p13, %p57_p2 }
  0x5c   : > { %s238_s12 = sand.u32 1, %s1561_s17   ;;  %s45_s13 = ssub.s32 %s1569_s19, %s2051_s11 }
  0x5d   : > { %p48_p7 = scmp.eq.s32.totalorder %s45_s13, 0  ;;  %s1118_s8 = sshll.u32 %s238_s12, 7 }
  0x5e   : > { %s1158_s21 = sshll.u32 %s1569_s19, 11  ;;  %s242_s9 = scalar_lea.vmem [#allocation3], %s1118_s8 }
  0x5f   : > { %s1776_s22 = scalar_select %p48_p7, %s1561_s17, %s50_s14  }
  0x60   : > { %s1781_s24 = scalar_lea.hbm %s2018_s0, %s1158_s21  ;;  %s250_s6 = sshll.u32 %s242_s9, 4  ;;  %s1783_s6 = int_to_ptr.vmem [resolvable:$true] %s250_s6 }
  0x61   : > { %p1787_p11 = pnand %p1285_p3, %p59_p5  ;;  %s1791_s10 = scalar_lea.sflag [#allocation4], %s238_s12 }
  0x62   : > { %s1453_s14 = scalar_lea.hbm %s1781_s24, 2048  ;;  %s1458_s21 = scalar_lea.hbm %s2018_s0, 4096 }
  0x63   : > { %p1454_p9 = scmp.ne.s32.totalorder %s1781_s24, %s1453_s14  ;;  %p1455_p12 = pneg %p1787_p11 }
  0x64   : > { %p1459_p4 = scmp.lt.u32.totalorder %s1781_s24, %s2018_s0  ;;  %p1460_p2 = scmp.lt.u32.totalorder %s1458_s21, %s1453_s14 }
  0x65   : > { %p1456_p0 = pnand %p1455_p12, %p1454_p9  ;;  %p1462_p13 = scmp.lt.u32.totalorder %s1453_s14, %s1781_s24 }
  0x66   : > { %p1461_p8 = por %p1460_p2, %p1459_p4 }
  0x67   : > { %p1457_p1 = pneg %p1456_p0 }
  0x68   : > { %p1463_p6 = por %p1462_p13, %p1461_p8 }
  0x6a   : > { %p1464_p3 = pnand %p1463_p6, %p1457_p1 }
  0x6c   : > { %1467 = shalt.err (!%p1464_p3)
}
  0x6d   : > { %s1468_s12 = scalar_lea.vmem %s1783_s6, 2048  ;;  %s1580_s9 = smov [#allocation3]  }
  0x6e   : > { %p1469_p5 = scmp.ne.s32.totalorder %s1783_s6, %s1468_s12  ;;  %s1473_s13 = sshll.u32 %s1580_s9, 4  ;;  %s1474_s13 = int_to_ptr.vmem [resolvable:$false] %s1473_s13 }
  0x6f   : > { %s1475_s8 = scalar_lea.vmem %s1474_s13, 4096  ;;  %p1476_p0 = scmp.lt.s32.totalorder %s1783_s6, %s1474_s13 }
  0x70   : > { %p1471_p7 = pnand %p1469_p5, %p1455_p12  ;;  %p1477_p4 = scmp.lt.s32.totalorder %s1475_s8, %s1468_s12 }
  0x72   : > { %p1472_p9 = pneg %p1471_p7  ;;  %p1478_p2 = por %p1477_p4, %p1476_p0 }
  0x74   : > { %p1479_p8 = pnand %p1478_p2, %p1472_p9 }
  0x76   : > { %1482 = shalt.err (!%p1479_p8)
}
  0x77   : > { %1277 = dma.hbm_to_vmem [thread:$0]  (!%p1787_p11), %s1781_s24, 2048, %s1783_s6, %s1791_s10, %s1578_s5, %s1578_s5, %s1579_s7  }
  0x78   : > { %p2039_p12 = scmp.ne.s32.totalorder %s2033_s27, 0 }
  0x79   : > { %s1825_s14 = sand.u32 (!%p2039_p12), 1, %s1557_s16   ;;  %p2040_p1 = scmp.ne.s32.totalorder (!%p2039_p12), %s2030_s25, 0 }
  0x7a   : > { %262 = sbr.rel (%p2039_p12) target bundleno = 428 (0x1ac), region = 36  ;;  %s1122_s21 = sshll.u32 (!%p2039_p12), %s1825_s14, 7 }
  0x7b   : > { %s265_s28 = scalar_lea.sflag (!%p2039_p12), [#allocation4], %s1825_s14  ;;  %s1829_s29 = scalar_lea.vmem (!%p2039_p12), [#allocation3], %s1122_s21 }
  0x81   : > { %1536 = dma.done.wait (%p2040_p1), %s265_s28, 2048  }
  0x82   : > { %1538 = vsyncadd (%p2040_p1), %s265_s28, 4294965248  ;;  %p2041_p11 = scmp.ne.s32.totalorder %s2028_s23, 0 }
  0x84   : > { %1540 = dma.done.wait (%p2041_p11), [#allocation7], 1040  }
  0x85   : > { %1542 = vsyncadd (%p2041_p11), [#allocation7], 4294966256 }
  0x86   : > { %1544 = dma.done.wait (%p2041_p11), [#allocation10], 16  }
  0x87   : > { %1546 = vsyncadd (%p2041_p11), [#allocation10], 4294967280  ;;  %v1345_v0 = vld [vmem:[#allocation6] sm:$0xff]   ;;  %v1346_v1 = vld [vmem:[#allocation6 + $0x8] sm:$0xff]   ;;  %s1126_s23 = sshll.u32 %s1825_s14, 8  ;;  %s1159_s27 = sshll.u32 %s1565_s18, 12 }
  0x88   : > { %1184 = vmatprep.subr.bf16.mxu0 %v1345_v0  ;;  %1232 = vmatprep.subr.bf16.mxu1 %v1345_v0  ;;  %v1347_v2 = vld [vmem:[#allocation6 + $0x10] sm:$0xff]   ;;  %v1348_v3 = vld [vmem:[#allocation6 + $0x18] sm:$0xff]   ;;  %v1353_v4 = vld [vmem:[%s1829_s29] sm:$0xff]   ;;  %s1880_s25 = scalar_lea.vmem [#allocation11], %s1126_s23  ;;  %s1961_s24 = scalar_lea.hbm %s2022_s4, %s1159_s27 }
  0x89   : > { %1185 = vmatpush3.bf16.msra.mxu0 %v1345_v0  ;;  %1240 = vmatpush3.bf16.msra.mxu1 %v1345_v0  ;;  %v1354_v5 = vld [vmem:[%s1829_s29 + $0x40] sm:$0xff]   ;;  %v1350_v7 = vld [vmem:[#allocation6 + $0x28] sm:$0xff]   ;;  %v1351_v8 = vld [vmem:[#allocation6 + $0x30] sm:$0xff]   ;;  %s986_s5 = sshll.u32 %s1880_s25, 4  ;;  %s972_s6 = scalar_lea.sflag [#allocation5], %s1825_s14  ;;  %s1963_s5 = int_to_ptr.vmem [resolvable:$true] %s986_s5 }
  0x8a   : > { %1186 = vmatprep.subr.bf16.mxu0 %v1346_v1  ;;  %1233 = vmatprep.subr.bf16.mxu1 %v1346_v1  ;;  %v1349_v6 = vld [vmem:[#allocation6 + $0x20] sm:$0xff]   ;;  %v1352_v9 = vld [vmem:[#allocation6 + $0x38] sm:$0xff]   ;;  %v1355_v10 = vld [vmem:[%s1829_s29 + $0x8] sm:$0xff]   ;;  %s1483_s26 = scalar_lea.vmem %s1963_s5, 4096  ;;  %s1581_s10 = smov [#allocation11]  }
  0x8b   : > { %1200 = vmatprep.mubr.bf16.mxu0 %v1353_v4  ;;  %1216 = vmatprep.mubr.bf16.mxu1 %v1354_v5  ;;  %v1356_v11 = vld [vmem:[%s1829_s29 + $0x48] sm:$0xff]   ;;  %v1357_v12 = vld [vmem:[%s1829_s29 + $0x10] sm:$0xff]   ;;  %v1359_v14 = vld [vmem:[%s1829_s29 + $0x18] sm:$0xff]   ;;  %p1484_p13 = scmp.ne.s32.totalorder %s1963_s5, %s1483_s26  ;;  %s1487_s12 = sshll.u32 %s1581_s10, 4  ;;  %s1488_s12 = int_to_ptr.vmem [resolvable:$false] %s1487_s12 }
  0x8c   : > { %v1358_v13 = vld [vmem:[%s1829_s29 + $0x50] sm:$0xff]   ;;  %v1360_v15 = vld [vmem:[%s1829_s29 + $0x58] sm:$0xff]   ;;  %v1361_v16 = vld [vmem:[%s1829_s29 + $0x20] sm:$0xff]   ;;  %s1489_s9 = scalar_lea.vmem %s1488_s12, 8192  ;;  %p1490_p5 = scmp.lt.s32.totalorder %s1963_s5, %s1488_s12 }
  0x8d   : > { %1187 = vmatpush3.bf16.msra.mxu0 %v1346_v1  ;;  %1241 = vmatpush3.bf16.msra.mxu1 %v1346_v1  ;;  %v1362_v17 = vld [vmem:[%s1829_s29 + $0x60] sm:$0xff]   ;;  %v1363_v18 = vld [vmem:[%s1829_s29 + $0x28] sm:$0xff]   ;;  %v1365_v20 = vld [vmem:[%s1829_s29 + $0x30] sm:$0xff]   ;;  %p1485_p6 = pnand %p1484_p13, %p1764_p10  ;;  %p1491_p7 = scmp.lt.s32.totalorder %s1489_s9, %s1483_s26 }
  0x8e   : > { %1188 = vmatprep.subr.bf16.mxu0 %v1347_v2  ;;  %1234 = vmatprep.subr.bf16.mxu1 %v1347_v2  ;;  %v1364_v19 = vld [vmem:[%s1829_s29 + $0x68] sm:$0xff]   ;;  %v1366_v21 = vld [vmem:[%s1829_s29 + $0x70] sm:$0xff]   ;;  %v1367_v22 = vld [vmem:[%s1829_s29 + $0x38] sm:$0xff]  }
  0x8f   : > { %v1368_v23 = vld [vmem:[%s1829_s29 + $0x78] sm:$0xff]   ;;  %v1859_v24 = vld [vmem:[#allocation8] ss:$0 sm:$0xff]  ;;  %v1861_v26 = vld [vmem:[#allocation9] ss:$0 sm:$0xff]  ;;  %p1486_p3 = pneg %p1485_p6  ;;  %p1492_p9 = por %p1491_p7, %p1490_p5 }
  0x91   : > { %1189 = vmatpush3.bf16.msra.mxu0 %v1347_v2  ;;  %1242 = vmatpush3.bf16.msra.mxu1 %v1347_v2  ;;  %p1493_p0 = pnand %p1492_p9, %p1486_p3 }
  0x92   : > { %1190 = vmatprep.subr.bf16.mxu0 %v1348_v3  ;;  %1235 = vmatprep.subr.bf16.mxu1 %v1348_v3 }
  0x95   : > { %1191 = vmatpush3.bf16.msra.mxu0 %v1348_v3  ;;  %1243 = vmatpush3.bf16.msra.mxu1 %v1348_v3 }
  0x96   : > { %1192 = vmatprep.subr.bf16.mxu0 %v1349_v6  ;;  %1236 = vmatprep.subr.bf16.mxu1 %v1349_v6 }
  0x99   : > { %1193 = vmatpush3.bf16.msra.mxu0 %v1349_v6  ;;  %1244 = vmatpush3.bf16.msra.mxu1 %v1349_v6 }
  0x9a   : > { %1194 = vmatprep.subr.bf16.mxu0 %v1350_v7  ;;  %1237 = vmatprep.subr.bf16.mxu1 %v1350_v7 }
  0x9d   : > { %1195 = vmatpush3.bf16.msra.mxu0 %v1350_v7  ;;  %1245 = vmatpush3.bf16.msra.mxu1 %v1350_v7 }
  0x9e   : > { %1196 = vmatprep.subr.bf16.mxu0 %v1351_v8  ;;  %1238 = vmatprep.subr.bf16.mxu1 %v1351_v8 }
  0xa1   : > { %1197 = vmatpush3.bf16.msra.mxu0 %v1351_v8  ;;  %1246 = vmatpush3.bf16.msra.mxu1 %v1351_v8 }
  0xa2   : > { %1198 = vmatprep.subr.bf16.mxu0 %v1352_v9  ;;  %1239 = vmatprep.subr.bf16.mxu1 %v1352_v9 }
  0xa5   : > { %1199 = vmatpush3.bf16.msra.mxu0 %v1352_v9  ;;  %1247 = vmatpush3.bf16.msra.mxu1 %v1352_v9 }
  0xa8   : > { %1201 = vmatmul.mubr.bf16.vlgmr.msra.gmra.mrb[0].mxu0 %v1355_v10  ;;  %1217 = vmatmul.mubr.bf16.vlgmr.msra.gmra.mrb[0].mxu1 %v1356_v11 }
  0xa9   : > { %1204 = vmatprep.mubr.bf16.mxu0 %v1357_v12  ;;  %1220 = vmatprep.mubr.bf16.mxu1 %v1358_v13 }
  0xb0   : > { %1205 = vmatmul.mubr.bf16.gmra.mrb[4].mxu0 %v1359_v14  ;;  %1221 = vmatmul.mubr.bf16.gmra.mrb[4].mxu1 %v1360_v15 }
  0xb1   : > { %1208 = vmatprep.mubr.bf16.mxu0 %v1361_v16  ;;  %1224 = vmatprep.mubr.bf16.mxu1 %v1362_v17 }
  0xb8   : > { %1209 = vmatmul.mubr.bf16.gmra.mrb[8].mxu0 %v1363_v18  ;;  %1225 = vmatmul.mubr.bf16.gmra.mrb[8].mxu1 %v1364_v19 }
  0xb9   : > { %1212 = vmatprep.mubr.bf16.mxu0 %v1365_v20  ;;  %1228 = vmatprep.mubr.bf16.mxu1 %v1366_v21 }
  0xc0   : > { %1213 = vmatmul.mubr.bf16.gmra.mrb[12].mxu0 %v1367_v22  ;;  %1229 = vmatmul.mubr.bf16.gmra.mrb[12].mxu1 %v1368_v23 }
 0x17b   : > { %v1202_v25 = vpop.f32.mrb[0].mxu0  ;;  %v1218_v27 = vpop.f32.mrb[0].mxu1 }
 0x17c   : > { %v838_v28 = vmul.f32 %v1202_v25, %v1859_v24  ;;  %v854_v29 = vmul.f32 %v1218_v27, %v1859_v24  ;;  %v603_v30 = vpop.f32.mrb[1].mxu0  ;;  %v667_v31 = vpop.f32.mrb[1].mxu1 }
 0x17d   : > { %v836_v32 = vmul.f32 %v1859_v24, %v603_v30  ;;  %v852_v33 = vmul.f32 %v1859_v24, %v667_v31  ;;  %v1203_v34 = vpop.f32.mrb[2].mxu0  ;;  %v1219_v35 = vpop.f32.mrb[2].mxu1 }
 0x17e   : > { %v877_v36 = vadd.f32 %v1861_v26, %v838_v28  ;;  %v893_v37 = vadd.f32 %v1861_v26, %v854_v29  ;;  %v839_v38 = vmul.f32 %v1203_v34, %v1859_v24  ;;  %v855_v39 = vmul.f32 %v1219_v35, %v1859_v24  ;;  %v606_v40 = vpop.f32.mrb[3].mxu0  ;;  %v670_v41 = vpop.f32.mrb[3].mxu1 }
 0x17f   : > { %v875_v42 = vadd.f32 %v1861_v26, %v836_v32  ;;  %v891_v43 = vadd.f32 %v1861_v26, %v852_v33  ;;  %v837_v44 = vmul.f32 %v1859_v24, %v606_v40  ;;  %v853_v45 = vmul.f32 %v1859_v24, %v670_v41 }
 0x180   : > { %v909_v46 = vmax.f32 %v877_v36, 0.0  ;;  %v925_v47 = vmax.f32 %v893_v37, 0.0  ;;  %v878_v48 = vadd.f32 %v1861_v26, %v839_v38  ;;  %v894_v49 = vadd.f32 %v1861_v26, %v855_v39 }
 0x181   : > { %v907_v50 = vmax.f32 %v875_v42, 0.0  ;;  %v923_v51 = vmax.f32 %v891_v43, 0.0  ;;  %v876_v52 = vadd.f32 %v1861_v26, %v837_v44  ;;  %v892_v53 = vadd.f32 %v1861_v26, %v853_v45 }
 0x182   : > { %941 = vst [vmem:[%s1880_s25 + $0x10] sm:$0xff] %v909_v46  ;;  %957 = vst [vmem:[%s1880_s25 + $0x90] sm:$0xff] %v925_v47  ;;  %v910_v54 = vmax.f32 %v878_v48, 0.0  ;;  %v926_v55 = vmax.f32 %v894_v49, 0.0 }
 0x183   : > { %939 = vst [vmem:[%s1880_s25] sm:$0xff] %v907_v50  ;;  %955 = vst [vmem:[%s1880_s25 + $0x80] sm:$0xff] %v923_v51  ;;  %v908_v56 = vmax.f32 %v876_v52, 0.0  ;;  %v924_v57 = vmax.f32 %v892_v53, 0.0  ;;  %v1206_v58 = vpop.f32.mrb[4].mxu0  ;;  %v1222_v59 = vpop.f32.mrb[4].mxu1 }
 0x184   : > { %942 = vst [vmem:[%s1880_s25 + $0x18] sm:$0xff] %v910_v54  ;;  %958 = vst [vmem:[%s1880_s25 + $0x98] sm:$0xff] %v926_v55  ;;  %v842_v60 = vmul.f32 %v1206_v58, %v1859_v24  ;;  %v858_v61 = vmul.f32 %v1222_v59, %v1859_v24  ;;  %v619_v62 = vpop.f32.mrb[5].mxu0  ;;  %v683_v63 = vpop.f32.mrb[5].mxu1 }
 0x185   : > { %940 = vst [vmem:[%s1880_s25 + $0x8] sm:$0xff] %v908_v56  ;;  %956 = vst [vmem:[%s1880_s25 + $0x88] sm:$0xff] %v924_v57  ;;  %v840_v0 = vmul.f32 %v1859_v24, %v619_v62  ;;  %v856_v1 = vmul.f32 %v1859_v24, %v683_v63  ;;  %v1207_v2 = vpop.f32.mrb[6].mxu0  ;;  %v1223_v3 = vpop.f32.mrb[6].mxu1 }
 0x186   : > { %v881_v4 = vadd.f32 %v1861_v26, %v842_v60  ;;  %v897_v5 = vadd.f32 %v1861_v26, %v858_v61  ;;  %v843_v6 = vmul.f32 %v1207_v2, %v1859_v24  ;;  %v859_v7 = vmul.f32 %v1223_v3, %v1859_v24  ;;  %v622_v8 = vpop.f32.mrb[7].mxu0  ;;  %v686_v9 = vpop.f32.mrb[7].mxu1 }
 0x187   : > { %v879_v10 = vadd.f32 %v1861_v26, %v840_v0  ;;  %v895_v11 = vadd.f32 %v1861_v26, %v856_v1  ;;  %v841_v12 = vmul.f32 %v1859_v24, %v622_v8  ;;  %v857_v13 = vmul.f32 %v1859_v24, %v686_v9 }
 0x188   : > { %v913_v14 = vmax.f32 %v881_v4, 0.0  ;;  %v929_v15 = vmax.f32 %v897_v5, 0.0  ;;  %v882_v16 = vadd.f32 %v1861_v26, %v843_v6  ;;  %v898_v17 = vadd.f32 %v1861_v26, %v859_v7 }
 0x189   : > { %v911_v18 = vmax.f32 %v879_v10, 0.0  ;;  %v927_v19 = vmax.f32 %v895_v11, 0.0  ;;  %v880_v20 = vadd.f32 %v1861_v26, %v841_v12  ;;  %v896_v21 = vadd.f32 %v1861_v26, %v857_v13 }
 0x18a   : > { %945 = vst [vmem:[%s1880_s25 + $0x30] sm:$0xff] %v913_v14  ;;  %961 = vst [vmem:[%s1880_s25 + $0xb0] sm:$0xff] %v929_v15  ;;  %v914_v22 = vmax.f32 %v882_v16, 0.0  ;;  %v930_v23 = vmax.f32 %v898_v17, 0.0 }
 0x18b   : > { %943 = vst [vmem:[%s1880_s25 + $0x20] sm:$0xff] %v911_v18  ;;  %959 = vst [vmem:[%s1880_s25 + $0xa0] sm:$0xff] %v927_v19  ;;  %v912_v25 = vmax.f32 %v880_v20, 0.0  ;;  %v928_v27 = vmax.f32 %v896_v21, 0.0  ;;  %v1210_v28 = vpop.f32.mrb[8].mxu0  ;;  %v1226_v29 = vpop.f32.mrb[8].mxu1 }
 0x18c   : > { %946 = vst [vmem:[%s1880_s25 + $0x38] sm:$0xff] %v914_v22  ;;  %962 = vst [vmem:[%s1880_s25 + $0xb8] sm:$0xff] %v930_v23  ;;  %v846_v30 = vmul.f32 %v1210_v28, %v1859_v24  ;;  %v862_v31 = vmul.f32 %v1226_v29, %v1859_v24  ;;  %v635_v32 = vpop.f32.mrb[9].mxu0  ;;  %v699_v33 = vpop.f32.mrb[9].mxu1 }
 0x18d   : > { %944 = vst [vmem:[%s1880_s25 + $0x28] sm:$0xff] %v912_v25  ;;  %960 = vst [vmem:[%s1880_s25 + $0xa8] sm:$0xff] %v928_v27  ;;  %v844_v34 = vmul.f32 %v1859_v24, %v635_v32  ;;  %v860_v35 = vmul.f32 %v1859_v24, %v699_v33  ;;  %v1211_v36 = vpop.f32.mrb[10].mxu0  ;;  %v1227_v37 = vpop.f32.mrb[10].mxu1 }
 0x18e   : > { %v885_v38 = vadd.f32 %v1861_v26, %v846_v30  ;;  %v901_v39 = vadd.f32 %v1861_v26, %v862_v31  ;;  %v847_v40 = vmul.f32 %v1211_v36, %v1859_v24  ;;  %v863_v41 = vmul.f32 %v1227_v37, %v1859_v24  ;;  %v638_v42 = vpop.f32.mrb[11].mxu0  ;;  %v702_v43 = vpop.f32.mrb[11].mxu1 }
 0x18f   : > { %v883_v44 = vadd.f32 %v1861_v26, %v844_v34  ;;  %v899_v45 = vadd.f32 %v1861_v26, %v860_v35  ;;  %v845_v46 = vmul.f32 %v1859_v24, %v638_v42  ;;  %v861_v47 = vmul.f32 %v1859_v24, %v702_v43 }
 0x190   : > { %v917_v48 = vmax.f32 %v885_v38, 0.0  ;;  %v933_v49 = vmax.f32 %v901_v39, 0.0  ;;  %v886_v50 = vadd.f32 %v1861_v26, %v847_v40  ;;  %v902_v51 = vadd.f32 %v1861_v26, %v863_v41 }
 0x191   : > { %v915_v52 = vmax.f32 %v883_v44, 0.0  ;;  %v931_v53 = vmax.f32 %v899_v45, 0.0  ;;  %v884_v54 = vadd.f32 %v1861_v26, %v845_v46  ;;  %v900_v55 = vadd.f32 %v1861_v26, %v861_v47 }
 0x192   : > { %949 = vst [vmem:[%s1880_s25 + $0x50] sm:$0xff] %v917_v48  ;;  %965 = vst [vmem:[%s1880_s25 + $0xd0] sm:$0xff] %v933_v49  ;;  %v918_v56 = vmax.f32 %v886_v50, 0.0  ;;  %v934_v57 = vmax.f32 %v902_v51, 0.0 }
 0x193   : > { %947 = vst [vmem:[%s1880_s25 + $0x40] sm:$0xff] %v915_v52  ;;  %963 = vst [vmem:[%s1880_s25 + $0xc0] sm:$0xff] %v931_v53  ;;  %v916_v58 = vmax.f32 %v884_v54, 0.0  ;;  %v932_v59 = vmax.f32 %v900_v55, 0.0  ;;  %v1214_v60 = vpop.f32.mrb[12].mxu0  ;;  %v1230_v61 = vpop.f32.mrb[12].mxu1 }
 0x194   : > { %950 = vst [vmem:[%s1880_s25 + $0x58] sm:$0xff] %v918_v56  ;;  %966 = vst [vmem:[%s1880_s25 + $0xd8] sm:$0xff] %v934_v57  ;;  %v850_v62 = vmul.f32 %v1214_v60, %v1859_v24  ;;  %v866_v63 = vmul.f32 %v1230_v61, %v1859_v24  ;;  %v651_v0 = vpop.f32.mrb[13].mxu0  ;;  %v715_v1 = vpop.f32.mrb[13].mxu1 }
 0x195   : > { %948 = vst [vmem:[%s1880_s25 + $0x48] sm:$0xff] %v916_v58  ;;  %964 = vst [vmem:[%s1880_s25 + $0xc8] sm:$0xff] %v932_v59  ;;  %v848_v2 = vmul.f32 %v1859_v24, %v651_v0  ;;  %v864_v3 = vmul.f32 %v1859_v24, %v715_v1  ;;  %v1215_v4 = vpop.f32.mrb[14].mxu0  ;;  %v1231_v5 = vpop.f32.mrb[14].mxu1 }
 0x196   : > { %v889_v6 = vadd.f32 %v1861_v26, %v850_v62  ;;  %v905_v7 = vadd.f32 %v1861_v26, %v866_v63  ;;  %v851_v8 = vmul.f32 %v1215_v4, %v1859_v24  ;;  %v867_v9 = vmul.f32 %v1231_v5, %v1859_v24  ;;  %v654_v10 = vpop.f32.mrb[15].mxu0  ;;  %v718_v11 = vpop.f32.mrb[15].mxu1 }
 0x197   : > { %v887_v12 = vadd.f32 %v1861_v26, %v848_v2  ;;  %v903_v13 = vadd.f32 %v1861_v26, %v864_v3  ;;  %v849_v14 = vmul.f32 %v1859_v24, %v654_v10  ;;  %v865_v15 = vmul.f32 %v1859_v24, %v718_v11 }
 0x198   : > { %v921_v16 = vmax.f32 %v889_v6, 0.0  ;;  %v937_v17 = vmax.f32 %v905_v7, 0.0  ;;  %v890_v18 = vadd.f32 %v1861_v26, %v851_v8  ;;  %v906_v19 = vadd.f32 %v1861_v26, %v867_v9 }
 0x199   : > { %v919_v20 = vmax.f32 %v887_v12, 0.0  ;;  %v935_v21 = vmax.f32 %v903_v13, 0.0  ;;  %v888_v22 = vadd.f32 %v1861_v26, %v849_v14  ;;  %v904_v24 = vadd.f32 %v1861_v26, %v865_v15 }
 0x19a   : > { %953 = vst [vmem:[%s1880_s25 + $0x70] sm:$0xff] %v921_v16  ;;  %969 = vst [vmem:[%s1880_s25 + $0xf0] sm:$0xff] %v937_v17  ;;  %v922_v23 = vmax.f32 %v890_v18, 0.0  ;;  %v938_v25 = vmax.f32 %v906_v19, 0.0 }
 0x19b   : > { %951 = vst [vmem:[%s1880_s25 + $0x60] sm:$0xff] %v919_v20  ;;  %967 = vst [vmem:[%s1880_s25 + $0xe0] sm:$0xff] %v935_v21  ;;  %v920_v27 = vmax.f32 %v888_v22, 0.0  ;;  %v936_v28 = vmax.f32 %v904_v24, 0.0 }
 0x19c   : > { %954 = vst [vmem:[%s1880_s25 + $0x78] sm:$0xff] %v922_v23  ;;  %970 = vst [vmem:[%s1880_s25 + $0xf8] sm:$0xff] %v938_v25 }
 0x19d   : > { %952 = vst [vmem:[%s1880_s25 + $0x68] sm:$0xff] %v920_v27  ;;  %968 = vst [vmem:[%s1880_s25 + $0xe8] sm:$0xff] %v936_v28 }
 0x19e   : > { %1496 = shalt.err (!%p1493_p0)
}
 0x19f   : > { %s1497_s13 = scalar_lea.hbm %s1961_s24, 4096  ;;  %s1501_s28 = scalar_lea.hbm %s2022_s4, 8192 }
 0x1a0   : > { %p1498_p4 = scmp.ne.s32.totalorder %s1961_s24, %s1497_s13  ;;  %p1502_p12 = scmp.lt.u32.totalorder %s1961_s24, %s2022_s4 }
 0x1a1   : > { %p1503_p1 = scmp.lt.u32.totalorder %s1501_s28, %s1497_s13  ;;  %p1505_p13 = scmp.lt.u32.totalorder %s1497_s13, %s1961_s24 }
 0x1a2   : > { %p1499_p2 = pnand %p1498_p4, %p1764_p10 }
 0x1a3   : > { %p1504_p11 = por %p1503_p1, %p1502_p12 }
 0x1a4   : > { %p1500_p8 = pneg %p1499_p2 }
 0x1a5   : > { %p1506_p6 = por %p1505_p13, %p1504_p11 }
 0x1a7   : > { %p1507_p3 = pnand %p1506_p6, %p1500_p8 }
 0x1a9   : > { %1510 = shalt.err (!%p1507_p3)
}
 0x1aa   : > { %s1582_s25 = smov 128   ;;  %s1583_s27 = smov 8  }
 0x1ab   : > { %1262 = dma.vmem_to_hbm [thread:$0]  (%p1764_p10), %s1963_s5, 4096, %s1961_s24, %s972_s6, %s1582_s25, %s1582_s25, %s1583_s27  }
 0x1ac PF: > { %s2042_s18 = sld [smem:[#allocation16_spill]]  ;;  %s1001_s7 = sand.u32 1, %s1553_s15  }
 0x1ad   : > { %p2044_p7 = scmp.ge.s32.totalorder %s1573_s20, 2  ;;  %s1002_s26 = scalar_lea.sflag [#allocation5], %s1001_s7 }
 0x1b2   : > { %p2043_p5 = scmp.ne.s32.totalorder %s2042_s18, 0 }
 0x1b4   : > { %p1279_p9 = pnand %p2044_p7, %p2043_p5 }
 0x1b6   : > { %1548 = dma.done.wait (!%p1279_p9), %s1002_s26, 4096  }
 0x1b7   : > { %1550 = vsyncadd (!%p1279_p9), %s1002_s26, 4294963200  ;;  %s22_s20 = sadd.s32 1, %s1573_s20   ;;  %s2045_s15 = smov %s1557_s16 }
 0x1b8   : > { %p19_p0 = scmp.ge.s32.totalorder %s22_s20, 4   ;;  %s2046_s16 = smov %s1561_s17 }
 0x1b9   : > { %s2047_s17 = smov %s1776_s22  ;;  %s2048_s18 = smov %s1569_s19 }
 0x1ba   : > { %s2049_s19 = smov %s2051_s11  ;;  %21 = sbr.rel (!%p19_p0) target bundleno = 8 (0x8), region = 104 }
 0x1c1   :  { %1007 = vsyncpa [#allocation4], 1 }
 0x1c2   :  { %1009 = vsyncpa [#allocation4 + $0x1], 1 }
 0x1c3   :  { %1010 = vsyncpa [#allocation7], 1 }
 0x1c4   :  { %1011 = vsyncpa [#allocation10], 1 }
 0x1c5   :  { %1012 = vsyncpa [#allocation5], 1 }
 0x1c6   :  { %1014 = vsyncpa [#allocation5 + $0x1], 1 }

// kernel: espcn_forward.9
= control target key start
LH: loop header
LB: loop body
LE: loop exit
PB: predicated region body
PF: predicated region fallthrough
CT: control target
= control target key end

     0   :  { %9 = vsyncpa [#allocation4], 0  ;;  %s823_s0 = inlined_call_operand.hbm [shape: bf16[128,128], index: 0, kind: input, shape index: {}]   ;;  %s824_s1 = inlined_call_operand.hbm [shape: bf16[128,128], index: 1, kind: input, shape index: {}]   ;;  %s825_s2 = inlined_call_operand.hbm [shape: f32[1,128], index: 2, kind: input, shape index: {}]   ;;  %s826_s3 = inlined_call_operand.hbm [shape: f32[1,128], index: 3, kind: input, shape index: {}]   ;;  %s827_s4 = inlined_call_operand.hbm [shape: f32[128,128], index: 4, kind: output, shape index: {}]  }
   0x1   :  { %10 = vsyncpa [#allocation7], 0 }
   0x2   :  { %11 = vsyncpa [#allocation10], 0 }
   0x3   :  { %12 = vsyncpa [#allocation5], 0  ;;  %s704_s15 = smov [#allocation6]   ;;  %s705_s17 = smov [#allocation3]  }
   0x4   :  { %s30_s16 = sshll.u32 %s704_s15, 4  ;;  %s18_s18 = sshll.u32 %s705_s17, 4  ;;  %s31_s16 = int_to_ptr.vmem [resolvable:$true] %s30_s16  ;;  %s738_s18 = int_to_ptr.vmem [resolvable:$true] %s18_s18 }
   0x5   :  { %s586_s21 = scalar_lea.hbm %s824_s1, 1024 }
   0x6   :  { %p587_p0 = scmp.ne.s32.totalorder %s824_s1, %s586_s21  ;;  %p590_p1 = scmp.lt.u32.totalorder %s586_s21, %s824_s1 }
   0x8   :  { %p592_p2 = pnand %p590_p1, %p587_p0 }
   0xa   :  { %595 = shalt.err (!%p592_p2)
}
   0xb   :  { %s596_s26 = scalar_lea.vmem %s31_s16, 1024  ;;  %p601_p4 = scmp.lt.s32.totalorder %s31_s16, %s31_s16 }
   0xc   :  { %p597_p3 = scmp.ne.s32.totalorder %s31_s16, %s596_s26  ;;  %p602_p5 = scmp.lt.s32.totalorder %s596_s26, %s596_s26 }
   0xe   :  { %p603_p6 = por %p602_p5, %p601_p4 }
  0x10   :  { %p604_p7 = pnand %p603_p6, %p597_p3 }
  0x12   :  { %607 = shalt.err (!%p604_p7)
}
  0x13   :  { %s706_s27 = smov 64   ;;  %s707_s28 = smov 4  }
  0x14   :  { %36 = dma.hbm_to_vmem [thread:$0]  %s824_s1, 1024, %s31_s16, [#allocation7], %s706_s27, %s706_s27, %s707_s28  }
  0x15   :  { %s608_s7 = scalar_lea.hbm %s823_s0, 1024 }
  0x16   :  { %p609_p8 = scmp.ne.s32.totalorder %s823_s0, %s608_s7  ;;  %p612_p9 = scmp.lt.u32.totalorder %s608_s7, %s823_s0 }
  0x18   :  { %p614_p10 = pnand %p612_p9, %p609_p8 }
  0x1a   :  { %617 = shalt.err (!%p614_p10)
}
  0x1b   :  { %s618_s12 = scalar_lea.vmem %s738_s18, 1024  ;;  %p623_p12 = scmp.lt.s32.totalorder %s738_s18, %s738_s18 }
  0x1c   :  { %p619_p11 = scmp.ne.s32.totalorder %s738_s18, %s618_s12  ;;  %p624_p13 = scmp.lt.s32.totalorder %s618_s12, %s618_s12 }
  0x1e   :  { %p625_p0 = por %p624_p13, %p623_p12 }
  0x20   :  { %p626_p1 = pnand %p625_p0, %p619_p11 }
  0x22   :  { %629 = shalt.err (!%p626_p1)
}
  0x23   :  { %24 = dma.hbm_to_vmem [thread:$0]  %s823_s0, 1024, %s738_s18, [#allocation4], %s706_s27, %s706_s27, %s707_s28  }
  0x24   :  { %s708_s14 = smov [#allocation8]   ;;  %s709_s16 = smov [#allocation9]  }
  0x25   :  { %s43_s15 = sshll.u32 %s708_s14, 4  ;;  %s53_s17 = sshll.u32 %s709_s16, 4  ;;  %s44_s15 = int_to_ptr.vmem [resolvable:$true] %s43_s15  ;;  %s54_s17 = int_to_ptr.vmem [resolvable:$true] %s53_s17 }
  0x26   :  { %s630_s21 = scalar_lea.hbm %s825_s2, 16 }
  0x27   :  { %p631_p2 = scmp.ne.s32.totalorder %s825_s2, %s630_s21  ;;  %p634_p3 = scmp.lt.u32.totalorder %s630_s21, %s825_s2 }
  0x29   :  { %p636_p4 = pnand %p634_p3, %p631_p2 }
  0x2b   :  { %639 = shalt.err (!%p636_p4)
}
  0x2c   :  { %s640_s0 = scalar_lea.vmem %s44_s15, 16  ;;  %s644_s18 = scalar_lea.vmem %s44_s15, 32 }
  0x2d   :  { %p641_p5 = scmp.ne.s32.totalorder %s44_s15, %s640_s0  ;;  %p645_p6 = scmp.lt.s32.totalorder %s44_s15, %s44_s15 }
  0x2e   :  { %p646_p7 = scmp.lt.s32.totalorder %s644_s18, %s640_s0 }
  0x30   :  { %p647_p8 = por %p646_p7, %p645_p6 }
  0x32   :  { %p648_p9 = pnand %p647_p8, %p641_p5 }
  0x34   :  { %651 = shalt.err (!%p648_p9)
}
  0x35   :  { %46 = dma.hbm_to_vmem [thread:$0]  %s825_s2, 16, %s44_s15, [#allocation7]  }
  0x36   :  { %s652_s30 = scalar_lea.hbm %s826_s3, 16 }
  0x37   :  { %p653_p10 = scmp.ne.s32.totalorder %s826_s3, %s652_s30  ;;  %p656_p11 = scmp.lt.u32.totalorder %s652_s30, %s826_s3 }
  0x39   :  { %p658_p12 = pnand %p656_p11, %p653_p10 }
  0x3b   :  { %661 = shalt.err (!%p658_p12)
}
  0x3c   :  { %s662_s9 = scalar_lea.vmem %s54_s17, 16  ;;  %s666_s10 = scalar_lea.vmem %s54_s17, 32 }
  0x3d   :  { %p663_p13 = scmp.ne.s32.totalorder %s54_s17, %s662_s9  ;;  %p667_p0 = scmp.lt.s32.totalorder %s54_s17, %s54_s17 }
  0x3e   :  { %p668_p1 = scmp.lt.s32.totalorder %s666_s10, %s662_s9 }
  0x40   :  { %p669_p2 = por %p668_p1, %p667_p0 }
  0x42   :  { %p670_p3 = pnand %p669_p2, %p663_p13 }
  0x44   :  { %673 = shalt.err (!%p670_p3)
}
  0x45   :  { %56 = dma.hbm_to_vmem [thread:$0]  %s826_s3, 16, %s54_s17, [#allocation10]  }
  0x46   :  { %696 = dma.done.wait [#allocation4], 1024  }
  0x47   :  { %697 = vsyncadd [#allocation4], 4294966272 }
  0x48   :  { %698 = dma.done.wait [#allocation7], 1040  }
  0x49   :  { %699 = vsyncadd [#allocation7], 4294966256 }
  0x4a   :  { %700 = dma.done.wait [#allocation10], 16  }
  0x4b   :  { %701 = vsyncadd [#allocation10], 4294967280  ;;  %v570_v0 = vld [vmem:[#allocation6] sm:$0xff]   ;;  %v571_v1 = vld [vmem:[#allocation6 + $0x8] sm:$0xff]   ;;  %s710_s3 = smov [#allocation11]  }
  0x4c   :  { %513 = vmatprep.subr.bf16.mxu0 %v570_v0  ;;  %545 = vmatprep.subr.bf16.mxu1 %v570_v0  ;;  %v572_v2 = vld [vmem:[#allocation6 + $0x10] sm:$0xff]   ;;  %v573_v3 = vld [vmem:[#allocation6 + $0x18] sm:$0xff]   ;;  %v578_v4 = vld [vmem:[#allocation3] sm:$0xff]   ;;  %s465_s12 = sshll.u32 %s710_s3, 4  ;;  %s466_s12 = int_to_ptr.vmem [resolvable:$true] %s465_s12 }
  0x4d   :  { %514 = vmatpush3.bf16.msra.mxu0 %v570_v0  ;;  %553 = vmatpush3.bf16.msra.mxu1 %v570_v0  ;;  %v579_v5 = vld [vmem:[#allocation3 + $0x20] sm:$0xff]   ;;  %v575_v7 = vld [vmem:[#allocation6 + $0x28] sm:$0xff]   ;;  %v576_v8 = vld [vmem:[#allocation6 + $0x30] sm:$0xff]   ;;  %s674_s1 = scalar_lea.vmem %s466_s12, 2048  ;;  %p679_p5 = scmp.lt.s32.totalorder %s466_s12, %s466_s12 }
  0x4e   :  { %515 = vmatprep.subr.bf16.mxu0 %v571_v1  ;;  %546 = vmatprep.subr.bf16.mxu1 %v571_v1  ;;  %v574_v6 = vld [vmem:[#allocation6 + $0x20] sm:$0xff]   ;;  %v577_v9 = vld [vmem:[#allocation6 + $0x38] sm:$0xff]   ;;  %v580_v10 = vld [vmem:[#allocation3 + $0x8] sm:$0xff]   ;;  %p675_p4 = scmp.ne.s32.totalorder %s466_s12, %s674_s1  ;;  %p680_p6 = scmp.lt.s32.totalorder %s674_s1, %s674_s1 }
  0x4f   :  { %529 = vmatprep.mubr.bf16.mxu0 %v578_v4  ;;  %537 = vmatprep.mubr.bf16.mxu1 %v579_v5  ;;  %v581_v11 = vld [vmem:[#allocation3 + $0x28] sm:$0xff]   ;;  %v582_v12 = vld [vmem:[#allocation3 + $0x10] sm:$0xff]   ;;  %v584_v14 = vld [vmem:[#allocation3 + $0x18] sm:$0xff]  }
  0x50   :  { %v583_v13 = vld [vmem:[#allocation3 + $0x30] sm:$0xff]   ;;  %v585_v15 = vld [vmem:[#allocation3 + $0x38] sm:$0xff]   ;;  %v495_v16 = vld [vmem:[#allocation8] ss:$0 sm:$0xff]  ;;  %p681_p7 = por %p680_p6, %p679_p5 }
  0x51   :  { %516 = vmatpush3.bf16.msra.mxu0 %v571_v1  ;;  %554 = vmatpush3.bf16.msra.mxu1 %v571_v1  ;;  %v793_v18 = vld [vmem:[#allocation9] ss:$0 sm:$0xff] }
  0x52   :  { %517 = vmatprep.subr.bf16.mxu0 %v572_v2  ;;  %547 = vmatprep.subr.bf16.mxu1 %v572_v2  ;;  %p682_p8 = pnand %p681_p7, %p675_p4 }
  0x55   :  { %518 = vmatpush3.bf16.msra.mxu0 %v572_v2  ;;  %555 = vmatpush3.bf16.msra.mxu1 %v572_v2 }
  0x56   :  { %519 = vmatprep.subr.bf16.mxu0 %v573_v3  ;;  %548 = vmatprep.subr.bf16.mxu1 %v573_v3 }
  0x59   :  { %520 = vmatpush3.bf16.msra.mxu0 %v573_v3  ;;  %556 = vmatpush3.bf16.msra.mxu1 %v573_v3 }
  0x5a   :  { %521 = vmatprep.subr.bf16.mxu0 %v574_v6  ;;  %549 = vmatprep.subr.bf16.mxu1 %v574_v6 }
  0x5d   :  { %522 = vmatpush3.bf16.msra.mxu0 %v574_v6  ;;  %557 = vmatpush3.bf16.msra.mxu1 %v574_v6 }
  0x5e   :  { %523 = vmatprep.subr.bf16.mxu0 %v575_v7  ;;  %550 = vmatprep.subr.bf16.mxu1 %v575_v7 }
  0x61   :  { %524 = vmatpush3.bf16.msra.mxu0 %v575_v7  ;;  %558 = vmatpush3.bf16.msra.mxu1 %v575_v7 }
  0x62   :  { %525 = vmatprep.subr.bf16.mxu0 %v576_v8  ;;  %551 = vmatprep.subr.bf16.mxu1 %v576_v8 }
  0x65   :  { %526 = vmatpush3.bf16.msra.mxu0 %v576_v8  ;;  %559 = vmatpush3.bf16.msra.mxu1 %v576_v8 }
  0x66   :  { %527 = vmatprep.subr.bf16.mxu0 %v577_v9  ;;  %552 = vmatprep.subr.bf16.mxu1 %v577_v9 }
  0x69   :  { %528 = vmatpush3.bf16.msra.mxu0 %v577_v9  ;;  %560 = vmatpush3.bf16.msra.mxu1 %v577_v9 }
  0x6c   :  { %530 = vmatmul.mubr.bf16.vlgmr.msra.gmra.mrb[0].mxu0 %v580_v10  ;;  %538 = vmatmul.mubr.bf16.vlgmr.msra.gmra.mrb[0].mxu1 %v581_v11 }
  0x6d   :  { %533 = vmatprep.mubr.bf16.mxu0 %v582_v12  ;;  %541 = vmatprep.mubr.bf16.mxu1 %v583_v13 }
  0x74   :  { %534 = vmatmul.mubr.bf16.gmra.mrb[4].mxu0 %v584_v14  ;;  %542 = vmatmul.mubr.bf16.gmra.mrb[4].mxu1 %v585_v15 }
 0x13f   :  { %v531_v17 = vpop.f32.mrb[0].mxu0  ;;  %v539_v19 = vpop.f32.mrb[0].mxu1 }
 0x140   :  { %v391_v20 = vmul.f32 %v531_v17, %v495_v16  ;;  %v399_v21 = vmul.f32 %v539_v19, %v495_v16  ;;  %v268_v22 = vpop.f32.mrb[1].mxu0  ;;  %v300_v23 = vpop.f32.mrb[1].mxu1 }
 0x141   :  { %v389_v24 = vmul.f32 %v495_v16, %v268_v22  ;;  %v397_v25 = vmul.f32 %v495_v16, %v300_v23  ;;  %v532_v26 = vpop.f32.mrb[2].mxu0  ;;  %v540_v27 = vpop.f32.mrb[2].mxu1 }
 0x142   :  { %v414_v28 = vadd.f32 %v793_v18, %v391_v20  ;;  %v422_v29 = vadd.f32 %v793_v18, %v399_v21  ;;  %v392_v30 = vmul.f32 %v532_v26, %v495_v16  ;;  %v400_v31 = vmul.f32 %v540_v27, %v495_v16  ;;  %v271_v32 = vpop.f32.mrb[3].mxu0  ;;  %v303_v33 = vpop.f32.mrb[3].mxu1 }
 0x143   :  { %v412_v34 = vadd.f32 %v793_v18, %v389_v24  ;;  %v420_v35 = vadd.f32 %v793_v18, %v397_v25  ;;  %v390_v36 = vmul.f32 %v495_v16, %v271_v32  ;;  %v398_v37 = vmul.f32 %v495_v16, %v303_v33 }
 0x144   :  { %v430_v38 = vmax.f32 %v414_v28, 0.0  ;;  %v438_v39 = vmax.f32 %v422_v29, 0.0  ;;  %v415_v40 = vadd.f32 %v793_v18, %v392_v30  ;;  %v423_v41 = vadd.f32 %v793_v18, %v400_v31 }
 0x145   :  { %v428_v42 = vmax.f32 %v412_v34, 0.0  ;;  %v436_v43 = vmax.f32 %v420_v35, 0.0  ;;  %v413_v44 = vadd.f32 %v793_v18, %v390_v36  ;;  %v421_v45 = vadd.f32 %v793_v18, %v398_v37 }
 0x146   :  { %446 = vst [vmem:[#allocation11 + $0x10] sm:$0xff] %v430_v38  ;;  %454 = vst [vmem:[#allocation11 + $0x50] sm:$0xff] %v438_v39  ;;  %v431_v46 = vmax.f32 %v415_v40, 0.0  ;;  %v439_v47 = vmax.f32 %v423_v41, 0.0 }
 0x147   :  { %444 = vst [vmem:[#allocation11] sm:$0xff] %v428_v42  ;;  %452 = vst [vmem:[#allocation11 + $0x40] sm:$0xff] %v436_v43  ;;  %v429_v48 = vmax.f32 %v413_v44, 0.0  ;;  %v437_v49 = vmax.f32 %v421_v45, 0.0  ;;  %v535_v50 = vpop.f32.mrb[4].mxu0  ;;  %v543_v51 = vpop.f32.mrb[4].mxu1 }
 0x148   :  { %447 = vst [vmem:[#allocation11 + $0x18] sm:$0xff] %v431_v46  ;;  %455 = vst [vmem:[#allocation11 + $0x58] sm:$0xff] %v439_v47  ;;  %v395_v52 = vmul.f32 %v535_v50, %v495_v16  ;;  %v403_v53 = vmul.f32 %v543_v51, %v495_v16  ;;  %v284_v54 = vpop.f32.mrb[5].mxu0  ;;  %v316_v55 = vpop.f32.mrb[5].mxu1 }
 0x149   :  { %445 = vst [vmem:[#allocation11 + $0x8] sm:$0xff] %v429_v48  ;;  %453 = vst [vmem:[#allocation11 + $0x48] sm:$0xff] %v437_v49  ;;  %v393_v56 = vmul.f32 %v495_v16, %v284_v54  ;;  %v401_v57 = vmul.f32 %v495_v16, %v316_v55  ;;  %v536_v58 = vpop.f32.mrb[6].mxu0  ;;  %v544_v59 = vpop.f32.mrb[6].mxu1 }
 0x14a   :  { %v418_v60 = vadd.f32 %v793_v18, %v395_v52  ;;  %v426_v61 = vadd.f32 %v793_v18, %v403_v53  ;;  %v396_v62 = vmul.f32 %v536_v58, %v495_v16  ;;  %v404_v63 = vmul.f32 %v544_v59, %v495_v16  ;;  %v287_v0 = vpop.f32.mrb[7].mxu0  ;;  %v319_v1 = vpop.f32.mrb[7].mxu1 }
 0x14b   :  { %v416_v2 = vadd.f32 %v793_v18, %v393_v56  ;;  %v424_v3 = vadd.f32 %v793_v18, %v401_v57  ;;  %v394_v4 = vmul.f32 %v495_v16, %v287_v0  ;;  %v402_v5 = vmul.f32 %v495_v16, %v319_v1 }
 0x14c   :  { %v434_v6 = vmax.f32 %v418_v60, 0.0  ;;  %v442_v7 = vmax.f32 %v426_v61, 0.0  ;;  %v419_v8 = vadd.f32 %v793_v18, %v396_v62  ;;  %v427_v9 = vadd.f32 %v793_v18, %v404_v63 }
 0x14d   :  { %v432_v10 = vmax.f32 %v416_v2, 0.0  ;;  %v440_v11 = vmax.f32 %v424_v3, 0.0  ;;  %v417_v12 = vadd.f32 %v793_v18, %v394_v4  ;;  %v425_v13 = vadd.f32 %v793_v18, %v402_v5 }
 0x14e   :  { %450 = vst [vmem:[#allocation11 + $0x30] sm:$0xff] %v434_v6  ;;  %458 = vst [vmem:[#allocation11 + $0x70] sm:$0xff] %v442_v7  ;;  %v435_v14 = vmax.f32 %v419_v8, 0.0  ;;  %v443_v15 = vmax.f32 %v427_v9, 0.0 }
 0x14f   :  { %448 = vst [vmem:[#allocation11 + $0x20] sm:$0xff] %v432_v10  ;;  %456 = vst [vmem:[#allocation11 + $0x60] sm:$0xff] %v440_v11  ;;  %v433_v16 = vmax.f32 %v417_v12, 0.0  ;;  %v441_v17 = vmax.f32 %v425_v13, 0.0 }
 0x150   :  { %451 = vst [vmem:[#allocation11 + $0x38] sm:$0xff] %v435_v14  ;;  %459 = vst [vmem:[#allocation11 + $0x78] sm:$0xff] %v443_v15 }
 0x151   :  { %449 = vst [vmem:[#allocation11 + $0x28] sm:$0xff] %v433_v16  ;;  %457 = vst [vmem:[#allocation11 + $0x68] sm:$0xff] %v441_v17 }
 0x152   :  { %685 = shalt.err (!%p682_p8)
}
 0x153   :  { %s686_s15 = scalar_lea.hbm %s827_s4, 2048 }
 0x154   :  { %p687_p9 = scmp.ne.s32.totalorder %s827_s4, %s686_s15  ;;  %p690_p10 = scmp.lt.u32.totalorder %s686_s15, %s827_s4 }
 0x156   :  { %p692_p11 = pnand %p690_p10, %p687_p9 }
 0x158   :  { %695 = shalt.err (!%p692_p11)
}
 0x159   :  { %s711_s21 = smov 128   ;;  %s712_s22 = smov 8  }
 0x15a   :  { %471 = dma.vmem_to_hbm [thread:$0]  %s466_s12, 2048, %s827_s4, [#allocation5], %s711_s21, %s711_s21, %s712_s22  }
 0x15b   :  { %702 = dma.done.wait [#allocation5], 2048  }
 0x15c   :  { %703 = vsyncadd [#allocation5], 4294965248 }
 0x15d   :  { %475 = vsyncpa [#allocation4], 1 }
 0x15e   :  { %476 = vsyncpa [#allocation7], 1 }
 0x15f   :  { %477 = vsyncpa [#allocation10], 1 }
 0x160   :  { %478 = vsyncpa [#allocation5], 1 }

</bundles_post_ra>
